<compile_context>
chip_gen: v7x
topology: tpu7x:2x2x1
jax: 0.10.0
libtpu: 0.0.40
codegen_flags: <defaults>
</compile_context>

<pallas_src>
import jax
import jax.numpy as jnp
from jax.experimental import pallas as pl
from jax.experimental.pallas import tpu as pltpu

# ---- small synthetic problem sizes consistent with the module ----
B, Z, X, Y = 2, 8, 16, 16          # batch, voxel grid dims (z, x, y)
P = 16                             # number of points per cloud
KZ, KX, KY = 3, 3, 3               # GENEO kernel size (odd -> 'same' padding)
GENEO_NUM = {"cy": 2, "cone": 1, "neg": 1}   # geneo_num mapping
NUM_OBSERVERS = 2
G = sum(GENEO_NUM.values())        # total geneo kernels (4)
O = NUM_OBSERVERS                  # observers (2)
C = G + O                          # fused conv channels (observers folded in)
FEAT = 3 + 2 * C                   # per-point feature width (15)
TAPS = KZ * KX * KY                # 27

PZ, PX, PY = KZ // 2, KX // 2, KY // 2
XY = X * Y                         # 256 -> lane-dense minor dimension
PADC = 32                          # zero margin on the flattened (x,y) axis (>= X*PY+PX... >= 17)
XPAD = XY + 2 * PADC               # 320
ZPAD = Z + 2 * PZ                  # 10


# --------------------------------------------------------------------------
# Fused Pallas kernel: conv (observers folded in) + point gather + assembly.
# --------------------------------------------------------------------------
def _scenenet_fused_kernel(w_ref, vox_ref, zidx_ref, cidx_ref, ploc_ref,
                           out_ref, pad_ref):
    # w_ref   : SMEM (C*TAPS,)   fused conv weights [geneos ; lambda @ geneos]
    # vox_ref : VMEM (1, Z, XY)  voxel grid of one batch, lane-dense layout
    # zidx_ref: VMEM (1, P, 1)   int32 z voxel index per point
    # cidx_ref: VMEM (1, P, 1)   int32 flattened x*Y+y voxel index per point
    # ploc_ref: VMEM (1, P, 3)   point coordinates
    # out_ref : VMEM (1, P, FEAT)
    # pad_ref : VMEM (ZPAD, XPAD) scratch: zero-padded voxel grid

    # ---- in-kernel zero padding (no padded HBM array) ---------------------
    pad_ref[...] = jnp.zeros((ZPAD, XPAD), jnp.float32)
    pad_ref[PZ:PZ + Z, PADC:PADC + XY] = vox_ref[0]

    # ---- 27-tap GENEO conv on the flattened (Z, X*Y) layout ---------------
    # z / x boundaries are handled by the zero margins of pad_ref; the only
    # masking needed is for the y wrap-around between adjacent x rows.
    col = jax.lax.broadcasted_iota(jnp.int32, (Z, XY), 1)
    ymod = col % Y
    y_ok = {-1: ymod >= 1, 0: None, 1: ymod <= Y - 2}

    accs = [jnp.zeros((Z, XY), jnp.float32) for _ in range(C)]
    for dz in range(KZ):
        for dx in range(KX):
            for dy in range(KY):
                oz, ox, oy = dz - PZ, dx - PX, dy - PY
                c0 = PADC + ox * Y + oy
                plane = pad_ref[PZ + oz:PZ + oz + Z, c0:c0 + XY]   # (Z, XY)
                if y_ok[oy] is not None:
                    plane = jnp.where(y_ok[oy], plane, 0.0)
                t = (dz * KX + dx) * KY + dy
                for c in range(C):
                    accs[c] = accs[c] + w_ref[c * TAPS + t] * plane

    # ---- gather conv values at the P point voxels (one-hot + MXU) ---------
    zidx = zidx_ref[0]                                   # (P, 1) int32
    cidx = cidx_ref[0]                                   # (P, 1) int32
    ploc = ploc_ref[0]                                   # (P, 3) f32

    ohz = (jax.lax.broadcasted_iota(jnp.int32, (P, Z), 1) == zidx
           ).astype(jnp.float32)                         # (P, Z)
    ohc = (jax.lax.broadcasted_iota(jnp.int32, (P, XY), 1) == cidx
           ).astype(jnp.float32)                         # (P, XY)

    gcol = jax.lax.broadcasted_iota(jnp.int32, (P, C), 1)
    gat = jnp.zeros((P, C), jnp.float32)
    for c in range(C):
        rows = jnp.dot(ohz, accs[c], preferred_element_type=jnp.float32)  # (P, XY)
        val = jnp.sum(rows * ohc, axis=1, keepdims=True)                  # (P, 1)
        gat = jnp.where(gcol == c, jnp.broadcast_to(val, (P, C)), gat)

    # global max over points (== torch.max_pool1d(kernel_size=num_points))
    gmaxb = jnp.broadcast_to(jnp.max(gat, axis=0, keepdims=True), (P, C))

    # ---- assemble [pt_loc | per-point feats | global max] in registers ----
    # exact 0/1 placement matmuls -> one wide store instead of many narrow ones
    def _placer(k, off):
        r = jax.lax.broadcasted_iota(jnp.int32, (k, FEAT), 0)
        cc = jax.lax.broadcasted_iota(jnp.int32, (k, FEAT), 1)
        return (cc == r + off).astype(jnp.float32)

    out = (jnp.dot(ploc, _placer(3, 0), preferred_element_type=jnp.float32)
           + jnp.dot(gat, _placer(C, 3), preferred_element_type=jnp.float32)
           + jnp.dot(gmaxb, _placer(C, 3 + C), preferred_element_type=jnp.float32))
    out_ref[0] = out


# --------------------------------------------------------------------------
# Wrapper: full SceneNet GENEO-layer forward in a single pallas_call.
# --------------------------------------------------------------------------
def scenenet_forward(x, pt_loc, weights, lambdas):
    """x (B,Z,X,Y), pt_loc (B,P,3) in [0,1), weights (G,KZ,KX,KY), lambdas (O,G)."""
    # host-side: fold the observer convex combination into the conv weights
    w2 = weights.reshape(G, TAPS).astype(jnp.float32)
    w_fused = jnp.concatenate(
        [w2, lambdas.astype(jnp.float32) @ w2], axis=0)          # (C, TAPS)
    w_flat = w_fused.reshape(-1)

    # lane-dense (Z, X*Y) layout — pure metadata reshape, no HBM copy
    vflat = x.astype(jnp.float32).reshape(B, Z, XY)

    # voxel index of every point (Vox.vox_to_pts convention: floor(coord*dim))
    dims = jnp.array([Z, X, Y], jnp.float32)
    idx = jnp.clip(jnp.floor(pt_loc.astype(jnp.float32) * dims),
                   0.0, dims - 1.0).astype(jnp.int32)            # (B, P, 3)
    zidx = idx[..., 0:1]                                         # (B, P, 1)
    cidx = (idx[..., 1] * Y + idx[..., 2])[..., None]            # (B, P, 1)

    return pl.pallas_call(
        _scenenet_fused_kernel,
        out_shape=jax.ShapeDtypeStruct((B, P, FEAT), jnp.float32),
        grid_spec=pltpu.PrefetchScalarGridSpec(
            num_scalar_prefetch=0,
            grid=(B,),
            in_specs=[
                pl.BlockSpec(memory_space=pltpu.MemorySpace.SMEM),      # weights
                pl.BlockSpec((1, Z, XY), lambda b: (b, 0, 0)),          # voxels
                pl.BlockSpec((1, P, 1), lambda b: (b, 0, 0)),           # z idx
                pl.BlockSpec((1, P, 1), lambda b: (b, 0, 0)),           # x*Y+y idx
                pl.BlockSpec((1, P, 3), lambda b: (b, 0, 0)),           # pt_loc
            ],
            out_specs=pl.BlockSpec((1, P, FEAT), lambda b: (b, 0, 0)),
            scratch_shapes=[pltpu.VMEM((ZPAD, XPAD), jnp.float32)],
        ),
        compiler_params=pltpu.CompilerParams(
            dimension_semantics=("parallel",)),
    )(w_flat, vflat, zidx, cidx, pt_loc.astype(jnp.float32))


# --------------------------------------------------------------------------
# Pure-JAX reference (for the correctness check)
# --------------------------------------------------------------------------
def _vox_to_pts_ref(vox, pt_loc):
    dims = jnp.array([Z, X, Y], jnp.float32)
    idx = jnp.clip(jnp.floor(pt_loc * dims), 0.0, dims - 1.0).astype(jnp.int32)

    def per_batch(v, ix):                 # v: (C,Z,X,Y), ix: (P,3)
        return v[:, ix[:, 0], ix[:, 1], ix[:, 2]].T              # (P, C)

    return jax.vmap(per_batch)(vox, idx)


def reference_forward(x, pt_loc, weights, lambdas):
    conv = jax.lax.conv_general_dilated(
        x[:, None].astype(jnp.float32),
        weights[:, None].astype(jnp.float32),        # (G, 1, KZ, KX, KY) — 5-D rhs
        window_strides=(1, 1, 1), padding="SAME",
        dimension_numbers=("NCDHW", "OIDHW", "NCDHW"))           # (B,G,Z,X,Y)
    obs = jnp.einsum("og,bgzxy->bozxy", lambdas, conv)           # (B,O,Z,X,Y)
    conv_pts = _vox_to_pts_ref(conv, pt_loc)                     # (B,P,G)
    obs_pts = _vox_to_pts_ref(obs, pt_loc)                       # (B,P,O)
    feats = jnp.concatenate([conv_pts, obs_pts], axis=-1)
    gmax = jnp.max(feats, axis=1, keepdims=True)
    return jnp.concatenate(
        [pt_loc, feats, jnp.broadcast_to(gmax, (B, P, G + O))], axis=-1)


if __name__ == "__main__":
    key = jax.random.PRNGKey(0)
    k1, k2, k3, k4 = jax.random.split(key, 4)

    # TODO(synk): GENEO cylinder/cone/neg-sphere parametric kernel construction
    #             (and any post-observer nonlinearity inside GENEO_Layer) not
    #             reproduced; deterministic synthetic kernels used instead.
    weights = 0.1 * jax.random.normal(k1, (G, KZ, KX, KY), jnp.float32)
    # convex observer coefficients (rows sum to 1, as maintain_convexity enforces)
    lambdas = jax.nn.softmax(jax.random.normal(k2, (O, G), jnp.float32), axis=-1)

    x = jax.random.uniform(k3, (B, Z, X, Y), jnp.float32)        # voxel grid
    pt_loc = jax.random.uniform(k4, (B, P, 3), jnp.float32)      # point coords

    out = jax.block_until_ready(scenenet_forward(x, pt_loc, weights, lambdas))
    ref = jax.block_until_ready(reference_forward(x, pt_loc, weights, lambdas))

    assert out.shape == (B, P, FEAT), out.shape
    max_err = float(jnp.max(jnp.abs(out - ref)))
    assert max_err < 1e-4, f"max abs error {max_err}"

    print("KERNEL_OK")
</pallas_src>

<mosaic_0001>
module attributes {stable_mosaic.version = 11 : i64} {
  func.func @_scenenet_fused_kernel(%arg0: i32, %arg1: memref<162xf32, #tpu.memory_space<smem>>, %arg2: memref<1x8x256xf32, #tpu.memory_space<vmem>>, %arg3: memref<1x16x1xi32, #tpu.memory_space<vmem>>, %arg4: memref<1x16x1xi32, #tpu.memory_space<vmem>>, %arg5: memref<1x16x3xf32, #tpu.memory_space<vmem>>, %arg6: memref<1x16x15xf32, #tpu.memory_space<vmem>>, %arg7: memref<10x320xf32, #tpu.memory_space<vmem>>) attributes {dimension_semantics = [#tpu.dimension_semantics<parallel>], iteration_bounds = array<i64: 2>, scalar_prefetch = 0 : i64, scratch_operands = 1 : i64, tpu.core_type = #tpu.core_type<tc>, window_params = [{transform_indices = @transform_0, window_bounds = array<i64: 162>}, {transform_indices = @transform_1, window_bounds = array<i64: 1, 8, 256>}, {transform_indices = @transform_2, window_bounds = array<i64: 1, 16, 1>}, {transform_indices = @transform_3, window_bounds = array<i64: 1, 16, 1>}, {transform_indices = @transform_4, window_bounds = array<i64: 1, 16, 3>}, {transform_indices = @transform_5, window_bounds = array<i64: 1, 16, 15>}]} {
    %cst = arith.constant 0.000000e+00 : f32
    %0 = vector.broadcast %cst : f32 to vector<10x320xf32>
    %c0 = arith.constant 0 : index
    %c0_0 = arith.constant 0 : index
    %1 = vector.load %arg7[%c0, %c0_0] : memref<10x320xf32, #tpu.memory_space<vmem>>, vector<10x320xf32>
    tpu.vector_store %arg7[%c0, %c0_0], %0 {strides = array<i32>} : memref<10x320xf32, #tpu.memory_space<vmem>>, vector<10x320xf32>,
    %c0_1 = arith.constant 0 : index
    %c0_2 = arith.constant 0 : index
    %c0_3 = arith.constant 0 : index
    %2 = vector.load %arg2[%c0_1, %c0_2, %c0_3] : memref<1x8x256xf32, #tpu.memory_space<vmem>>, vector<1x8x256xf32>
    %3 = vector.shape_cast %2 : vector<1x8x256xf32> to vector<8x256xf32>
    %c1 = arith.constant 1 : index
    %c32 = arith.constant 32 : index
    %4 = vector.load %arg7[%c1, %c32] : memref<10x320xf32, #tpu.memory_space<vmem>>, vector<8x256xf32>
    tpu.vector_store %arg7[%c1, %c32], %3 {strides = array<i32>} : memref<10x320xf32, #tpu.memory_space<vmem>>, vector<8x256xf32>,
    %5 = tpu.iota {dimensions = array<i32: 1>} : vector<8x256xi32>
    %c16_i32 = arith.constant 16 : i32
    %c0_i32 = arith.constant 0 : i32
    %6 = arith.cmpi eq, %c16_i32, %c0_i32 : i32
    %c1_i32 = arith.constant 1 : i32
    %7 = arith.select %6, %c1_i32, %c16_i32 : i32
    %8 = vector.broadcast %7 : i32 to vector<8x256xi32>
    %9 = arith.remsi %5, %8 : vector<8x256xi32>
    %c0_i32_4 = arith.constant 0 : i32
    %10 = vector.broadcast %c0_i32_4 : i32 to vector<8x256xi32>
    %11 = arith.cmpi ne, %9, %10 : vector<8x256xi32>
    %c0_i32_5 = arith.constant 0 : i32
    %12 = vector.broadcast %c0_i32_5 : i32 to vector<8x256xi32>
    %13 = arith.cmpi slt, %9, %12 : vector<8x256xi32>
    %c0_i32_6 = arith.constant 0 : i32
    %14 = arith.cmpi slt, %7, %c0_i32_6 : i32
    %15 = vector.broadcast %14 : i1 to vector<8x256xi1>
    %16 = vector.broadcast %15 : vector<8x256xi1> to vector<8x256xi1>
    %17 = arith.xori %13, %16 : vector<8x256xi1>
    %18 = arith.andi %17, %11 : vector<8x256xi1>
    %19 = vector.broadcast %7 : i32 to vector<8x256xi32>
    %20 = arith.addi %9, %19 : vector<8x256xi32>
    %21 = arith.select %18, %20, %9 : vector<8x256xi1>, vector<8x256xi32>
    %c1_i32_7 = arith.constant 1 : i32
    %22 = vector.broadcast %c1_i32_7 : i32 to vector<8x256xi32>
    %23 = arith.cmpi sge, %21, %22 : vector<8x256xi32>
    %c14_i32 = arith.constant 14 : i32
    %24 = vector.broadcast %c14_i32 : i32 to vector<8x256xi32>
    %25 = arith.cmpi sle, %21, %24 : vector<8x256xi32>
    %cst_8 = arith.constant 0.000000e+00 : f32
    %26 = vector.broadcast %cst_8 : f32 to vector<8x256xf32>
    %cst_9 = arith.constant 0.000000e+00 : f32
    %27 = vector.broadcast %cst_9 : f32 to vector<8x256xf32>
    %cst_10 = arith.constant 0.000000e+00 : f32
    %28 = vector.broadcast %cst_10 : f32 to vector<8x256xf32>
    %cst_11 = arith.constant 0.000000e+00 : f32
    %29 = vector.broadcast %cst_11 : f32 to vector<8x256xf32>
    %cst_12 = arith.constant 0.000000e+00 : f32
    %30 = vector.broadcast %cst_12 : f32 to vector<8x256xf32>
    %cst_13 = arith.constant 0.000000e+00 : f32
    %31 = vector.broadcast %cst_13 : f32 to vector<8x256xf32>
    %c0_14 = arith.constant 0 : index
    %c15 = arith.constant 15 : index
    %32 = vector.load %arg7[%c0_14, %c15] : memref<10x320xf32, #tpu.memory_space<vmem>>, vector<8x256xf32>
    %cst_15 = arith.constant 0.000000e+00 : f32
    %33 = vector.broadcast %cst_15 : f32 to vector<8x256xf32>
    %34 = arith.select %23, %32, %33 : vector<8x256xi1>, vector<8x256xf32>
    %c0_16 = arith.constant 0 : index
    %35 = memref.load %arg1[%c0_16] : memref<162xf32, #tpu.memory_space<smem>>
    %36 = vector.broadcast %35 : f32 to vector<8x256xf32>
    %37 = arith.mulf %36, %34 : vector<8x256xf32>
    %38 = arith.addf %26, %37 : vector<8x256xf32>
    %c27 = arith.constant 27 : index
    %39 = memref.load %arg1[%c27] : memref<162xf32, #tpu.memory_space<smem>>
    %40 = vector.broadcast %39 : f32 to vector<8x256xf32>
    %41 = arith.mulf %40, %34 : vector<8x256xf32>
    %42 = arith.addf %27, %41 : vector<8x256xf32>
    %c54 = arith.constant 54 : index
    %43 = memref.load %arg1[%c54] : memref<162xf32, #tpu.memory_space<smem>>
    %44 = vector.broadcast %43 : f32 to vector<8x256xf32>
    %45 = arith.mulf %44, %34 : vector<8x256xf32>
    %46 = arith.addf %28, %45 : vector<8x256xf32>
    %c81 = arith.constant 81 : index
    %47 = memref.load %arg1[%c81] : memref<162xf32, #tpu.memory_space<smem>>
    %48 = vector.broadcast %47 : f32 to vector<8x256xf32>
    %49 = arith.mulf %48, %34 : vector<8x256xf32>
    %50 = arith.addf %29, %49 : vector<8x256xf32>
    %c108 = arith.constant 108 : index
    %51 = memref.load %arg1[%c108] : memref<162xf32, #tpu.memory_space<smem>>
    %52 = vector.broadcast %51 : f32 to vector<8x256xf32>
    %53 = arith.mulf %52, %34 : vector<8x256xf32>
    %54 = arith.addf %30, %53 : vector<8x256xf32>
    %c135 = arith.constant 135 : index
    %55 = memref.load %arg1[%c135] : memref<162xf32, #tpu.memory_space<smem>>
    %56 = vector.broadcast %55 : f32 to vector<8x256xf32>
    %57 = arith.mulf %56, %34 : vector<8x256xf32>
    %58 = arith.addf %31, %57 : vector<8x256xf32>
    %c0_17 = arith.constant 0 : index
    %c16 = arith.constant 16 : index
    %59 = vector.load %arg7[%c0_17, %c16] : memref<10x320xf32, #tpu.memory_space<vmem>>, vector<8x256xf32>
    %c1_18 = arith.constant 1 : index
    %60 = memref.load %arg1[%c1_18] : memref<162xf32, #tpu.memory_space<smem>>
    %61 = vector.broadcast %60 : f32 to vector<8x256xf32>
    %62 = arith.mulf %61, %59 : vector<8x256xf32>
    %63 = arith.addf %38, %62 : vector<8x256xf32>
    %c28 = arith.constant 28 : index
    %64 = memref.load %arg1[%c28] : memref<162xf32, #tpu.memory_space<smem>>
    %65 = vector.broadcast %64 : f32 to vector<8x256xf32>
    %66 = arith.mulf %65, %59 : vector<8x256xf32>
    %67 = arith.addf %42, %66 : vector<8x256xf32>
    %c55 = arith.constant 55 : index
    %68 = memref.load %arg1[%c55] : memref<162xf32, #tpu.memory_space<smem>>
    %69 = vector.broadcast %68 : f32 to vector<8x256xf32>
    %70 = arith.mulf %69, %59 : vector<8x256xf32>
    %71 = arith.addf %46, %70 : vector<8x256xf32>
    %c82 = arith.constant 82 : index
    %72 = memref.load %arg1[%c82] : memref<162xf32, #tpu.memory_space<smem>>
    %73 = vector.broadcast %72 : f32 to vector<8x256xf32>
    %74 = arith.mulf %73, %59 : vector<8x256xf32>
    %75 = arith.addf %50, %74 : vector<8x256xf32>
    %c109 = arith.constant 109 : index
    %76 = memref.load %arg1[%c109] : memref<162xf32, #tpu.memory_space<smem>>
    %77 = vector.broadcast %76 : f32 to vector<8x256xf32>
    %78 = arith.mulf %77, %59 : vector<8x256xf32>
    %79 = arith.addf %54, %78 : vector<8x256xf32>
    %c136 = arith.constant 136 : index
    %80 = memref.load %arg1[%c136] : memref<162xf32, #tpu.memory_space<smem>>
    %81 = vector.broadcast %80 : f32 to vector<8x256xf32>
    %82 = arith.mulf %81, %59 : vector<8x256xf32>
    %83 = arith.addf %58, %82 : vector<8x256xf32>
    %c0_19 = arith.constant 0 : index
    %c17 = arith.constant 17 : index
    %84 = vector.load %arg7[%c0_19, %c17] : memref<10x320xf32, #tpu.memory_space<vmem>>, vector<8x256xf32>
    %cst_20 = arith.constant 0.000000e+00 : f32
    %85 = vector.broadcast %cst_20 : f32 to vector<8x256xf32>
    %86 = arith.select %25, %84, %85 : vector<8x256xi1>, vector<8x256xf32>
    %c2 = arith.constant 2 : index
    %87 = memref.load %arg1[%c2] : memref<162xf32, #tpu.memory_space<smem>>
    %88 = vector.broadcast %87 : f32 to vector<8x256xf32>
    %89 = arith.mulf %88, %86 : vector<8x256xf32>
    %90 = arith.addf %63, %89 : vector<8x256xf32>
    %c29 = arith.constant 29 : index
    %91 = memref.load %arg1[%c29] : memref<162xf32, #tpu.memory_space<smem>>
    %92 = vector.broadcast %91 : f32 to vector<8x256xf32>
    %93 = arith.mulf %92, %86 : vector<8x256xf32>
    %94 = arith.addf %67, %93 : vector<8x256xf32>
    %c56 = arith.constant 56 : index
    %95 = memref.load %arg1[%c56] : memref<162xf32, #tpu.memory_space<smem>>
    %96 = vector.broadcast %95 : f32 to vector<8x256xf32>
    %97 = arith.mulf %96, %86 : vector<8x256xf32>
    %98 = arith.addf %71, %97 : vector<8x256xf32>
    %c83 = arith.constant 83 : index
    %99 = memref.load %arg1[%c83] : memref<162xf32, #tpu.memory_space<smem>>
    %100 = vector.broadcast %99 : f32 to vector<8x256xf32>
    %101 = arith.mulf %100, %86 : vector<8x256xf32>
    %102 = arith.addf %75, %101 : vector<8x256xf32>
    %c110 = arith.constant 110 : index
    %103 = memref.load %arg1[%c110] : memref<162xf32, #tpu.memory_space<smem>>
    %104 = vector.broadcast %103 : f32 to vector<8x256xf32>
    %105 = arith.mulf %104, %86 : vector<8x256xf32>
    %106 = arith.addf %79, %105 : vector<8x256xf32>
    %c137 = arith.constant 137 : index
    %107 = memref.load %arg1[%c137] : memref<162xf32, #tpu.memory_space<smem>>
    %108 = vector.broadcast %107 : f32 to vector<8x256xf32>
    %109 = arith.mulf %108, %86 : vector<8x256xf32>
    %110 = arith.addf %83, %109 : vector<8x256xf32>
    %c0_21 = arith.constant 0 : index
    %c31 = arith.constant 31 : index
    %111 = vector.load %arg7[%c0_21, %c31] : memref<10x320xf32, #tpu.memory_space<vmem>>, vector<8x256xf32>
    %cst_22 = arith.constant 0.000000e+00 : f32
    %112 = vector.broadcast %cst_22 : f32 to vector<8x256xf32>
    %113 = arith.select %23, %111, %112 : vector<8x256xi1>, vector<8x256xf32>
    %c3 = arith.constant 3 : index
    %114 = memref.load %arg1[%c3] : memref<162xf32, #tpu.memory_space<smem>>
    %115 = vector.broadcast %114 : f32 to vector<8x256xf32>
    %116 = arith.mulf %115, %113 : vector<8x256xf32>
    %117 = arith.addf %90, %116 : vector<8x256xf32>
    %c30 = arith.constant 30 : index
    %118 = memref.load %arg1[%c30] : memref<162xf32, #tpu.memory_space<smem>>
    %119 = vector.broadcast %118 : f32 to vector<8x256xf32>
    %120 = arith.mulf %119, %113 : vector<8x256xf32>
    %121 = arith.addf %94, %120 : vector<8x256xf32>
    %c57 = arith.constant 57 : index
    %122 = memref.load %arg1[%c57] : memref<162xf32, #tpu.memory_space<smem>>
    %123 = vector.broadcast %122 : f32 to vector<8x256xf32>
    %124 = arith.mulf %123, %113 : vector<8x256xf32>
    %125 = arith.addf %98, %124 : vector<8x256xf32>
    %c84 = arith.constant 84 : index
    %126 = memref.load %arg1[%c84] : memref<162xf32, #tpu.memory_space<smem>>
    %127 = vector.broadcast %126 : f32 to vector<8x256xf32>
    %128 = arith.mulf %127, %113 : vector<8x256xf32>
    %129 = arith.addf %102, %128 : vector<8x256xf32>
    %c111 = arith.constant 111 : index
    %130 = memref.load %arg1[%c111] : memref<162xf32, #tpu.memory_space<smem>>
    %131 = vector.broadcast %130 : f32 to vector<8x256xf32>
    %132 = arith.mulf %131, %113 : vector<8x256xf32>
    %133 = arith.addf %106, %132 : vector<8x256xf32>
    %c138 = arith.constant 138 : index
    %134 = memref.load %arg1[%c138] : memref<162xf32, #tpu.memory_space<smem>>
    %135 = vector.broadcast %134 : f32 to vector<8x256xf32>
    %136 = arith.mulf %135, %113 : vector<8x256xf32>
    %137 = arith.addf %110, %136 : vector<8x256xf32>
    %c0_23 = arith.constant 0 : index
    %c32_24 = arith.constant 32 : index
    %138 = vector.load %arg7[%c0_23, %c32_24] : memref<10x320xf32, #tpu.memory_space<vmem>>, vector<8x256xf32>
    %c4 = arith.constant 4 : index
    %139 = memref.load %arg1[%c4] : memref<162xf32, #tpu.memory_space<smem>>
    %140 = vector.broadcast %139 : f32 to vector<8x256xf32>
    %141 = arith.mulf %140, %138 : vector<8x256xf32>
    %142 = arith.addf %117, %141 : vector<8x256xf32>
    %c31_25 = arith.constant 31 : index
    %143 = memref.load %arg1[%c31_25] : memref<162xf32, #tpu.memory_space<smem>>
    %144 = vector.broadcast %143 : f32 to vector<8x256xf32>
    %145 = arith.mulf %144, %138 : vector<8x256xf32>
    %146 = arith.addf %121, %145 : vector<8x256xf32>
    %c58 = arith.constant 58 : index
    %147 = memref.load %arg1[%c58] : memref<162xf32, #tpu.memory_space<smem>>
    %148 = vector.broadcast %147 : f32 to vector<8x256xf32>
    %149 = arith.mulf %148, %138 : vector<8x256xf32>
    %150 = arith.addf %125, %149 : vector<8x256xf32>
    %c85 = arith.constant 85 : index
    %151 = memref.load %arg1[%c85] : memref<162xf32, #tpu.memory_space<smem>>
    %152 = vector.broadcast %151 : f32 to vector<8x256xf32>
    %153 = arith.mulf %152, %138 : vector<8x256xf32>
    %154 = arith.addf %129, %153 : vector<8x256xf32>
    %c112 = arith.constant 112 : index
    %155 = memref.load %arg1[%c112] : memref<162xf32, #tpu.memory_space<smem>>
    %156 = vector.broadcast %155 : f32 to vector<8x256xf32>
    %157 = arith.mulf %156, %138 : vector<8x256xf32>
    %158 = arith.addf %133, %157 : vector<8x256xf32>
    %c139 = arith.constant 139 : index
    %159 = memref.load %arg1[%c139] : memref<162xf32, #tpu.memory_space<smem>>
    %160 = vector.broadcast %159 : f32 to vector<8x256xf32>
    %161 = arith.mulf %160, %138 : vector<8x256xf32>
    %162 = arith.addf %137, %161 : vector<8x256xf32>
    %c0_26 = arith.constant 0 : index
    %c33 = arith.constant 33 : index
    %163 = vector.load %arg7[%c0_26, %c33] : memref<10x320xf32, #tpu.memory_space<vmem>>, vector<8x256xf32>
    %cst_27 = arith.constant 0.000000e+00 : f32
    %164 = vector.broadcast %cst_27 : f32 to vector<8x256xf32>
    %165 = arith.select %25, %163, %164 : vector<8x256xi1>, vector<8x256xf32>
    %c5 = arith.constant 5 : index
    %166 = memref.load %arg1[%c5] : memref<162xf32, #tpu.memory_space<smem>>
    %167 = vector.broadcast %166 : f32 to vector<8x256xf32>
    %168 = arith.mulf %167, %165 : vector<8x256xf32>
    %169 = arith.addf %142, %168 : vector<8x256xf32>
    %c32_28 = arith.constant 32 : index
    %170 = memref.load %arg1[%c32_28] : memref<162xf32, #tpu.memory_space<smem>>
    %171 = vector.broadcast %170 : f32 to vector<8x256xf32>
    %172 = arith.mulf %171, %165 : vector<8x256xf32>
    %173 = arith.addf %146, %172 : vector<8x256xf32>
    %c59 = arith.constant 59 : index
    %174 = memref.load %arg1[%c59] : memref<162xf32, #tpu.memory_space<smem>>
    %175 = vector.broadcast %174 : f32 to vector<8x256xf32>
    %176 = arith.mulf %175, %165 : vector<8x256xf32>
    %177 = arith.addf %150, %176 : vector<8x256xf32>
    %c86 = arith.constant 86 : index
    %178 = memref.load %arg1[%c86] : memref<162xf32, #tpu.memory_space<smem>>
    %179 = vector.broadcast %178 : f32 to vector<8x256xf32>
    %180 = arith.mulf %179, %165 : vector<8x256xf32>
    %181 = arith.addf %154, %180 : vector<8x256xf32>
    %c113 = arith.constant 113 : index
    %182 = memref.load %arg1[%c113] : memref<162xf32, #tpu.memory_space<smem>>
    %183 = vector.broadcast %182 : f32 to vector<8x256xf32>
    %184 = arith.mulf %183, %165 : vector<8x256xf32>
    %185 = arith.addf %158, %184 : vector<8x256xf32>
    %c140 = arith.constant 140 : index
    %186 = memref.load %arg1[%c140] : memref<162xf32, #tpu.memory_space<smem>>
    %187 = vector.broadcast %186 : f32 to vector<8x256xf32>
    %188 = arith.mulf %187, %165 : vector<8x256xf32>
    %189 = arith.addf %162, %188 : vector<8x256xf32>
    %c0_29 = arith.constant 0 : index
    %c47 = arith.constant 47 : index
    %190 = vector.load %arg7[%c0_29, %c47] : memref<10x320xf32, #tpu.memory_space<vmem>>, vector<8x256xf32>
    %cst_30 = arith.constant 0.000000e+00 : f32
    %191 = vector.broadcast %cst_30 : f32 to vector<8x256xf32>
    %192 = arith.select %23, %190, %191 : vector<8x256xi1>, vector<8x256xf32>
    %c6 = arith.constant 6 : index
    %193 = memref.load %arg1[%c6] : memref<162xf32, #tpu.memory_space<smem>>
    %194 = vector.broadcast %193 : f32 to vector<8x256xf32>
    %195 = arith.mulf %194, %192 : vector<8x256xf32>
    %196 = arith.addf %169, %195 : vector<8x256xf32>
    %c33_31 = arith.constant 33 : index
    %197 = memref.load %arg1[%c33_31] : memref<162xf32, #tpu.memory_space<smem>>
    %198 = vector.broadcast %197 : f32 to vector<8x256xf32>
    %199 = arith.mulf %198, %192 : vector<8x256xf32>
    %200 = arith.addf %173, %199 : vector<8x256xf32>
    %c60 = arith.constant 60 : index
    %201 = memref.load %arg1[%c60] : memref<162xf32, #tpu.memory_space<smem>>
    %202 = vector.broadcast %201 : f32 to vector<8x256xf32>
    %203 = arith.mulf %202, %192 : vector<8x256xf32>
    %204 = arith.addf %177, %203 : vector<8x256xf32>
    %c87 = arith.constant 87 : index
    %205 = memref.load %arg1[%c87] : memref<162xf32, #tpu.memory_space<smem>>
    %206 = vector.broadcast %205 : f32 to vector<8x256xf32>
    %207 = arith.mulf %206, %192 : vector<8x256xf32>
    %208 = arith.addf %181, %207 : vector<8x256xf32>
    %c114 = arith.constant 114 : index
    %209 = memref.load %arg1[%c114] : memref<162xf32, #tpu.memory_space<smem>>
    %210 = vector.broadcast %209 : f32 to vector<8x256xf32>
    %211 = arith.mulf %210, %192 : vector<8x256xf32>
    %212 = arith.addf %185, %211 : vector<8x256xf32>
    %c141 = arith.constant 141 : index
    %213 = memref.load %arg1[%c141] : memref<162xf32, #tpu.memory_space<smem>>
    %214 = vector.broadcast %213 : f32 to vector<8x256xf32>
    %215 = arith.mulf %214, %192 : vector<8x256xf32>
    %216 = arith.addf %189, %215 : vector<8x256xf32>
    %c0_32 = arith.constant 0 : index
    %c48 = arith.constant 48 : index
    %217 = vector.load %arg7[%c0_32, %c48] : memref<10x320xf32, #tpu.memory_space<vmem>>, vector<8x256xf32>
    %c7 = arith.constant 7 : index
    %218 = memref.load %arg1[%c7] : memref<162xf32, #tpu.memory_space<smem>>
    %219 = vector.broadcast %218 : f32 to vector<8x256xf32>
    %220 = arith.mulf %219, %217 : vector<8x256xf32>
    %221 = arith.addf %196, %220 : vector<8x256xf32>
    %c34 = arith.constant 34 : index
    %222 = memref.load %arg1[%c34] : memref<162xf32, #tpu.memory_space<smem>>
    %223 = vector.broadcast %222 : f32 to vector<8x256xf32>
    %224 = arith.mulf %223, %217 : vector<8x256xf32>
    %225 = arith.addf %200, %224 : vector<8x256xf32>
    %c61 = arith.constant 61 : index
    %226 = memref.load %arg1[%c61] : memref<162xf32, #tpu.memory_space<smem>>
    %227 = vector.broadcast %226 : f32 to vector<8x256xf32>
    %228 = arith.mulf %227, %217 : vector<8x256xf32>
    %229 = arith.addf %204, %228 : vector<8x256xf32>
    %c88 = arith.constant 88 : index
    %230 = memref.load %arg1[%c88] : memref<162xf32, #tpu.memory_space<smem>>
    %231 = vector.broadcast %230 : f32 to vector<8x256xf32>
    %232 = arith.mulf %231, %217 : vector<8x256xf32>
    %233 = arith.addf %208, %232 : vector<8x256xf32>
    %c115 = arith.constant 115 : index
    %234 = memref.load %arg1[%c115] : memref<162xf32, #tpu.memory_space<smem>>
    %235 = vector.broadcast %234 : f32 to vector<8x256xf32>
    %236 = arith.mulf %235, %217 : vector<8x256xf32>
    %237 = arith.addf %212, %236 : vector<8x256xf32>
    %c142 = arith.constant 142 : index
    %238 = memref.load %arg1[%c142] : memref<162xf32, #tpu.memory_space<smem>>
    %239 = vector.broadcast %238 : f32 to vector<8x256xf32>
    %240 = arith.mulf %239, %217 : vector<8x256xf32>
    %241 = arith.addf %216, %240 : vector<8x256xf32>
    %c0_33 = arith.constant 0 : index
    %c49 = arith.constant 49 : index
    %242 = vector.load %arg7[%c0_33, %c49] : memref<10x320xf32, #tpu.memory_space<vmem>>, vector<8x256xf32>
    %cst_34 = arith.constant 0.000000e+00 : f32
    %243 = vector.broadcast %cst_34 : f32 to vector<8x256xf32>
    %244 = arith.select %25, %242, %243 : vector<8x256xi1>, vector<8x256xf32>
    %c8 = arith.constant 8 : index
    %245 = memref.load %arg1[%c8] : memref<162xf32, #tpu.memory_space<smem>>
    %246 = vector.broadcast %245 : f32 to vector<8x256xf32>
    %247 = arith.mulf %246, %244 : vector<8x256xf32>
    %248 = arith.addf %221, %247 : vector<8x256xf32>
    %c35 = arith.constant 35 : index
    %249 = memref.load %arg1[%c35] : memref<162xf32, #tpu.memory_space<smem>>
    %250 = vector.broadcast %249 : f32 to vector<8x256xf32>
    %251 = arith.mulf %250, %244 : vector<8x256xf32>
    %252 = arith.addf %225, %251 : vector<8x256xf32>
    %c62 = arith.constant 62 : index
    %253 = memref.load %arg1[%c62] : memref<162xf32, #tpu.memory_space<smem>>
    %254 = vector.broadcast %253 : f32 to vector<8x256xf32>
    %255 = arith.mulf %254, %244 : vector<8x256xf32>
    %256 = arith.addf %229, %255 : vector<8x256xf32>
    %c89 = arith.constant 89 : index
    %257 = memref.load %arg1[%c89] : memref<162xf32, #tpu.memory_space<smem>>
    %258 = vector.broadcast %257 : f32 to vector<8x256xf32>
    %259 = arith.mulf %258, %244 : vector<8x256xf32>
    %260 = arith.addf %233, %259 : vector<8x256xf32>
    %c116 = arith.constant 116 : index
    %261 = memref.load %arg1[%c116] : memref<162xf32, #tpu.memory_space<smem>>
    %262 = vector.broadcast %261 : f32 to vector<8x256xf32>
    %263 = arith.mulf %262, %244 : vector<8x256xf32>
    %264 = arith.addf %237, %263 : vector<8x256xf32>
    %c143 = arith.constant 143 : index
    %265 = memref.load %arg1[%c143] : memref<162xf32, #tpu.memory_space<smem>>
    %266 = vector.broadcast %265 : f32 to vector<8x256xf32>
    %267 = arith.mulf %266, %244 : vector<8x256xf32>
    %268 = arith.addf %241, %267 : vector<8x256xf32>
    %c1_35 = arith.constant 1 : index
    %c15_36 = arith.constant 15 : index
    %269 = vector.load %arg7[%c1_35, %c15_36] : memref<10x320xf32, #tpu.memory_space<vmem>>, vector<8x256xf32>
    %cst_37 = arith.constant 0.000000e+00 : f32
    %270 = vector.broadcast %cst_37 : f32 to vector<8x256xf32>
    %271 = arith.select %23, %269, %270 : vector<8x256xi1>, vector<8x256xf32>
    %c9 = arith.constant 9 : index
    %272 = memref.load %arg1[%c9] : memref<162xf32, #tpu.memory_space<smem>>
    %273 = vector.broadcast %272 : f32 to vector<8x256xf32>
    %274 = arith.mulf %273, %271 : vector<8x256xf32>
    %275 = arith.addf %248, %274 : vector<8x256xf32>
    %c36 = arith.constant 36 : index
    %276 = memref.load %arg1[%c36] : memref<162xf32, #tpu.memory_space<smem>>
    %277 = vector.broadcast %276 : f32 to vector<8x256xf32>
    %278 = arith.mulf %277, %271 : vector<8x256xf32>
    %279 = arith.addf %252, %278 : vector<8x256xf32>
    %c63 = arith.constant 63 : index
    %280 = memref.load %arg1[%c63] : memref<162xf32, #tpu.memory_space<smem>>
    %281 = vector.broadcast %280 : f32 to vector<8x256xf32>
    %282 = arith.mulf %281, %271 : vector<8x256xf32>
    %283 = arith.addf %256, %282 : vector<8x256xf32>
    %c90 = arith.constant 90 : index
    %284 = memref.load %arg1[%c90] : memref<162xf32, #tpu.memory_space<smem>>
    %285 = vector.broadcast %284 : f32 to vector<8x256xf32>
    %286 = arith.mulf %285, %271 : vector<8x256xf32>
    %287 = arith.addf %260, %286 : vector<8x256xf32>
    %c117 = arith.constant 117 : index
    %288 = memref.load %arg1[%c117] : memref<162xf32, #tpu.memory_space<smem>>
    %289 = vector.broadcast %288 : f32 to vector<8x256xf32>
    %290 = arith.mulf %289, %271 : vector<8x256xf32>
    %291 = arith.addf %264, %290 : vector<8x256xf32>
    %c144 = arith.constant 144 : index
    %292 = memref.load %arg1[%c144] : memref<162xf32, #tpu.memory_space<smem>>
    %293 = vector.broadcast %292 : f32 to vector<8x256xf32>
    %294 = arith.mulf %293, %271 : vector<8x256xf32>
    %295 = arith.addf %268, %294 : vector<8x256xf32>
    %c1_38 = arith.constant 1 : index
    %c16_39 = arith.constant 16 : index
    %296 = vector.load %arg7[%c1_38, %c16_39] : memref<10x320xf32, #tpu.memory_space<vmem>>, vector<8x256xf32>
    %c10 = arith.constant 10 : index
    %297 = memref.load %arg1[%c10] : memref<162xf32, #tpu.memory_space<smem>>
    %298 = vector.broadcast %297 : f32 to vector<8x256xf32>
    %299 = arith.mulf %298, %296 : vector<8x256xf32>
    %300 = arith.addf %275, %299 : vector<8x256xf32>
    %c37 = arith.constant 37 : index
    %301 = memref.load %arg1[%c37] : memref<162xf32, #tpu.memory_space<smem>>
    %302 = vector.broadcast %301 : f32 to vector<8x256xf32>
    %303 = arith.mulf %302, %296 : vector<8x256xf32>
    %304 = arith.addf %279, %303 : vector<8x256xf32>
    %c64 = arith.constant 64 : index
    %305 = memref.load %arg1[%c64] : memref<162xf32, #tpu.memory_space<smem>>
    %306 = vector.broadcast %305 : f32 to vector<8x256xf32>
    %307 = arith.mulf %306, %296 : vector<8x256xf32>
    %308 = arith.addf %283, %307 : vector<8x256xf32>
    %c91 = arith.constant 91 : index
    %309 = memref.load %arg1[%c91] : memref<162xf32, #tpu.memory_space<smem>>
    %310 = vector.broadcast %309 : f32 to vector<8x256xf32>
    %311 = arith.mulf %310, %296 : vector<8x256xf32>
    %312 = arith.addf %287, %311 : vector<8x256xf32>
    %c118 = arith.constant 118 : index
    %313 = memref.load %arg1[%c118] : memref<162xf32, #tpu.memory_space<smem>>
    %314 = vector.broadcast %313 : f32 to vector<8x256xf32>
    %315 = arith.mulf %314, %296 : vector<8x256xf32>
    %316 = arith.addf %291, %315 : vector<8x256xf32>
    %c145 = arith.constant 145 : index
    %317 = memref.load %arg1[%c145] : memref<162xf32, #tpu.memory_space<smem>>
    %318 = vector.broadcast %317 : f32 to vector<8x256xf32>
    %319 = arith.mulf %318, %296 : vector<8x256xf32>
    %320 = arith.addf %295, %319 : vector<8x256xf32>
    %c1_40 = arith.constant 1 : index
    %c17_41 = arith.constant 17 : index
    %321 = vector.load %arg7[%c1_40, %c17_41] : memref<10x320xf32, #tpu.memory_space<vmem>>, vector<8x256xf32>
    %cst_42 = arith.constant 0.000000e+00 : f32
    %322 = vector.broadcast %cst_42 : f32 to vector<8x256xf32>
    %323 = arith.select %25, %321, %322 : vector<8x256xi1>, vector<8x256xf32>
    %c11 = arith.constant 11 : index
    %324 = memref.load %arg1[%c11] : memref<162xf32, #tpu.memory_space<smem>>
    %325 = vector.broadcast %324 : f32 to vector<8x256xf32>
    %326 = arith.mulf %325, %323 : vector<8x256xf32>
    %327 = arith.addf %300, %326 : vector<8x256xf32>
    %c38 = arith.constant 38 : index
    %328 = memref.load %arg1[%c38] : memref<162xf32, #tpu.memory_space<smem>>
    %329 = vector.broadcast %328 : f32 to vector<8x256xf32>
    %330 = arith.mulf %329, %323 : vector<8x256xf32>
    %331 = arith.addf %304, %330 : vector<8x256xf32>
    %c65 = arith.constant 65 : index
    %332 = memref.load %arg1[%c65] : memref<162xf32, #tpu.memory_space<smem>>
    %333 = vector.broadcast %332 : f32 to vector<8x256xf32>
    %334 = arith.mulf %333, %323 : vector<8x256xf32>
    %335 = arith.addf %308, %334 : vector<8x256xf32>
    %c92 = arith.constant 92 : index
    %336 = memref.load %arg1[%c92] : memref<162xf32, #tpu.memory_space<smem>>
    %337 = vector.broadcast %336 : f32 to vector<8x256xf32>
    %338 = arith.mulf %337, %323 : vector<8x256xf32>
    %339 = arith.addf %312, %338 : vector<8x256xf32>
    %c119 = arith.constant 119 : index
    %340 = memref.load %arg1[%c119] : memref<162xf32, #tpu.memory_space<smem>>
    %341 = vector.broadcast %340 : f32 to vector<8x256xf32>
    %342 = arith.mulf %341, %323 : vector<8x256xf32>
    %343 = arith.addf %316, %342 : vector<8x256xf32>
    %c146 = arith.constant 146 : index
    %344 = memref.load %arg1[%c146] : memref<162xf32, #tpu.memory_space<smem>>
    %345 = vector.broadcast %344 : f32 to vector<8x256xf32>
    %346 = arith.mulf %345, %323 : vector<8x256xf32>
    %347 = arith.addf %320, %346 : vector<8x256xf32>
    %c1_43 = arith.constant 1 : index
    %c31_44 = arith.constant 31 : index
    %348 = vector.load %arg7[%c1_43, %c31_44] : memref<10x320xf32, #tpu.memory_space<vmem>>, vector<8x256xf32>
    %cst_45 = arith.constant 0.000000e+00 : f32
    %349 = vector.broadcast %cst_45 : f32 to vector<8x256xf32>
    %350 = arith.select %23, %348, %349 : vector<8x256xi1>, vector<8x256xf32>
    %c12 = arith.constant 12 : index
    %351 = memref.load %arg1[%c12] : memref<162xf32, #tpu.memory_space<smem>>
    %352 = vector.broadcast %351 : f32 to vector<8x256xf32>
    %353 = arith.mulf %352, %350 : vector<8x256xf32>
    %354 = arith.addf %327, %353 : vector<8x256xf32>
    %c39 = arith.constant 39 : index
    %355 = memref.load %arg1[%c39] : memref<162xf32, #tpu.memory_space<smem>>
    %356 = vector.broadcast %355 : f32 to vector<8x256xf32>
    %357 = arith.mulf %356, %350 : vector<8x256xf32>
    %358 = arith.addf %331, %357 : vector<8x256xf32>
    %c66 = arith.constant 66 : index
    %359 = memref.load %arg1[%c66] : memref<162xf32, #tpu.memory_space<smem>>
    %360 = vector.broadcast %359 : f32 to vector<8x256xf32>
    %361 = arith.mulf %360, %350 : vector<8x256xf32>
    %362 = arith.addf %335, %361 : vector<8x256xf32>
    %c93 = arith.constant 93 : index
    %363 = memref.load %arg1[%c93] : memref<162xf32, #tpu.memory_space<smem>>
    %364 = vector.broadcast %363 : f32 to vector<8x256xf32>
    %365 = arith.mulf %364, %350 : vector<8x256xf32>
    %366 = arith.addf %339, %365 : vector<8x256xf32>
    %c120 = arith.constant 120 : index
    %367 = memref.load %arg1[%c120] : memref<162xf32, #tpu.memory_space<smem>>
    %368 = vector.broadcast %367 : f32 to vector<8x256xf32>
    %369 = arith.mulf %368, %350 : vector<8x256xf32>
    %370 = arith.addf %343, %369 : vector<8x256xf32>
    %c147 = arith.constant 147 : index
    %371 = memref.load %arg1[%c147] : memref<162xf32, #tpu.memory_space<smem>>
    %372 = vector.broadcast %371 : f32 to vector<8x256xf32>
    %373 = arith.mulf %372, %350 : vector<8x256xf32>
    %374 = arith.addf %347, %373 : vector<8x256xf32>
    %c1_46 = arith.constant 1 : index
    %c32_47 = arith.constant 32 : index
    %375 = vector.load %arg7[%c1_46, %c32_47] : memref<10x320xf32, #tpu.memory_space<vmem>>, vector<8x256xf32>
    %c13 = arith.constant 13 : index
    %376 = memref.load %arg1[%c13] : memref<162xf32, #tpu.memory_space<smem>>
    %377 = vector.broadcast %376 : f32 to vector<8x256xf32>
    %378 = arith.mulf %377, %375 : vector<8x256xf32>
    %379 = arith.addf %354, %378 : vector<8x256xf32>
    %c40 = arith.constant 40 : index
    %380 = memref.load %arg1[%c40] : memref<162xf32, #tpu.memory_space<smem>>
    %381 = vector.broadcast %380 : f32 to vector<8x256xf32>
    %382 = arith.mulf %381, %375 : vector<8x256xf32>
    %383 = arith.addf %358, %382 : vector<8x256xf32>
    %c67 = arith.constant 67 : index
    %384 = memref.load %arg1[%c67] : memref<162xf32, #tpu.memory_space<smem>>
    %385 = vector.broadcast %384 : f32 to vector<8x256xf32>
    %386 = arith.mulf %385, %375 : vector<8x256xf32>
    %387 = arith.addf %362, %386 : vector<8x256xf32>
    %c94 = arith.constant 94 : index
    %388 = memref.load %arg1[%c94] : memref<162xf32, #tpu.memory_space<smem>>
    %389 = vector.broadcast %388 : f32 to vector<8x256xf32>
    %390 = arith.mulf %389, %375 : vector<8x256xf32>
    %391 = arith.addf %366, %390 : vector<8x256xf32>
    %c121 = arith.constant 121 : index
    %392 = memref.load %arg1[%c121] : memref<162xf32, #tpu.memory_space<smem>>
    %393 = vector.broadcast %392 : f32 to vector<8x256xf32>
    %394 = arith.mulf %393, %375 : vector<8x256xf32>
    %395 = arith.addf %370, %394 : vector<8x256xf32>
    %c148 = arith.constant 148 : index
    %396 = memref.load %arg1[%c148] : memref<162xf32, #tpu.memory_space<smem>>
    %397 = vector.broadcast %396 : f32 to vector<8x256xf32>
    %398 = arith.mulf %397, %375 : vector<8x256xf32>
    %399 = arith.addf %374, %398 : vector<8x256xf32>
    %c1_48 = arith.constant 1 : index
    %c33_49 = arith.constant 33 : index
    %400 = vector.load %arg7[%c1_48, %c33_49] : memref<10x320xf32, #tpu.memory_space<vmem>>, vector<8x256xf32>
    %cst_50 = arith.constant 0.000000e+00 : f32
    %401 = vector.broadcast %cst_50 : f32 to vector<8x256xf32>
    %402 = arith.select %25, %400, %401 : vector<8x256xi1>, vector<8x256xf32>
    %c14 = arith.constant 14 : index
    %403 = memref.load %arg1[%c14] : memref<162xf32, #tpu.memory_space<smem>>
    %404 = vector.broadcast %403 : f32 to vector<8x256xf32>
    %405 = arith.mulf %404, %402 : vector<8x256xf32>
    %406 = arith.addf %379, %405 : vector<8x256xf32>
    %c41 = arith.constant 41 : index
    %407 = memref.load %arg1[%c41] : memref<162xf32, #tpu.memory_space<smem>>
    %408 = vector.broadcast %407 : f32 to vector<8x256xf32>
    %409 = arith.mulf %408, %402 : vector<8x256xf32>
    %410 = arith.addf %383, %409 : vector<8x256xf32>
    %c68 = arith.constant 68 : index
    %411 = memref.load %arg1[%c68] : memref<162xf32, #tpu.memory_space<smem>>
    %412 = vector.broadcast %411 : f32 to vector<8x256xf32>
    %413 = arith.mulf %412, %402 : vector<8x256xf32>
    %414 = arith.addf %387, %413 : vector<8x256xf32>
    %c95 = arith.constant 95 : index
    %415 = memref.load %arg1[%c95] : memref<162xf32, #tpu.memory_space<smem>>
    %416 = vector.broadcast %415 : f32 to vector<8x256xf32>
    %417 = arith.mulf %416, %402 : vector<8x256xf32>
    %418 = arith.addf %391, %417 : vector<8x256xf32>
    %c122 = arith.constant 122 : index
    %419 = memref.load %arg1[%c122] : memref<162xf32, #tpu.memory_space<smem>>
    %420 = vector.broadcast %419 : f32 to vector<8x256xf32>
    %421 = arith.mulf %420, %402 : vector<8x256xf32>
    %422 = arith.addf %395, %421 : vector<8x256xf32>
    %c149 = arith.constant 149 : index
    %423 = memref.load %arg1[%c149] : memref<162xf32, #tpu.memory_space<smem>>
    %424 = vector.broadcast %423 : f32 to vector<8x256xf32>
    %425 = arith.mulf %424, %402 : vector<8x256xf32>
    %426 = arith.addf %399, %425 : vector<8x256xf32>
    %c1_51 = arith.constant 1 : index
    %c47_52 = arith.constant 47 : index
    %427 = vector.load %arg7[%c1_51, %c47_52] : memref<10x320xf32, #tpu.memory_space<vmem>>, vector<8x256xf32>
    %cst_53 = arith.constant 0.000000e+00 : f32
    %428 = vector.broadcast %cst_53 : f32 to vector<8x256xf32>
    %429 = arith.select %23, %427, %428 : vector<8x256xi1>, vector<8x256xf32>
    %c15_54 = arith.constant 15 : index
    %430 = memref.load %arg1[%c15_54] : memref<162xf32, #tpu.memory_space<smem>>
    %431 = vector.broadcast %430 : f32 to vector<8x256xf32>
    %432 = arith.mulf %431, %429 : vector<8x256xf32>
    %433 = arith.addf %406, %432 : vector<8x256xf32>
    %c42 = arith.constant 42 : index
    %434 = memref.load %arg1[%c42] : memref<162xf32, #tpu.memory_space<smem>>
    %435 = vector.broadcast %434 : f32 to vector<8x256xf32>
    %436 = arith.mulf %435, %429 : vector<8x256xf32>
    %437 = arith.addf %410, %436 : vector<8x256xf32>
    %c69 = arith.constant 69 : index
    %438 = memref.load %arg1[%c69] : memref<162xf32, #tpu.memory_space<smem>>
    %439 = vector.broadcast %438 : f32 to vector<8x256xf32>
    %440 = arith.mulf %439, %429 : vector<8x256xf32>
    %441 = arith.addf %414, %440 : vector<8x256xf32>
    %c96 = arith.constant 96 : index
    %442 = memref.load %arg1[%c96] : memref<162xf32, #tpu.memory_space<smem>>
    %443 = vector.broadcast %442 : f32 to vector<8x256xf32>
    %444 = arith.mulf %443, %429 : vector<8x256xf32>
    %445 = arith.addf %418, %444 : vector<8x256xf32>
    %c123 = arith.constant 123 : index
    %446 = memref.load %arg1[%c123] : memref<162xf32, #tpu.memory_space<smem>>
    %447 = vector.broadcast %446 : f32 to vector<8x256xf32>
    %448 = arith.mulf %447, %429 : vector<8x256xf32>
    %449 = arith.addf %422, %448 : vector<8x256xf32>
    %c150 = arith.constant 150 : index
    %450 = memref.load %arg1[%c150] : memref<162xf32, #tpu.memory_space<smem>>
    %451 = vector.broadcast %450 : f32 to vector<8x256xf32>
    %452 = arith.mulf %451, %429 : vector<8x256xf32>
    %453 = arith.addf %426, %452 : vector<8x256xf32>
    %c1_55 = arith.constant 1 : index
    %c48_56 = arith.constant 48 : index
    %454 = vector.load %arg7[%c1_55, %c48_56] : memref<10x320xf32, #tpu.memory_space<vmem>>, vector<8x256xf32>
    %c16_57 = arith.constant 16 : index
    %455 = memref.load %arg1[%c16_57] : memref<162xf32, #tpu.memory_space<smem>>
    %456 = vector.broadcast %455 : f32 to vector<8x256xf32>
    %457 = arith.mulf %456, %454 : vector<8x256xf32>
    %458 = arith.addf %433, %457 : vector<8x256xf32>
    %c43 = arith.constant 43 : index
    %459 = memref.load %arg1[%c43] : memref<162xf32, #tpu.memory_space<smem>>
    %460 = vector.broadcast %459 : f32 to vector<8x256xf32>
    %461 = arith.mulf %460, %454 : vector<8x256xf32>
    %462 = arith.addf %437, %461 : vector<8x256xf32>
    %c70 = arith.constant 70 : index
    %463 = memref.load %arg1[%c70] : memref<162xf32, #tpu.memory_space<smem>>
    %464 = vector.broadcast %463 : f32 to vector<8x256xf32>
    %465 = arith.mulf %464, %454 : vector<8x256xf32>
    %466 = arith.addf %441, %465 : vector<8x256xf32>
    %c97 = arith.constant 97 : index
    %467 = memref.load %arg1[%c97] : memref<162xf32, #tpu.memory_space<smem>>
    %468 = vector.broadcast %467 : f32 to vector<8x256xf32>
    %469 = arith.mulf %468, %454 : vector<8x256xf32>
    %470 = arith.addf %445, %469 : vector<8x256xf32>
    %c124 = arith.constant 124 : index
    %471 = memref.load %arg1[%c124] : memref<162xf32, #tpu.memory_space<smem>>
    %472 = vector.broadcast %471 : f32 to vector<8x256xf32>
    %473 = arith.mulf %472, %454 : vector<8x256xf32>
    %474 = arith.addf %449, %473 : vector<8x256xf32>
    %c151 = arith.constant 151 : index
    %475 = memref.load %arg1[%c151] : memref<162xf32, #tpu.memory_space<smem>>
    %476 = vector.broadcast %475 : f32 to vector<8x256xf32>
    %477 = arith.mulf %476, %454 : vector<8x256xf32>
    %478 = arith.addf %453, %477 : vector<8x256xf32>
    %c1_58 = arith.constant 1 : index
    %c49_59 = arith.constant 49 : index
    %479 = vector.load %arg7[%c1_58, %c49_59] : memref<10x320xf32, #tpu.memory_space<vmem>>, vector<8x256xf32>
    %cst_60 = arith.constant 0.000000e+00 : f32
    %480 = vector.broadcast %cst_60 : f32 to vector<8x256xf32>
    %481 = arith.select %25, %479, %480 : vector<8x256xi1>, vector<8x256xf32>
    %c17_61 = arith.constant 17 : index
    %482 = memref.load %arg1[%c17_61] : memref<162xf32, #tpu.memory_space<smem>>
    %483 = vector.broadcast %482 : f32 to vector<8x256xf32>
    %484 = arith.mulf %483, %481 : vector<8x256xf32>
    %485 = arith.addf %458, %484 : vector<8x256xf32>
    %c44 = arith.constant 44 : index
    %486 = memref.load %arg1[%c44] : memref<162xf32, #tpu.memory_space<smem>>
    %487 = vector.broadcast %486 : f32 to vector<8x256xf32>
    %488 = arith.mulf %487, %481 : vector<8x256xf32>
    %489 = arith.addf %462, %488 : vector<8x256xf32>
    %c71 = arith.constant 71 : index
    %490 = memref.load %arg1[%c71] : memref<162xf32, #tpu.memory_space<smem>>
    %491 = vector.broadcast %490 : f32 to vector<8x256xf32>
    %492 = arith.mulf %491, %481 : vector<8x256xf32>
    %493 = arith.addf %466, %492 : vector<8x256xf32>
    %c98 = arith.constant 98 : index
    %494 = memref.load %arg1[%c98] : memref<162xf32, #tpu.memory_space<smem>>
    %495 = vector.broadcast %494 : f32 to vector<8x256xf32>
    %496 = arith.mulf %495, %481 : vector<8x256xf32>
    %497 = arith.addf %470, %496 : vector<8x256xf32>
    %c125 = arith.constant 125 : index
    %498 = memref.load %arg1[%c125] : memref<162xf32, #tpu.memory_space<smem>>
    %499 = vector.broadcast %498 : f32 to vector<8x256xf32>
    %500 = arith.mulf %499, %481 : vector<8x256xf32>
    %501 = arith.addf %474, %500 : vector<8x256xf32>
    %c152 = arith.constant 152 : index
    %502 = memref.load %arg1[%c152] : memref<162xf32, #tpu.memory_space<smem>>
    %503 = vector.broadcast %502 : f32 to vector<8x256xf32>
    %504 = arith.mulf %503, %481 : vector<8x256xf32>
    %505 = arith.addf %478, %504 : vector<8x256xf32>
    %c2_62 = arith.constant 2 : index
    %c15_63 = arith.constant 15 : index
    %506 = vector.load %arg7[%c2_62, %c15_63] : memref<10x320xf32, #tpu.memory_space<vmem>>, vector<8x256xf32>
    %cst_64 = arith.constant 0.000000e+00 : f32
    %507 = vector.broadcast %cst_64 : f32 to vector<8x256xf32>
    %508 = arith.select %23, %506, %507 : vector<8x256xi1>, vector<8x256xf32>
    %c18 = arith.constant 18 : index
    %509 = memref.load %arg1[%c18] : memref<162xf32, #tpu.memory_space<smem>>
    %510 = vector.broadcast %509 : f32 to vector<8x256xf32>
    %511 = arith.mulf %510, %508 : vector<8x256xf32>
    %512 = arith.addf %485, %511 : vector<8x256xf32>
    %c45 = arith.constant 45 : index
    %513 = memref.load %arg1[%c45] : memref<162xf32, #tpu.memory_space<smem>>
    %514 = vector.broadcast %513 : f32 to vector<8x256xf32>
    %515 = arith.mulf %514, %508 : vector<8x256xf32>
    %516 = arith.addf %489, %515 : vector<8x256xf32>
    %c72 = arith.constant 72 : index
    %517 = memref.load %arg1[%c72] : memref<162xf32, #tpu.memory_space<smem>>
    %518 = vector.broadcast %517 : f32 to vector<8x256xf32>
    %519 = arith.mulf %518, %508 : vector<8x256xf32>
    %520 = arith.addf %493, %519 : vector<8x256xf32>
    %c99 = arith.constant 99 : index
    %521 = memref.load %arg1[%c99] : memref<162xf32, #tpu.memory_space<smem>>
    %522 = vector.broadcast %521 : f32 to vector<8x256xf32>
    %523 = arith.mulf %522, %508 : vector<8x256xf32>
    %524 = arith.addf %497, %523 : vector<8x256xf32>
    %c126 = arith.constant 126 : index
    %525 = memref.load %arg1[%c126] : memref<162xf32, #tpu.memory_space<smem>>
    %526 = vector.broadcast %525 : f32 to vector<8x256xf32>
    %527 = arith.mulf %526, %508 : vector<8x256xf32>
    %528 = arith.addf %501, %527 : vector<8x256xf32>
    %c153 = arith.constant 153 : index
    %529 = memref.load %arg1[%c153] : memref<162xf32, #tpu.memory_space<smem>>
    %530 = vector.broadcast %529 : f32 to vector<8x256xf32>
    %531 = arith.mulf %530, %508 : vector<8x256xf32>
    %532 = arith.addf %505, %531 : vector<8x256xf32>
    %c2_65 = arith.constant 2 : index
    %c16_66 = arith.constant 16 : index
    %533 = vector.load %arg7[%c2_65, %c16_66] : memref<10x320xf32, #tpu.memory_space<vmem>>, vector<8x256xf32>
    %c19 = arith.constant 19 : index
    %534 = memref.load %arg1[%c19] : memref<162xf32, #tpu.memory_space<smem>>
    %535 = vector.broadcast %534 : f32 to vector<8x256xf32>
    %536 = arith.mulf %535, %533 : vector<8x256xf32>
    %537 = arith.addf %512, %536 : vector<8x256xf32>
    %c46 = arith.constant 46 : index
    %538 = memref.load %arg1[%c46] : memref<162xf32, #tpu.memory_space<smem>>
    %539 = vector.broadcast %538 : f32 to vector<8x256xf32>
    %540 = arith.mulf %539, %533 : vector<8x256xf32>
    %541 = arith.addf %516, %540 : vector<8x256xf32>
    %c73 = arith.constant 73 : index
    %542 = memref.load %arg1[%c73] : memref<162xf32, #tpu.memory_space<smem>>
    %543 = vector.broadcast %542 : f32 to vector<8x256xf32>
    %544 = arith.mulf %543, %533 : vector<8x256xf32>
    %545 = arith.addf %520, %544 : vector<8x256xf32>
    %c100 = arith.constant 100 : index
    %546 = memref.load %arg1[%c100] : memref<162xf32, #tpu.memory_space<smem>>
    %547 = vector.broadcast %546 : f32 to vector<8x256xf32>
    %548 = arith.mulf %547, %533 : vector<8x256xf32>
    %549 = arith.addf %524, %548 : vector<8x256xf32>
    %c127 = arith.constant 127 : index
    %550 = memref.load %arg1[%c127] : memref<162xf32, #tpu.memory_space<smem>>
    %551 = vector.broadcast %550 : f32 to vector<8x256xf32>
    %552 = arith.mulf %551, %533 : vector<8x256xf32>
    %553 = arith.addf %528, %552 : vector<8x256xf32>
    %c154 = arith.constant 154 : index
    %554 = memref.load %arg1[%c154] : memref<162xf32, #tpu.memory_space<smem>>
    %555 = vector.broadcast %554 : f32 to vector<8x256xf32>
    %556 = arith.mulf %555, %533 : vector<8x256xf32>
    %557 = arith.addf %532, %556 : vector<8x256xf32>
    %c2_67 = arith.constant 2 : index
    %c17_68 = arith.constant 17 : index
    %558 = vector.load %arg7[%c2_67, %c17_68] : memref<10x320xf32, #tpu.memory_space<vmem>>, vector<8x256xf32>
    %cst_69 = arith.constant 0.000000e+00 : f32
    %559 = vector.broadcast %cst_69 : f32 to vector<8x256xf32>
    %560 = arith.select %25, %558, %559 : vector<8x256xi1>, vector<8x256xf32>
    %c20 = arith.constant 20 : index
    %561 = memref.load %arg1[%c20] : memref<162xf32, #tpu.memory_space<smem>>
    %562 = vector.broadcast %561 : f32 to vector<8x256xf32>
    %563 = arith.mulf %562, %560 : vector<8x256xf32>
    %564 = arith.addf %537, %563 : vector<8x256xf32>
    %c47_70 = arith.constant 47 : index
    %565 = memref.load %arg1[%c47_70] : memref<162xf32, #tpu.memory_space<smem>>
    %566 = vector.broadcast %565 : f32 to vector<8x256xf32>
    %567 = arith.mulf %566, %560 : vector<8x256xf32>
    %568 = arith.addf %541, %567 : vector<8x256xf32>
    %c74 = arith.constant 74 : index
    %569 = memref.load %arg1[%c74] : memref<162xf32, #tpu.memory_space<smem>>
    %570 = vector.broadcast %569 : f32 to vector<8x256xf32>
    %571 = arith.mulf %570, %560 : vector<8x256xf32>
    %572 = arith.addf %545, %571 : vector<8x256xf32>
    %c101 = arith.constant 101 : index
    %573 = memref.load %arg1[%c101] : memref<162xf32, #tpu.memory_space<smem>>
    %574 = vector.broadcast %573 : f32 to vector<8x256xf32>
    %575 = arith.mulf %574, %560 : vector<8x256xf32>
    %576 = arith.addf %549, %575 : vector<8x256xf32>
    %c128 = arith.constant 128 : index
    %577 = memref.load %arg1[%c128] : memref<162xf32, #tpu.memory_space<smem>>
    %578 = vector.broadcast %577 : f32 to vector<8x256xf32>
    %579 = arith.mulf %578, %560 : vector<8x256xf32>
    %580 = arith.addf %553, %579 : vector<8x256xf32>
    %c155 = arith.constant 155 : index
    %581 = memref.load %arg1[%c155] : memref<162xf32, #tpu.memory_space<smem>>
    %582 = vector.broadcast %581 : f32 to vector<8x256xf32>
    %583 = arith.mulf %582, %560 : vector<8x256xf32>
    %584 = arith.addf %557, %583 : vector<8x256xf32>
    %c2_71 = arith.constant 2 : index
    %c31_72 = arith.constant 31 : index
    %585 = vector.load %arg7[%c2_71, %c31_72] : memref<10x320xf32, #tpu.memory_space<vmem>>, vector<8x256xf32>
    %cst_73 = arith.constant 0.000000e+00 : f32
    %586 = vector.broadcast %cst_73 : f32 to vector<8x256xf32>
    %587 = arith.select %23, %585, %586 : vector<8x256xi1>, vector<8x256xf32>
    %c21 = arith.constant 21 : index
    %588 = memref.load %arg1[%c21] : memref<162xf32, #tpu.memory_space<smem>>
    %589 = vector.broadcast %588 : f32 to vector<8x256xf32>
    %590 = arith.mulf %589, %587 : vector<8x256xf32>
    %591 = arith.addf %564, %590 : vector<8x256xf32>
    %c48_74 = arith.constant 48 : index
    %592 = memref.load %arg1[%c48_74] : memref<162xf32, #tpu.memory_space<smem>>
    %593 = vector.broadcast %592 : f32 to vector<8x256xf32>
    %594 = arith.mulf %593, %587 : vector<8x256xf32>
    %595 = arith.addf %568, %594 : vector<8x256xf32>
    %c75 = arith.constant 75 : index
    %596 = memref.load %arg1[%c75] : memref<162xf32, #tpu.memory_space<smem>>
    %597 = vector.broadcast %596 : f32 to vector<8x256xf32>
    %598 = arith.mulf %597, %587 : vector<8x256xf32>
    %599 = arith.addf %572, %598 : vector<8x256xf32>
    %c102 = arith.constant 102 : index
    %600 = memref.load %arg1[%c102] : memref<162xf32, #tpu.memory_space<smem>>
    %601 = vector.broadcast %600 : f32 to vector<8x256xf32>
    %602 = arith.mulf %601, %587 : vector<8x256xf32>
    %603 = arith.addf %576, %602 : vector<8x256xf32>
    %c129 = arith.constant 129 : index
    %604 = memref.load %arg1[%c129] : memref<162xf32, #tpu.memory_space<smem>>
    %605 = vector.broadcast %604 : f32 to vector<8x256xf32>
    %606 = arith.mulf %605, %587 : vector<8x256xf32>
    %607 = arith.addf %580, %606 : vector<8x256xf32>
    %c156 = arith.constant 156 : index
    %608 = memref.load %arg1[%c156] : memref<162xf32, #tpu.memory_space<smem>>
    %609 = vector.broadcast %608 : f32 to vector<8x256xf32>
    %610 = arith.mulf %609, %587 : vector<8x256xf32>
    %611 = arith.addf %584, %610 : vector<8x256xf32>
    %c2_75 = arith.constant 2 : index
    %c32_76 = arith.constant 32 : index
    %612 = vector.load %arg7[%c2_75, %c32_76] : memref<10x320xf32, #tpu.memory_space<vmem>>, vector<8x256xf32>
    %c22 = arith.constant 22 : index
    %613 = memref.load %arg1[%c22] : memref<162xf32, #tpu.memory_space<smem>>
    %614 = vector.broadcast %613 : f32 to vector<8x256xf32>
    %615 = arith.mulf %614, %612 : vector<8x256xf32>
    %616 = arith.addf %591, %615 : vector<8x256xf32>
    %c49_77 = arith.constant 49 : index
    %617 = memref.load %arg1[%c49_77] : memref<162xf32, #tpu.memory_space<smem>>
    %618 = vector.broadcast %617 : f32 to vector<8x256xf32>
    %619 = arith.mulf %618, %612 : vector<8x256xf32>
    %620 = arith.addf %595, %619 : vector<8x256xf32>
    %c76 = arith.constant 76 : index
    %621 = memref.load %arg1[%c76] : memref<162xf32, #tpu.memory_space<smem>>
    %622 = vector.broadcast %621 : f32 to vector<8x256xf32>
    %623 = arith.mulf %622, %612 : vector<8x256xf32>
    %624 = arith.addf %599, %623 : vector<8x256xf32>
    %c103 = arith.constant 103 : index
    %625 = memref.load %arg1[%c103] : memref<162xf32, #tpu.memory_space<smem>>
    %626 = vector.broadcast %625 : f32 to vector<8x256xf32>
    %627 = arith.mulf %626, %612 : vector<8x256xf32>
    %628 = arith.addf %603, %627 : vector<8x256xf32>
    %c130 = arith.constant 130 : index
    %629 = memref.load %arg1[%c130] : memref<162xf32, #tpu.memory_space<smem>>
    %630 = vector.broadcast %629 : f32 to vector<8x256xf32>
    %631 = arith.mulf %630, %612 : vector<8x256xf32>
    %632 = arith.addf %607, %631 : vector<8x256xf32>
    %c157 = arith.constant 157 : index
    %633 = memref.load %arg1[%c157] : memref<162xf32, #tpu.memory_space<smem>>
    %634 = vector.broadcast %633 : f32 to vector<8x256xf32>
    %635 = arith.mulf %634, %612 : vector<8x256xf32>
    %636 = arith.addf %611, %635 : vector<8x256xf32>
    %c2_78 = arith.constant 2 : index
    %c33_79 = arith.constant 33 : index
    %637 = vector.load %arg7[%c2_78, %c33_79] : memref<10x320xf32, #tpu.memory_space<vmem>>, vector<8x256xf32>
    %cst_80 = arith.constant 0.000000e+00 : f32
    %638 = vector.broadcast %cst_80 : f32 to vector<8x256xf32>
    %639 = arith.select %25, %637, %638 : vector<8x256xi1>, vector<8x256xf32>
    %c23 = arith.constant 23 : index
    %640 = memref.load %arg1[%c23] : memref<162xf32, #tpu.memory_space<smem>>
    %641 = vector.broadcast %640 : f32 to vector<8x256xf32>
    %642 = arith.mulf %641, %639 : vector<8x256xf32>
    %643 = arith.addf %616, %642 : vector<8x256xf32>
    %c50 = arith.constant 50 : index
    %644 = memref.load %arg1[%c50] : memref<162xf32, #tpu.memory_space<smem>>
    %645 = vector.broadcast %644 : f32 to vector<8x256xf32>
    %646 = arith.mulf %645, %639 : vector<8x256xf32>
    %647 = arith.addf %620, %646 : vector<8x256xf32>
    %c77 = arith.constant 77 : index
    %648 = memref.load %arg1[%c77] : memref<162xf32, #tpu.memory_space<smem>>
    %649 = vector.broadcast %648 : f32 to vector<8x256xf32>
    %650 = arith.mulf %649, %639 : vector<8x256xf32>
    %651 = arith.addf %624, %650 : vector<8x256xf32>
    %c104 = arith.constant 104 : index
    %652 = memref.load %arg1[%c104] : memref<162xf32, #tpu.memory_space<smem>>
    %653 = vector.broadcast %652 : f32 to vector<8x256xf32>
    %654 = arith.mulf %653, %639 : vector<8x256xf32>
    %655 = arith.addf %628, %654 : vector<8x256xf32>
    %c131 = arith.constant 131 : index
    %656 = memref.load %arg1[%c131] : memref<162xf32, #tpu.memory_space<smem>>
    %657 = vector.broadcast %656 : f32 to vector<8x256xf32>
    %658 = arith.mulf %657, %639 : vector<8x256xf32>
    %659 = arith.addf %632, %658 : vector<8x256xf32>
    %c158 = arith.constant 158 : index
    %660 = memref.load %arg1[%c158] : memref<162xf32, #tpu.memory_space<smem>>
    %661 = vector.broadcast %660 : f32 to vector<8x256xf32>
    %662 = arith.mulf %661, %639 : vector<8x256xf32>
    %663 = arith.addf %636, %662 : vector<8x256xf32>
    %c2_81 = arith.constant 2 : index
    %c47_82 = arith.constant 47 : index
    %664 = vector.load %arg7[%c2_81, %c47_82] : memref<10x320xf32, #tpu.memory_space<vmem>>, vector<8x256xf32>
    %cst_83 = arith.constant 0.000000e+00 : f32
    %665 = vector.broadcast %cst_83 : f32 to vector<8x256xf32>
    %666 = arith.select %23, %664, %665 : vector<8x256xi1>, vector<8x256xf32>
    %c24 = arith.constant 24 : index
    %667 = memref.load %arg1[%c24] : memref<162xf32, #tpu.memory_space<smem>>
    %668 = vector.broadcast %667 : f32 to vector<8x256xf32>
    %669 = arith.mulf %668, %666 : vector<8x256xf32>
    %670 = arith.addf %643, %669 : vector<8x256xf32>
    %c51 = arith.constant 51 : index
    %671 = memref.load %arg1[%c51] : memref<162xf32, #tpu.memory_space<smem>>
    %672 = vector.broadcast %671 : f32 to vector<8x256xf32>
    %673 = arith.mulf %672, %666 : vector<8x256xf32>
    %674 = arith.addf %647, %673 : vector<8x256xf32>
    %c78 = arith.constant 78 : index
    %675 = memref.load %arg1[%c78] : memref<162xf32, #tpu.memory_space<smem>>
    %676 = vector.broadcast %675 : f32 to vector<8x256xf32>
    %677 = arith.mulf %676, %666 : vector<8x256xf32>
    %678 = arith.addf %651, %677 : vector<8x256xf32>
    %c105 = arith.constant 105 : index
    %679 = memref.load %arg1[%c105] : memref<162xf32, #tpu.memory_space<smem>>
    %680 = vector.broadcast %679 : f32 to vector<8x256xf32>
    %681 = arith.mulf %680, %666 : vector<8x256xf32>
    %682 = arith.addf %655, %681 : vector<8x256xf32>
    %c132 = arith.constant 132 : index
    %683 = memref.load %arg1[%c132] : memref<162xf32, #tpu.memory_space<smem>>
    %684 = vector.broadcast %683 : f32 to vector<8x256xf32>
    %685 = arith.mulf %684, %666 : vector<8x256xf32>
    %686 = arith.addf %659, %685 : vector<8x256xf32>
    %c159 = arith.constant 159 : index
    %687 = memref.load %arg1[%c159] : memref<162xf32, #tpu.memory_space<smem>>
    %688 = vector.broadcast %687 : f32 to vector<8x256xf32>
    %689 = arith.mulf %688, %666 : vector<8x256xf32>
    %690 = arith.addf %663, %689 : vector<8x256xf32>
    %c2_84 = arith.constant 2 : index
    %c48_85 = arith.constant 48 : index
    %691 = vector.load %arg7[%c2_84, %c48_85] : memref<10x320xf32, #tpu.memory_space<vmem>>, vector<8x256xf32>
    %c25 = arith.constant 25 : index
    %692 = memref.load %arg1[%c25] : memref<162xf32, #tpu.memory_space<smem>>
    %693 = vector.broadcast %692 : f32 to vector<8x256xf32>
    %694 = arith.mulf %693, %691 : vector<8x256xf32>
    %695 = arith.addf %670, %694 : vector<8x256xf32>
    %c52 = arith.constant 52 : index
    %696 = memref.load %arg1[%c52] : memref<162xf32, #tpu.memory_space<smem>>
    %697 = vector.broadcast %696 : f32 to vector<8x256xf32>
    %698 = arith.mulf %697, %691 : vector<8x256xf32>
    %699 = arith.addf %674, %698 : vector<8x256xf32>
    %c79 = arith.constant 79 : index
    %700 = memref.load %arg1[%c79] : memref<162xf32, #tpu.memory_space<smem>>
    %701 = vector.broadcast %700 : f32 to vector<8x256xf32>
    %702 = arith.mulf %701, %691 : vector<8x256xf32>
    %703 = arith.addf %678, %702 : vector<8x256xf32>
    %c106 = arith.constant 106 : index
    %704 = memref.load %arg1[%c106] : memref<162xf32, #tpu.memory_space<smem>>
    %705 = vector.broadcast %704 : f32 to vector<8x256xf32>
    %706 = arith.mulf %705, %691 : vector<8x256xf32>
    %707 = arith.addf %682, %706 : vector<8x256xf32>
    %c133 = arith.constant 133 : index
    %708 = memref.load %arg1[%c133] : memref<162xf32, #tpu.memory_space<smem>>
    %709 = vector.broadcast %708 : f32 to vector<8x256xf32>
    %710 = arith.mulf %709, %691 : vector<8x256xf32>
    %711 = arith.addf %686, %710 : vector<8x256xf32>
    %c160 = arith.constant 160 : index
    %712 = memref.load %arg1[%c160] : memref<162xf32, #tpu.memory_space<smem>>
    %713 = vector.broadcast %712 : f32 to vector<8x256xf32>
    %714 = arith.mulf %713, %691 : vector<8x256xf32>
    %715 = arith.addf %690, %714 : vector<8x256xf32>
    %c2_86 = arith.constant 2 : index
    %c49_87 = arith.constant 49 : index
    %716 = vector.load %arg7[%c2_86, %c49_87] : memref<10x320xf32, #tpu.memory_space<vmem>>, vector<8x256xf32>
    %cst_88 = arith.constant 0.000000e+00 : f32
    %717 = vector.broadcast %cst_88 : f32 to vector<8x256xf32>
    %718 = arith.select %25, %716, %717 : vector<8x256xi1>, vector<8x256xf32>
    %c26 = arith.constant 26 : index
    %719 = memref.load %arg1[%c26] : memref<162xf32, #tpu.memory_space<smem>>
    %720 = vector.broadcast %719 : f32 to vector<8x256xf32>
    %721 = arith.mulf %720, %718 : vector<8x256xf32>
    %722 = arith.addf %695, %721 : vector<8x256xf32>
    %c53 = arith.constant 53 : index
    %723 = memref.load %arg1[%c53] : memref<162xf32, #tpu.memory_space<smem>>
    %724 = vector.broadcast %723 : f32 to vector<8x256xf32>
    %725 = arith.mulf %724, %718 : vector<8x256xf32>
    %726 = arith.addf %699, %725 : vector<8x256xf32>
    %c80 = arith.constant 80 : index
    %727 = memref.load %arg1[%c80] : memref<162xf32, #tpu.memory_space<smem>>
    %728 = vector.broadcast %727 : f32 to vector<8x256xf32>
    %729 = arith.mulf %728, %718 : vector<8x256xf32>
    %730 = arith.addf %703, %729 : vector<8x256xf32>
    %c107 = arith.constant 107 : index
    %731 = memref.load %arg1[%c107] : memref<162xf32, #tpu.memory_space<smem>>
    %732 = vector.broadcast %731 : f32 to vector<8x256xf32>
    %733 = arith.mulf %732, %718 : vector<8x256xf32>
    %734 = arith.addf %707, %733 : vector<8x256xf32>
    %c134 = arith.constant 134 : index
    %735 = memref.load %arg1[%c134] : memref<162xf32, #tpu.memory_space<smem>>
    %736 = vector.broadcast %735 : f32 to vector<8x256xf32>
    %737 = arith.mulf %736, %718 : vector<8x256xf32>
    %738 = arith.addf %711, %737 : vector<8x256xf32>
    %c161 = arith.constant 161 : index
    %739 = memref.load %arg1[%c161] : memref<162xf32, #tpu.memory_space<smem>>
    %740 = vector.broadcast %739 : f32 to vector<8x256xf32>
    %741 = arith.mulf %740, %718 : vector<8x256xf32>
    %742 = arith.addf %715, %741 : vector<8x256xf32>
    %c0_89 = arith.constant 0 : index
    %c0_90 = arith.constant 0 : index
    %c0_91 = arith.constant 0 : index
    %743 = vector.load %arg3[%c0_89, %c0_90, %c0_91] : memref<1x16x1xi32, #tpu.memory_space<vmem>>, vector<1x16x1xi32>
    %744 = vector.shape_cast %743 : vector<1x16x1xi32> to vector<16x1xi32>
    %c0_92 = arith.constant 0 : index
    %c0_93 = arith.constant 0 : index
    %c0_94 = arith.constant 0 : index
    %745 = vector.load %arg4[%c0_92, %c0_93, %c0_94] : memref<1x16x1xi32, #tpu.memory_space<vmem>>, vector<1x16x1xi32>
    %746 = vector.shape_cast %745 : vector<1x16x1xi32> to vector<16x1xi32>
    %c0_95 = arith.constant 0 : index
    %c0_96 = arith.constant 0 : index
    %c0_97 = arith.constant 0 : index
    %747 = vector.load %arg5[%c0_95, %c0_96, %c0_97] : memref<1x16x3xf32, #tpu.memory_space<vmem>>, vector<1x16x3xf32>
    %748 = vector.shape_cast %747 : vector<1x16x3xf32> to vector<16x3xf32>
    %749 = tpu.iota {dimensions = array<i32: 1>} : vector<16x8xi32>
    %750 = vector.broadcast %744 : vector<16x1xi32> to vector<16x8xi32>
    %751 = arith.cmpi eq, %749, %750 : vector<16x8xi32>
    %752 = arith.extui %751 : vector<16x8xi1> to vector<16x8xi32>
    %753 = arith.sitofp %752 : vector<16x8xi32> to vector<16x8xf32>
    %754 = tpu.iota {dimensions = array<i32: 1>} : vector<16x256xi32>
    %755 = vector.broadcast %746 : vector<16x1xi32> to vector<16x256xi32>
    %756 = arith.cmpi eq, %754, %755 : vector<16x256xi32>
    %757 = arith.extui %756 : vector<16x256xi1> to vector<16x256xi32>
    %758 = arith.sitofp %757 : vector<16x256xi32> to vector<16x256xf32>
    %759 = tpu.iota {dimensions = array<i32: 1>} : vector<16x6xi32>
    %cst_98 = arith.constant 0.000000e+00 : f32
    %760 = vector.broadcast %cst_98 : f32 to vector<16x6xf32>
    %cst_99 = arith.constant dense<0.000000e+00> : vector<16x256xf32>
    %761 = tpu.matmul %753, %722, %cst_99 {dimension_numbers = #tpu.dot_dimension_numbers<[1], [0], [0], [1], [0, 0, 1, 1], [], []>} : vector<16x8xf32>, vector<8x256xf32>, vector<16x256xf32> -> vector<16x256xf32>
    %762 = arith.mulf %761, %758 : vector<16x256xf32>
    %cst_100 = arith.constant dense<0.000000e+00> : vector<16xf32>
    %763 = vector.multi_reduction <add>, %762, %cst_100 [1] : vector<16x256xf32> to vector<16xf32>
    %764 = vector.shape_cast %763 : vector<16xf32> to vector<16x1xf32>
    %c0_i32_101 = arith.constant 0 : i32
    %765 = vector.broadcast %c0_i32_101 : i32 to vector<16x6xi32>
    %766 = arith.cmpi eq, %759, %765 : vector<16x6xi32>
    %767 = vector.shape_cast %764 : vector<16x1xf32> to vector<16x1xf32>
    %768 = vector.broadcast %767 : vector<16x1xf32> to vector<16x6xf32>
    %769 = arith.select %766, %768, %760 : vector<16x6xi1>, vector<16x6xf32>
    %cst_102 = arith.constant dense<0.000000e+00> : vector<16x256xf32>
    %770 = tpu.matmul %753, %726, %cst_102 {dimension_numbers = #tpu.dot_dimension_numbers<[1], [0], [0], [1], [0, 0, 1, 1], [], []>} : vector<16x8xf32>, vector<8x256xf32>, vector<16x256xf32> -> vector<16x256xf32>
    %771 = arith.mulf %770, %758 : vector<16x256xf32>
    %cst_103 = arith.constant dense<0.000000e+00> : vector<16xf32>
    %772 = vector.multi_reduction <add>, %771, %cst_103 [1] : vector<16x256xf32> to vector<16xf32>
    %773 = vector.shape_cast %772 : vector<16xf32> to vector<16x1xf32>
    %c1_i32_104 = arith.constant 1 : i32
    %774 = vector.broadcast %c1_i32_104 : i32 to vector<16x6xi32>
    %775 = arith.cmpi eq, %759, %774 : vector<16x6xi32>
    %776 = vector.shape_cast %773 : vector<16x1xf32> to vector<16x1xf32>
    %777 = vector.broadcast %776 : vector<16x1xf32> to vector<16x6xf32>
    %778 = arith.select %775, %777, %769 : vector<16x6xi1>, vector<16x6xf32>
    %cst_105 = arith.constant dense<0.000000e+00> : vector<16x256xf32>
    %779 = tpu.matmul %753, %730, %cst_105 {dimension_numbers = #tpu.dot_dimension_numbers<[1], [0], [0], [1], [0, 0, 1, 1], [], []>} : vector<16x8xf32>, vector<8x256xf32>, vector<16x256xf32> -> vector<16x256xf32>
    %780 = arith.mulf %779, %758 : vector<16x256xf32>
    %cst_106 = arith.constant dense<0.000000e+00> : vector<16xf32>
    %781 = vector.multi_reduction <add>, %780, %cst_106 [1] : vector<16x256xf32> to vector<16xf32>
    %782 = vector.shape_cast %781 : vector<16xf32> to vector<16x1xf32>
    %c2_i32 = arith.constant 2 : i32
    %783 = vector.broadcast %c2_i32 : i32 to vector<16x6xi32>
    %784 = arith.cmpi eq, %759, %783 : vector<16x6xi32>
    %785 = vector.shape_cast %782 : vector<16x1xf32> to vector<16x1xf32>
    %786 = vector.broadcast %785 : vector<16x1xf32> to vector<16x6xf32>
    %787 = arith.select %784, %786, %778 : vector<16x6xi1>, vector<16x6xf32>
    %cst_107 = arith.constant dense<0.000000e+00> : vector<16x256xf32>
    %788 = tpu.matmul %753, %734, %cst_107 {dimension_numbers = #tpu.dot_dimension_numbers<[1], [0], [0], [1], [0, 0, 1, 1], [], []>} : vector<16x8xf32>, vector<8x256xf32>, vector<16x256xf32> -> vector<16x256xf32>
    %789 = arith.mulf %788, %758 : vector<16x256xf32>
    %cst_108 = arith.constant dense<0.000000e+00> : vector<16xf32>
    %790 = vector.multi_reduction <add>, %789, %cst_108 [1] : vector<16x256xf32> to vector<16xf32>
    %791 = vector.shape_cast %790 : vector<16xf32> to vector<16x1xf32>
    %c3_i32 = arith.constant 3 : i32
    %792 = vector.broadcast %c3_i32 : i32 to vector<16x6xi32>
    %793 = arith.cmpi eq, %759, %792 : vector<16x6xi32>
    %794 = vector.shape_cast %791 : vector<16x1xf32> to vector<16x1xf32>
    %795 = vector.broadcast %794 : vector<16x1xf32> to vector<16x6xf32>
    %796 = arith.select %793, %795, %787 : vector<16x6xi1>, vector<16x6xf32>
    %cst_109 = arith.constant dense<0.000000e+00> : vector<16x256xf32>
    %797 = tpu.matmul %753, %738, %cst_109 {dimension_numbers = #tpu.dot_dimension_numbers<[1], [0], [0], [1], [0, 0, 1, 1], [], []>} : vector<16x8xf32>, vector<8x256xf32>, vector<16x256xf32> -> vector<16x256xf32>
    %798 = arith.mulf %797, %758 : vector<16x256xf32>
    %cst_110 = arith.constant dense<0.000000e+00> : vector<16xf32>
    %799 = vector.multi_reduction <add>, %798, %cst_110 [1] : vector<16x256xf32> to vector<16xf32>
    %800 = vector.shape_cast %799 : vector<16xf32> to vector<16x1xf32>
    %c4_i32 = arith.constant 4 : i32
    %801 = vector.broadcast %c4_i32 : i32 to vector<16x6xi32>
    %802 = arith.cmpi eq, %759, %801 : vector<16x6xi32>
    %803 = vector.shape_cast %800 : vector<16x1xf32> to vector<16x1xf32>
    %804 = vector.broadcast %803 : vector<16x1xf32> to vector<16x6xf32>
    %805 = arith.select %802, %804, %796 : vector<16x6xi1>, vector<16x6xf32>
    %cst_111 = arith.constant dense<0.000000e+00> : vector<16x256xf32>
    %806 = tpu.matmul %753, %742, %cst_111 {dimension_numbers = #tpu.dot_dimension_numbers<[1], [0], [0], [1], [0, 0, 1, 1], [], []>} : vector<16x8xf32>, vector<8x256xf32>, vector<16x256xf32> -> vector<16x256xf32>
    %807 = arith.mulf %806, %758 : vector<16x256xf32>
    %cst_112 = arith.constant dense<0.000000e+00> : vector<16xf32>
    %808 = vector.multi_reduction <add>, %807, %cst_112 [1] : vector<16x256xf32> to vector<16xf32>
    %809 = vector.shape_cast %808 : vector<16xf32> to vector<16x1xf32>
    %c5_i32 = arith.constant 5 : i32
    %810 = vector.broadcast %c5_i32 : i32 to vector<16x6xi32>
    %811 = arith.cmpi eq, %759, %810 : vector<16x6xi32>
    %812 = vector.shape_cast %809 : vector<16x1xf32> to vector<16x1xf32>
    %813 = vector.broadcast %812 : vector<16x1xf32> to vector<16x6xf32>
    %814 = arith.select %811, %813, %805 : vector<16x6xi1>, vector<16x6xf32>
    %cst_113 = arith.constant dense<0xFF800000> : vector<6xf32>
    %815 = vector.multi_reduction <maximumf>, %814, %cst_113 [0] : vector<16x6xf32> to vector<6xf32>
    %816 = vector.shape_cast %815 : vector<6xf32> to vector<1x6xf32>
    %817 = vector.shape_cast %816 : vector<1x6xf32> to vector<1x6xf32>
    %818 = vector.broadcast %817 : vector<1x6xf32> to vector<16x6xf32>
    %819 = tpu.iota {dimensions = array<i32: 0>} : vector<3x15xi32>
    %820 = tpu.iota {dimensions = array<i32: 1>} : vector<3x15xi32>
    %c0_i32_114 = arith.constant 0 : i32
    %821 = vector.broadcast %c0_i32_114 : i32 to vector<3x15xi32>
    %822 = arith.addi %819, %821 : vector<3x15xi32>
    %823 = arith.cmpi eq, %820, %822 : vector<3x15xi32>
    %824 = arith.extui %823 : vector<3x15xi1> to vector<3x15xi32>
    %825 = arith.sitofp %824 : vector<3x15xi32> to vector<3x15xf32>
    %cst_115 = arith.constant dense<0.000000e+00> : vector<16x15xf32>
    %826 = tpu.matmul %748, %825, %cst_115 {dimension_numbers = #tpu.dot_dimension_numbers<[1], [0], [0], [1], [0, 0, 1, 1], [], []>} : vector<16x3xf32>, vector<3x15xf32>, vector<16x15xf32> -> vector<16x15xf32>
    %827 = tpu.iota {dimensions = array<i32: 0>} : vector<6x15xi32>
    %828 = tpu.iota {dimensions = array<i32: 1>} : vector<6x15xi32>
    %c3_i32_116 = arith.constant 3 : i32
    %829 = vector.broadcast %c3_i32_116 : i32 to vector<6x15xi32>
    %830 = arith.addi %827, %829 : vector<6x15xi32>
    %831 = arith.cmpi eq, %828, %830 : vector<6x15xi32>
    %832 = arith.extui %831 : vector<6x15xi1> to vector<6x15xi32>
    %833 = arith.sitofp %832 : vector<6x15xi32> to vector<6x15xf32>
    %cst_117 = arith.constant dense<0.000000e+00> : vector<16x15xf32>
    %834 = tpu.matmul %814, %833, %cst_117 {dimension_numbers = #tpu.dot_dimension_numbers<[1], [0], [0], [1], [0, 0, 1, 1], [], []>} : vector<16x6xf32>, vector<6x15xf32>, vector<16x15xf32> -> vector<16x15xf32>
    %835 = arith.addf %826, %834 : vector<16x15xf32>
    %836 = tpu.iota {dimensions = array<i32: 0>} : vector<6x15xi32>
    %837 = tpu.iota {dimensions = array<i32: 1>} : vector<6x15xi32>
    %c9_i32 = arith.constant 9 : i32
    %838 = vector.broadcast %c9_i32 : i32 to vector<6x15xi32>
    %839 = arith.addi %836, %838 : vector<6x15xi32>
    %840 = arith.cmpi eq, %837, %839 : vector<6x15xi32>
    %841 = arith.extui %840 : vector<6x15xi1> to vector<6x15xi32>
    %842 = arith.sitofp %841 : vector<6x15xi32> to vector<6x15xf32>
    %cst_118 = arith.constant dense<0.000000e+00> : vector<16x15xf32>
    %843 = tpu.matmul %818, %842, %cst_118 {dimension_numbers = #tpu.dot_dimension_numbers<[1], [0], [0], [1], [0, 0, 1, 1], [], []>} : vector<16x6xf32>, vector<6x15xf32>, vector<16x15xf32> -> vector<16x15xf32>
    %844 = arith.addf %835, %843 : vector<16x15xf32>
    %c0_119 = arith.constant 0 : index
    %c0_120 = arith.constant 0 : index
    %c0_121 = arith.constant 0 : index
    %845 = vector.load %arg6[%c0_119, %c0_120, %c0_121] : memref<1x16x15xf32, #tpu.memory_space<vmem>>, vector<1x16x15xf32>
    %846 = vector.shape_cast %845 : vector<1x16x15xf32> to vector<16x15xf32>
    %847 = vector.shape_cast %844 : vector<16x15xf32> to vector<1x16x15xf32>
    tpu.vector_store %arg6[%c0_119, %c0_120, %c0_121], %847 {strides = array<i32>} : memref<1x16x15xf32, #tpu.memory_space<vmem>>, vector<1x16x15xf32>,
    return
  }
  func.func @transform_0(%arg0: i32) -> i32 {
    %c0_i32 = arith.constant 0 : i32
    %c0_i32_0 = arith.constant 0 : i32
    return %c0_i32 : i32
  }
  func.func @transform_1(%arg0: i32) -> (i32, i32, i32) {
    %c0_i32 = arith.constant 0 : i32
    %c0_i32_0 = arith.constant 0 : i32
    %c0_i32_1 = arith.constant 0 : i32
    return %arg0, %c0_i32, %c0_i32_0 : i32, i32, i32
  }
  func.func @transform_2(%arg0: i32) -> (i32, i32, i32) {
    %c0_i32 = arith.constant 0 : i32
    %c0_i32_0 = arith.constant 0 : i32
    %c0_i32_1 = arith.constant 0 : i32
    return %arg0, %c0_i32, %c0_i32_0 : i32, i32, i32
  }
  func.func @transform_3(%arg0: i32) -> (i32, i32, i32) {
    %c0_i32 = arith.constant 0 : i32
    %c0_i32_0 = arith.constant 0 : i32
    %c0_i32_1 = arith.constant 0 : i32
    return %arg0, %c0_i32, %c0_i32_0 : i32, i32, i32
  }
  func.func @transform_4(%arg0: i32) -> (i32, i32, i32) {
    %c0_i32 = arith.constant 0 : i32
    %c0_i32_0 = arith.constant 0 : i32
    %c0_i32_1 = arith.constant 0 : i32
    return %arg0, %c0_i32, %c0_i32_0 : i32, i32, i32
  }
  func.func @transform_5(%arg0: i32) -> (i32, i32, i32) {
    %c0_i32 = arith.constant 0 : i32
    %c0_i32_0 = arith.constant 0 : i32
    %c0_i32_1 = arith.constant 0 : i32
    return %arg0, %c0_i32, %c0_i32_0 : i32, i32, i32
  }
}

</mosaic_0001>

<bundles_post_ra>
// kernel: tpu_custom_call.1
= control target key start
LH: loop header
LB: loop body
LE: loop exit
PB: predicated region body
PF: predicated region fallthrough
CT: control target
= control target key end

     0   :  { %10 = vsyncpa [#allocation4], 0  ;;  %s4231_s18 = smov 0   ;;  %s7460_s0 = inlined_call_operand.vmem [shape: f32[162], index: 0, kind: input, shape index: {}]   ;;  %s7461_s1 = inlined_call_operand.vmem [shape: f32[2,8,256], index: 1, kind: input, shape index: {}]   ;;  %s7462_s2 = inlined_call_operand.vmem [shape: s32[2,16,1], index: 2, kind: input, shape index: {}]   ;;  %s7463_s3 = inlined_call_operand.vmem [shape: s32[2,16,1], index: 3, kind: input, shape index: {}]   ;;  %s7464_s4 = inlined_call_operand.vmem [shape: f32[2,16,3], index: 4, kind: input, shape index: {}]   ;;  %s7465_s5 = inlined_call_operand.vmem [shape: f32[2,16,15], index: 5, kind: output, shape index: {}]  }
   0x1 LB: > { %s4237_s19 = sadd.s32 4294967295, %s4186_s18   ;;  %p3873_p0 = scmp.ge.s32.totalorder %s4186_s18, 1  ;;  %s4186_s18 = sphi %s4231_s18, %s16_s18  }
   0x2   : > { %p172_p1 = scmp.lt.s32.totalorder %s4186_s18, 3  ;;  %s185_s22 = sshll.u32 %s7460_s0, 4  ;;  %s186_s22 = int_to_ptr.vmem [resolvable:$true] %s185_s22 }
   0x3   : > { %p4122_p3 = scmp.eq.s32.totalorder %s4237_s19, 0  ;;  %s4161_s24 = scalar_lea.vmem %s186_s22, 32 }
   0x4   : > { %p4244_p2 = pnand %p3873_p0, %p172_p1  ;;  %p4162_p6 = scmp.ne.s32.totalorder %s186_s22, %s4161_s24 }
   0x5   : > { %p4169_p10 = scmp.lt.s32.totalorder %s186_s22, %s186_s22  ;;  %p4170_p11 = scmp.lt.s32.totalorder %s4161_s24, %s4161_s24 }
   0x6   : > { %p4118_p4 = pneg %p4244_p2 }
   0x7   : > { %p4171_p12 = por %p4170_p11, %p4169_p10 }
   0x8   : > { %p4119_p5 = pnand %p4122_p3, %p4118_p4 }
   0xa   : > { %p4163_p7 = pneg %p4119_p5 }
   0xc   : > { %p4164_p8 = pnand %p4163_p7, %p4162_p6 }
   0xe   : > { %p4165_p9 = pneg %p4164_p8 }
  0x10   : > { %p4172_p13 = pnand %p4171_p12, %p4165_p9 }
  0x12   : > { %4175 = shalt.err (!%p4172_p13)
}
  0x13   : > { %s4188_s25 = smov [#allocation3]   ;;  %230 = sbr.rel (%p4244_p2) target bundleno = 1334 (0x536), region = 40 }
  0x14   : > { %4121 = dma.vmem_to_smem (!%p4119_p5), %s186_s22, 32, %s4188_s25, [#allocation4]  }
  0x1a   : > { %4181 = dma.done.wait (%p4122_p3), [#allocation4], 32  }
  0x1b   : > { %4183 = vsyncadd (%p4122_p3), [#allocation4], 4294967264 }
  0x1c   : > { %236 = sfence }
  0x1d   : > { %p274_p0 = scmp.lt.s32.totalorder %s4237_s19, 1  ;;  %vm301_vm0 = vcmask 523264   ;;  %v7466_v0 = vmov 0.0   ;;  %vm305_vm1 = vcmask 517120   ;;  %s4190_s30 = smov 32   ;;  %vm322_vm2 = vcmask 1047809  }
  0x1e   : > { %299 = vst [vmem:[#allocation2] sm:$0xff] %v7466_v0  ;;  %303 = vst [vmem:[#allocation2 + $0x18] sm:$0x3] %v7466_v0  ;;  %3013 = vmatprep.mubr.f32.mxu1 %v7466_v0  ;;  %3193 = vmatprep.mubr.f32.mxu0 %v7466_v0  ;;  %vm327_vm3 = vcmask 1040640   ;;  %vm317_vm4 = vcmask 261120   ;;  %vm325_vm5 = vcmask 261121  }
  0x1f   : > { %300 = vst [vmem:[#allocation2 + $0x8] sm:$0xff] %v7466_v0  ;;  %304 = vst [vmem:[#allocation2 + $0x20] sm:$0x3] %v7466_v0  ;;  %s7896_s19 = smov (!%p274_p0, %s4237_s19), 1  ;;  %vm330_vm6 = vcmask 253952   ;;  %s4191_s6 = smov 113  }
  0x20   : > { %302 = vst.msk [vmem:[#allocation2 + $0x10] sm:$0xff] %vm301_vm0, %v7466_v0  ;;  %s4269_s26 = sshll.u32 %s7896_s19, 4  ;;  %s4192_s7 = smov 111   ;;  %vm1038_vm7 = vcmask 1046528   ;;  %vm1978_vm8 = vcmask 1045504   ;;  %vm375_vm11 = vcmask 924672  }
  0x21   : > { %306 = vst.msk [vmem:[#allocation2 + $0x28] sm:$0x3] %vm305_vm1, %v7466_v0  ;;  %s278_s29 = scalar_lea.vmem %s7461_s1, %s4269_s26  ;;  %s4193_s8 = smov 97   ;;  %vm545_vm12 = vcmask 908288   ;;  %vm594_vm15 = vcmask 793600   ;;  %vm432_vm0 = vcmask 916480  }
  0x22   : > { %v307_v1 = vld [vmem:[%s278_s29] sm:$0xff]  ;;  %v308_v2 = vld [vmem:[%s278_s29 + $0x8] sm:$0xff]  ;;  %s4194_s9 = smov 95   ;;  %s4195_s10 = smov 81   ;;  %vm764_vm1 = vcmask 777216  }
  0x23   : > { %v311_v3 = vrot.slane %v307_v1, 7  ;;  %v312_v4 = vrot.slane %v308_v2, 7  ;;  %s4196_s11 = smov 79   ;;  %s3893_s12 = sld [smem:[#allocation3 + $0x1]] }
  0x24   : > { %s3911_s13 = sld [smem:[#allocation3 + $0x4]]  ;;  %s3895_s14 = sld [smem:[#allocation3 + $0x37]] }
  0x25   : > { %313 = vrot.lane.b32.xlu0 %v311_v3, %s4190_s30  ;;  %s4197_s15 = smov 112   ;;  %s3894_s16 = sld [smem:[#allocation3 + $0x1c]] }
  0x26   : > { %s4198_s17 = smov 96   ;;  %s3896_s19 = sld [smem:[#allocation3 + $0x52]] }
  0x27   : > { %s3913_s20 = sld [smem:[#allocation3 + $0x3a]]  ;;  %s3929_s21 = sld [smem:[#allocation3 + $0x7]] }
  0x28   : > { %s3914_s22 = sld [smem:[#allocation3 + $0x55]]  ;;  %s3912_s23 = sld [smem:[#allocation3 + $0x1f]] }
  0x29   : > { %315 = vrot.lane.b32.xlu0 %v312_v4, %s4190_s30  ;;  %v4315_v11 = vstv %s3893_s12  ;;  %s4199_s24 = smov 80   ;;  %s3897_s25 = sld [smem:[#allocation3 + $0x6d]] }
  0x2a   : > { %v4322_v13 = vstv %s3911_s13  ;;  %v4330_v16 = vstv %s3895_s14  ;;  %s3898_s27 = sld [smem:[#allocation3 + $0x88]]  ;;  %s3930_s28 = sld [smem:[#allocation3 + $0x22]] }
  0x2b   : > { %v440_v19 = vstv %s3894_s16  ;;  %s3947_s29 = sld [smem:[#allocation3 + $0xa]]  ;;  %s3965_s30 = sld [smem:[#allocation3 + $0xd]] }
  0x2c   : > { %v4343_v22 = vstv %s3896_s19  ;;  %s3948_s12 = sld [smem:[#allocation3 + $0x25]]  ;;  %s3932_s14 = sld [smem:[#allocation3 + $0x58]] }
  0x2d   : > { %v4350_v25 = vstv %s3913_s20  ;;  %v857_v26 = vstv %s3929_s21  ;;  %s3931_s13 = sld [smem:[#allocation3 + $0x3d]]  ;;  %s3915_s16 = sld [smem:[#allocation3 + $0x70]] }
  0x2e   : > { %v4362_v31 = vstv %s3914_s22  ;;  %v659_v32 = vstv %s3912_s23  ;;  %s3983_s19 = sld [smem:[#allocation3 + $0x10]]  ;;  %s3916_s20 = sld [smem:[#allocation3 + $0x8b]] }
  0x2f   : > { %v4369_v35 = vstv %s3897_s25  ;;  %s3966_s21 = sld [smem:[#allocation3 + $0x28]]  ;;  %s4648_s23 = sld [smem:[#allocation3 + $0x5b]] }
  0x30   : > { %v4382_v40 = vstv %s3898_s27  ;;  %v878_v41 = vstv %s3930_s28  ;;  %s4624_s22 = sld [smem:[#allocation3 + $0x40]]  ;;  %s4650_s25 = sld [smem:[#allocation3 + $0x73]] }
  0x31   : > { %s4656_s27 = sld [smem:[#allocation3 + $0x13]] }
  0x32   : > { %s4666_s28 = sld [smem:[#allocation3 + $0x2b]] }
  0x97   : > { %v314_v5 = vpop.permute.xlu0 %313 }
  0x98   : > { %323 = vst.msk [vmem:[#allocation2] sm:$0xfe] %vm322_vm2, %v314_v5  ;;  %vm813_vm2 = vcmask 662528  }
  0x99   : > { %328 = vst.msk [vmem:[#allocation2 + $0x18] sm:$0x1] %vm327_vm3, %v314_v5  ;;  %vm651_vm3 = vcmask 785408  }
  0x9b   : > { %v316_v6 = vpop.permute.xlu0 %315 }
  0x9c   : > { %v318_v7 = vsel %vm317_vm4, %v314_v5, %v316_v6  ;;  %326 = vst.msk [vmem:[#allocation2 + $0x10] sm:$0xfe] %vm325_vm5, %v316_v6  ;;  %vm983_vm4 = vcmask 646144   ;;  %vm870_vm5 = vcmask 654336  }
  0x9d   : > { %331 = vst.msk [vmem:[#allocation2 + $0x28] sm:$0x1] %vm330_vm6, %v316_v6  ;;  %324 = vst [vmem:[#allocation2 + $0x8] sm:$0xfe] %v318_v7 }
  0x9e   : > { %329 = vst [vmem:[#allocation2 + $0x20] sm:$0x1] %v318_v7 }
  0x9f   : > { %v4275_v8 = vld [vmem:[#allocation2] sm:$0xff] }
  0xa0   : > { %369 = vrot.lane.b32.xlu0 %v4275_v8, %s4191_s6  ;;  %v420_v14 = vmul.f32 %v4315_v11, %v4275_v8  ;;  %v639_v18 = vmul.f32 %v4322_v13, %v4275_v8  ;;  %v461_v20 = vmul.f32 %v4330_v16, %v4275_v8  ;;  %v441_v24 = vmul.f32 %v440_v19, %v4275_v8  ;;  %v4408_v54 = vld [vmem:[#allocation2] sm:$0xfe]  ;;  %v4410_v55 = vld [vmem:[#allocation2 + $0x18] sm:$0x1] }
  0xa1   : > { %v680_v29 = vmul.f32 %v4350_v25, %v4275_v8  ;;  %v858_v30 = vmul.f32 %v857_v26, %v4275_v8  ;;  %v660_v37 = vmul.f32 %v659_v32, %v4275_v8  ;;  %v501_v38 = vmul.f32 %v4369_v35, %v4275_v8 }
  0xa2   : > { %v481_v39 = vmul.f32 %v4343_v22, %v4275_v8  ;;  %v879_v44 = vmul.f32 %v878_v41, %v4275_v8  ;;  %v700_v46 = vmul.f32 %v4362_v31, %v4275_v8  ;;  %v1039_v58 = vrot.slane %v4408_v54, 1 }
  0xa3   : > { %v4279_v9 = vld [vmem:[#allocation2 + $0x10] sm:$0xff]  ;;  %v1040_v59 = vrot.slane %v4410_v55, 1 }
  0xa4   : > { %543 = vrot.lane.b32.xlu0 %v4279_v9, %s4192_s7  ;;  %373 = vrot.lane.b32.xlu1 %v4279_v9, %s4191_s6  ;;  %v4301_v10 = vld [vmem:[#allocation2 + $0x8] sm:$0xff]  ;;  %v422_v12 = vmul.f32 %v4315_v11, %v4279_v9  ;;  %v641_v15 = vmul.f32 %v4322_v13, %v4279_v9  ;;  %v463_v17 = vmul.f32 %v4330_v16, %v4279_v9  ;;  %v4397_v48 = vld [vmem:[#allocation2 + $0x10] sm:$0xfe] }
  0xa5   : > { %v443_v21 = vmul.f32 %v440_v19, %v4279_v9  ;;  %v483_v23 = vmul.f32 %v4343_v22, %v4279_v9  ;;  %v682_v27 = vmul.f32 %v4350_v25, %v4279_v9  ;;  %v860_v28 = vmul.f32 %v857_v26, %v4279_v9  ;;  %v4399_v49 = vld [vmem:[#allocation2 + $0x28] sm:$0x1]  ;;  %v4437_v1 = vld [vmem:[#allocation2 + $0x8] sm:$0xfe]  ;;  %v4439_v2 = vld [vmem:[#allocation2 + $0x20] sm:$0x1] }
  0xa6   : > { %v702_v33 = vmul.f32 %v4362_v31, %v4279_v9  ;;  %v662_v34 = vmul.f32 %v659_v32, %v4279_v9  ;;  %v503_v36 = vmul.f32 %v4369_v35, %v4279_v9  ;;  %v523_v42 = vmul.f32 %v4382_v40, %v4279_v9  ;;  %7554 = vst [vmem:[#allocation6_spill] sm:$0xff] %v4399_v49 }
  0xa7   : > { %v881_v43 = vmul.f32 %v878_v41, %v4279_v9  ;;  %v640_v45 = vmul.f32 %v4322_v13, %v4301_v10  ;;  %v442_v47 = vmul.f32 %v440_v19, %v4301_v10  ;;  %v859_v50 = vmul.f32 %v857_v26, %v4301_v10 }
  0xa8   : > { %592 = vrot.lane.b32.xlu0 %v4279_v9, %s4193_s8  ;;  %539 = vrot.lane.b32.xlu1 %v4275_v8, %s4192_s7  ;;  %v421_v51 = vmul.f32 %v4315_v11, %v4301_v10  ;;  %v1045_v52 = vrot.slane %v4397_v48, 1  ;;  %v1046_v53 = vrot.slane %v4399_v49, 1  ;;  %v661_v56 = vmul.f32 %v659_v32, %v4301_v10 }
  0xa9   : > { %v462_v60 = vmul.f32 %v4330_v16, %v4301_v10  ;;  %v4426_v61 = vsel %vm1038_vm7, %v1039_v58, %v1040_v59  ;;  %v482_v62 = vmul.f32 %v4343_v22, %v4301_v10  ;;  %v880_v63 = vmul.f32 %v878_v41, %v4301_v10 }
  0xaa   : > { %v4416_v57 = vsel %vm1038_vm7, %v1045_v52, %v1046_v53  ;;  %v1042_v3 = vrot.slane %v4437_v1, 1  ;;  %v1043_v4 = vrot.slane %v4439_v2, 1  ;;  %v681_v5 = vmul.f32 %v4350_v25, %v4301_v10 }
  0xab   : > { %v701_v11 = vmul.f32 %v4362_v31, %v4301_v10  ;;  %v1132_v52 = vstv %s3948_s12  ;;  %s4762_s12 = sld [smem:[#allocation3 + $0x51]] }
  0xac   : > { %758 = vrot.lane.b32.xlu0 %v4275_v8, %s4194_s9  ;;  %588 = vrot.lane.b32.xlu1 %v4275_v8, %s4193_s8  ;;  %v4453_v6 = vsel %vm1038_vm7, %v1042_v3, %v1043_v4  ;;  %v1134_v58 = vmul.f32 %v1132_v52, %v4437_v1  ;;  %v1137_v59 = vmul.f32 %v1132_v52, %v4439_v2 }
  0xae   : > { %v1148_v3 = vrot.slane %v1134_v58, 1  ;;  %v1149_v4 = vrot.slane %v1137_v59, 1 }
  0xb0   : > { %807 = vrot.lane.b32.xlu0 %v4275_v8, %s4195_s10  ;;  %762 = vrot.lane.b32.xlu1 %v4279_v9, %s4194_s9 }
  0xb4   : > { %977 = vrot.lane.b32.xlu0 %v4275_v8, %s4196_s11  ;;  %811 = vrot.lane.b32.xlu1 %v4279_v9, %s4195_s10 }
  0xb8   : > { %981 = vrot.lane.b32.xlu1 %v4279_v9, %s4196_s11  ;;  %760 = vrot.lane.b32.xlu0 %v4301_v10, %s4194_s9 }
  0xbc   : > { %809 = vrot.lane.b32.xlu0 %v4301_v10, %s4195_s10  ;;  %371 = vrot.lane.b32.xlu1 %v4301_v10, %s4191_s6 }
  0xc0   : > { %979 = vrot.lane.b32.xlu0 %v4301_v10, %s4196_s11  ;;  %541 = vrot.lane.b32.xlu1 %v4301_v10, %s4192_s7 }
  0xc4   : > { %430 = vrot.lane.b32.xlu0 %v422_v12, %s4197_s15  ;;  %590 = vrot.lane.b32.xlu1 %v4301_v10, %s4193_s8 }
  0xc8   : > { %426 = vrot.lane.b32.xlu0 %v420_v14, %s4197_s15  ;;  %649 = vrot.lane.b32.xlu1 %v641_v15, %s4198_s17  ;;  %v502_v14 = vmul.f32 %v4369_v35, %v4301_v10  ;;  %v1097_v15 = vstv %s3947_s29  ;;  %s4735_s29 = sld [smem:[#allocation3 + $0x36]] }
  0xc9   : > { %v1099_v16 = vmul.f32 %v1097_v15, %v4437_v1  ;;  %v1100_v25 = vmul.f32 %v1097_v15, %v4397_v48  ;;  %v1103_v26 = vmul.f32 %v1097_v15, %v4399_v49  ;;  %v1098_v31 = vmul.f32 %v1097_v15, %v4408_v54 }
  0xca   : > { %v1101_v32 = vmul.f32 %v1097_v15, %v4410_v55 }
  0xcb   : > { %v1116_v35 = vrot.slane %v1100_v25, 1  ;;  %v898_v25 = vstv %s3931_s13  ;;  %s4792_s13 = sld [smem:[#allocation3 + $0x53]] }
  0xcc   : > { %471 = vrot.lane.b32.xlu0 %v463_v17, %s4197_s15  ;;  %645 = vrot.lane.b32.xlu1 %v639_v18, %s4198_s17  ;;  %v1102_v17 = vmul.f32 %v1097_v15, %v4439_v2  ;;  %v1403_v18 = vstv %s3965_s30  ;;  %v1111_v41 = vrot.slane %v1101_v32, 1  ;;  %v1150_v15 = vsel %vm1038_vm7, %v1148_v3, %v1149_v4  ;;  %s4752_s30 = sld [smem:[#allocation3 + $0x38]] }
  0xcd   : > { %v1409_v22 = vmul.f32 %v1403_v18, %v4399_v49 }
  0xd0   : > { %467 = vrot.lane.b32.xlu0 %v461_v20, %s4197_s15  ;;  %451 = vrot.lane.b32.xlu1 %v443_v21, %s4197_s15  ;;  %v1406_v21 = vmul.f32 %v1403_v18, %v4397_v48 }
  0xd4   : > { %491 = vrot.lane.b32.xlu0 %v483_v23, %s4197_s15  ;;  %447 = vrot.lane.b32.xlu1 %v441_v24, %s4197_s15  ;;  %v1113_v23 = vrot.slane %v1099_v16, 1  ;;  %v1114_v24 = vrot.slane %v1102_v17, 1 }
  0xd8   : > { %690 = vrot.lane.b32.xlu0 %v682_v27, %s4198_s17  ;;  %868 = vrot.lane.b32.xlu1 %v860_v28, %s4199_s24 }
  0xdc   : > { %686 = vrot.lane.b32.xlu0 %v680_v29, %s4198_s17  ;;  %864 = vrot.lane.b32.xlu1 %v858_v30, %s4199_s24  ;;  %v522_v29 = vmul.f32 %v4382_v40, %v4301_v10  ;;  %v1422_v30 = vrot.slane %v1406_v21, 1 }
  0xe0   : > { %710 = vrot.lane.b32.xlu0 %v702_v33, %s4198_s17  ;;  %670 = vrot.lane.b32.xlu1 %v662_v34, %s4198_s17  ;;  %v1115_v33 = vsel %vm1038_vm7, %v1113_v23, %v1114_v24  ;;  %v1423_v34 = vrot.slane %v1409_v22, 1  ;;  %v1135_v23 = vmul.f32 %v1132_v52, %v4397_v48  ;;  %v1138_v24 = vmul.f32 %v1132_v52, %v4399_v49 }
  0xe2   : > { %v1152_v32 = vrot.slane %v1138_v24, 1 }
  0xe4   : > { %511 = vrot.lane.b32.xlu0 %v503_v36, %s4197_s15  ;;  %666 = vrot.lane.b32.xlu1 %v660_v37, %s4198_s17  ;;  %v1117_v36 = vrot.slane %v1103_v26, 1 }
  0xe8   : > { %507 = vrot.lane.b32.xlu0 %v501_v38, %s4197_s15  ;;  %487 = vrot.lane.b32.xlu1 %v481_v39, %s4197_s15  ;;  %v1110_v39 = vrot.slane %v1098_v31, 1  ;;  %v1151_v31 = vrot.slane %v1135_v23, 1 }
  0xec   : > { %531 = vrot.lane.b32.xlu0 %v523_v42, %s4197_s15  ;;  %889 = vrot.lane.b32.xlu1 %v881_v43, %s4199_s24  ;;  %v1424_v42 = vsel %vm1038_vm7, %v1422_v30, %v1423_v34  ;;  %v1118_v43 = vsel %vm1038_vm7, %v1116_v35, %v1117_v36  ;;  %v901_v30 = vmul.f32 %v898_v25, %v4279_v9 }
  0xed   : > { %v899_v35 = vmul.f32 %v898_v25, %v4275_v8  ;;  %v1153_v36 = vsel %vm1038_vm7, %v1151_v31, %v1152_v32 }
  0xf0   : > { %885 = vrot.lane.b32.xlu1 %v879_v44, %s4199_s24  ;;  %647 = vrot.lane.b32.xlu0 %v640_v45, %s4198_s17  ;;  %v1405_v44 = vmul.f32 %v1403_v18, %v4437_v1  ;;  %v1408_v45 = vmul.f32 %v1403_v18, %v4439_v2 }
  0xf2   : > { %v1419_v53 = vrot.slane %v1405_v44, 1 }
  0xf4   : > { %706 = vrot.lane.b32.xlu1 %v700_v46, %s4198_s17  ;;  %449 = vrot.lane.b32.xlu0 %v442_v47, %s4197_s15 }
  0xf8   : > { %866 = vrot.lane.b32.xlu0 %v859_v50, %s4199_s24  ;;  %428 = vrot.lane.b32.xlu1 %v421_v51, %s4197_s15  ;;  %v521_v50 = vmul.f32 %v4382_v40, %v4275_v8  ;;  %v1112_v51 = vsel %vm1038_vm7, %v1110_v39, %v1111_v41  ;;  %v1133_v39 = vmul.f32 %v1132_v52, %v4408_v54 }
  0xf9   : > { %v1136_v41 = vmul.f32 %v1132_v52, %v4410_v55  ;;  %v719_v52 = vstv %s3915_s16  ;;  %s4865_s16 = sld [smem:[#allocation3 + $0x8e]] }
  0xfa   : > { %v722_v59 = vmul.f32 %v719_v52, %v4279_v9 }
  0xfc   : > { %668 = vrot.lane.b32.xlu0 %v661_v56, %s4198_s17  ;;  %1052 = vrot.lane.b32.xlu1 %v4416_v57, %s4191_s6  ;;  %v1420_v56 = vrot.slane %v1408_v45, 1 }
  0xfe   : > { %v1421_v40 = vsel %vm1038_vm7, %v1419_v53, %v1420_v56  ;;  %v1146_v53 = vrot.slane %v1136_v41, 1 }
 0x100   : > { %1048 = vrot.lane.b32.xlu0 %v4426_v61, %s4191_s6  ;;  %469 = vrot.lane.b32.xlu1 %v462_v60, %s4197_s15 }
 0x104   : > { %1306 = vrot.lane.b32.xlu0 %v4426_v61, %s4192_s7  ;;  %489 = vrot.lane.b32.xlu1 %v482_v62, %s4197_s15 }
 0x108   : > { %887 = vrot.lane.b32.xlu0 %v880_v63, %s4199_s24  ;;  %1310 = vrot.lane.b32.xlu1 %v4416_v57, %s4192_s7  ;;  %v1404_v63 = vmul.f32 %v1403_v18, %v4408_v54 }
 0x10a   : > { %v1416_v16 = vrot.slane %v1404_v63, 1 }
 0x10c   : > { %1354 = vrot.lane.b32.xlu0 %v4426_v61, %s4193_s8  ;;  %1358 = vrot.lane.b32.xlu1 %v4416_v57, %s4193_s8 }
 0x110   : > { %1050 = vrot.lane.b32.xlu0 %v4453_v6, %s4191_s6  ;;  %688 = vrot.lane.b32.xlu1 %v681_v5, %s4198_s17  ;;  %v1407_v5 = vmul.f32 %v1403_v18, %v4410_v55 }
 0x112   : > { %v4458_v7 = vpop.permute.xlu0 %369  ;;  %v1417_v17 = vrot.slane %v1407_v5, 1 }
 0x114   : > { %1308 = vrot.lane.b32.xlu0 %v4453_v6, %s4192_s7  ;;  %708 = vrot.lane.b32.xlu1 %v701_v11, %s4198_s17  ;;  %v1418_v22 = vsel %vm1038_vm7, %v1416_v16, %v1417_v17  ;;  %v720_v16 = vmul.f32 %v719_v52, %v4275_v8  ;;  %v721_v17 = vmul.f32 %v719_v52, %v4301_v10  ;;  %v4622_v52 = vstv %s3966_s21  ;;  %s4905_s21 = sld [smem:[#allocation3 + $0x56]] }
 0x116   : > { %v4465_v12 = vpop.permute.xlu1 %373  ;;  %v4467_v13 = vpop.permute.xlu0 %543 }
 0x118   : > { %1356 = vrot.lane.b32.xlu0 %v4453_v6, %s4193_s8  ;;  %509 = vrot.lane.b32.xlu1 %v502_v14, %s4197_s15 }
 0x11a   : > { %v4476_v19 = vpop.permute.xlu1 %539  ;;  %v4478_v20 = vpop.permute.xlu0 %592 }
 0x11c   : > { %1614 = vrot.lane.b32.xlu0 %v4453_v6, %s4194_s9  ;;  %1616 = vrot.lane.b32.xlu1 %v4416_v57, %s4194_s9 }
 0x11e   : > { %v4488_v27 = vpop.permute.xlu1 %588  ;;  %v4490_v28 = vpop.permute.xlu0 %758 }
 0x120   : > { %1121 = vrot.lane.b32.xlu0 %v1115_v33, %s4197_s15  ;;  %529 = vrot.lane.b32.xlu1 %v522_v29, %s4197_s15 }
 0x122   : > { %v4499_v37 = vpop.permute.xlu1 %762  ;;  %v4501_v38 = vpop.permute.xlu0 %807 }
 0x123   : > { %7555 = vst [vmem:[#allocation7_spill] sm:$0xff] %v4501_v38 }
 0x124   : > { %1429 = vrot.lane.b32.xlu0 %v1424_v42, %s4198_s17  ;;  %1123 = vrot.lane.b32.xlu1 %v1118_v43, %s4197_s15  ;;  %v918_v42 = vstv %s3932_s14  ;;  %s4794_s14 = sld [smem:[#allocation3 + $0x54]] }
 0x125   : > { %v921_v45 = vmul.f32 %v918_v42, %v4279_v9  ;;  %v920_v4 = vmul.f32 %v918_v42, %v4301_v10  ;;  %v919_v32 = vmul.f32 %v918_v42, %v4275_v8 }
 0x126   : > { %v4509_v46 = vpop.permute.xlu1 %811  ;;  %v4511_v47 = vpop.permute.xlu0 %977 }
 0x127   : > { %7556 = vst [vmem:[#allocation8_spill] sm:$0xff] %v4509_v46  ;;  %7557 = vst [vmem:[#allocation9_spill] sm:$0xff] %v4511_v47 }
 0x128   : > { %527 = vrot.lane.b32.xlu0 %v521_v50, %s4197_s15  ;;  %1119 = vrot.lane.b32.xlu1 %v1112_v51, %s4197_s15  ;;  %v900_v50 = vmul.f32 %v898_v25, %v4301_v10  ;;  %v1145_v51 = vrot.slane %v1133_v39, 1 }
 0x12a   : > { %v4520_v60 = vpop.permute.xlu1 %981  ;;  %v4522_v62 = vpop.permute.xlu0 %760  ;;  %v1147_v63 = vsel %vm1038_vm7, %v1145_v51, %v1146_v53 }
 0x12b   : > { %7558 = vst [vmem:[#allocation10_spill] sm:$0xff] %v4520_v60 }
 0x12c   : > { %1662 = vrot.lane.b32.xlu0 %v4453_v6, %s4195_s10  ;;  %1427 = vrot.lane.b32.xlu1 %v1421_v40, %s4198_s17 }
 0x12e   : > { %v4530_v11 = vpop.permute.xlu1 %371  ;;  %v4532_v14 = vpop.permute.xlu0 %809 }
 0x12f   : > { %7559 = vst [vmem:[#allocation11_spill] sm:$0xff] %v4532_v14 }
 0x130   : > { %1156 = vrot.lane.b32.xlu0 %v1150_v15, %s4197_s15  ;;  %1612 = vrot.lane.b32.xlu1 %v4426_v61, %s4194_s9 }
 0x132   : > { %v4538_v18 = vpop.permute.xlu1 %541  ;;  %v4540_v21 = vpop.permute.xlu0 %979 }
 0x133   : > { %7560 = vst [vmem:[#allocation12_spill] sm:$0xff] %v4540_v21 }
 0x134   : > { %1660 = vrot.lane.b32.xlu0 %v4426_v61, %s4195_s10  ;;  %1425 = vrot.lane.b32.xlu1 %v1418_v22, %s4198_s17  ;;  %v1709_v22 = vstv %s3983_s19  ;;  %s4882_s19 = sld [smem:[#allocation3 + $0x43]] }
 0x135   : > { %v1712_v23 = vmul.f32 %v1709_v22, %v4397_v48  ;;  %v1715_v24 = vmul.f32 %v1709_v22, %v4399_v49  ;;  %v1711_v53 = vmul.f32 %v1709_v22, %v4437_v1  ;;  %v1714_v42 = vmul.f32 %v1709_v22, %v4439_v2 }
 0x136   : > { %v4548_v26 = vpop.permute.xlu1 %590  ;;  %v4550_v29 = vpop.permute.xlu0 %430 }
 0x137   : > { %7561 = vst [vmem:[#allocation13_spill] sm:$0xff] %v4550_v29 }
 0x138   : > { %909 = vrot.lane.b32.xlu0 %v901_v30, %s4199_s24  ;;  %1664 = vrot.lane.b32.xlu1 %v4416_v57, %s4195_s10 }
 0x13a   : > { %v4556_v33 = vpop.permute.xlu1 %649  ;;  %v4558_v34 = vpop.permute.xlu0 %426 }
 0x13b   : > { %7562 = vst [vmem:[#allocation14_spill] sm:$0xff] %v4556_v33  ;;  %7563 = vst [vmem:[#allocation15_spill] sm:$0xff] %v4558_v34  ;;  %v4699_v34 = vstv %s4648_s23  ;;  %s4931_s23 = sld [smem:[#allocation3 + $0x3c]] }
 0x13c   : > { %905 = vrot.lane.b32.xlu0 %v899_v35, %s4199_s24  ;;  %1158 = vrot.lane.b32.xlu1 %v1153_v36, %s4197_s15  ;;  %v1728_v35 = vrot.slane %v1712_v23, 1  ;;  %v1729_v36 = vrot.slane %v1715_v24, 1  ;;  %v1725_v24 = vrot.slane %v1711_v53, 1  ;;  %v1710_v53 = vmul.f32 %v1709_v22, %v4408_v54 }
 0x13e   : > { %v4566_v43 = vpop.permute.xlu1 %645  ;;  %v4568_v44 = vpop.permute.xlu0 %471  ;;  %v1730_v51 = vsel %vm1038_vm7, %v1728_v35, %v1729_v36  ;;  %v1713_v35 = vmul.f32 %v1709_v22, %v4410_v55  ;;  %v4671_v22 = vld [vmem:[#allocation2 + $0x28] sm:$0x3] }
 0x13f   : > { %7564 = vst [vmem:[#allocation16_spill] sm:$0xff] %v4566_v43  ;;  %v1986_v43 = vrot.slane %v4671_v22, 2 }
 0x140   : > { %929 = vrot.lane.b32.xlu0 %v921_v45, %s4199_s24  ;;  %907 = vrot.lane.b32.xlu1 %v900_v50, %s4199_s24  ;;  %v4612_v45 = vld [vmem:[#allocation2 + $0x8] sm:$0xfc]  ;;  %v4614_v50 = vld [vmem:[#allocation2 + $0x20] sm:$0x3] }
 0x141   : > { %v1983_v23 = vrot.slane %v4614_v50, 2 }
 0x142   : > { %v4574_v56 = vpop.permute.xlu1 %451  ;;  %v4576_v58 = vpop.permute.xlu0 %467 }
 0x143   : > { %7565 = vst [vmem:[#allocation17_spill] sm:$0xff] %v4574_v56 }
 0x144   : > { %730 = vrot.lane.b32.xlu0 %v722_v59, %s4198_s17  ;;  %1154 = vrot.lane.b32.xlu1 %v1147_v63, %s4197_s15 }
 0x146   : > { %v4582_v40 = vpop.permute.xlu1 %447  ;;  %v4584_v3 = vpop.permute.xlu0 %491 }
 0x147   : > { %7566 = vst [vmem:[#allocation18_spill] sm:$0xff] %v4582_v40 }
 0x148   : > { %1920 = vrot.lane.b32.xlu0 %v4453_v6, %s4196_s11  ;;  %927 = vrot.lane.b32.xlu1 %v920_v4, %s4199_s24  ;;  %v739_v6 = vstv %s3916_s20  ;;  %s4889_s20 = sld [smem:[#allocation3 + $0x3b]] }
 0x149   : > { %v742_v31 = vmul.f32 %v739_v6, %v4279_v9  ;;  %v740_v4 = vmul.f32 %v739_v6, %v4275_v8 }
 0x14a   : > { %v4590_v5 = vpop.permute.xlu1 %868  ;;  %v4592_v15 = vpop.permute.xlu0 %690 }
 0x14b   : > { %7567 = vst [vmem:[#allocation19_spill] sm:$0xff] %v4590_v5 }
 0x14c   : > { %726 = vrot.lane.b32.xlu0 %v720_v16, %s4198_s17  ;;  %728 = vrot.lane.b32.xlu1 %v721_v17, %s4198_s17  ;;  %v741_v16 = vmul.f32 %v739_v6, %v4301_v10  ;;  %v1982_v17 = vrot.slane %v4612_v45, 2 }
 0x14e   : > { %v4600_v25 = vpop.permute.xlu1 %864  ;;  %v4602_v30 = vpop.permute.xlu0 %686 }
 0x14f   : > { %7568 = vst [vmem:[#allocation20_spill] sm:$0xff] %v4600_v25  ;;  %v1722_v25 = vrot.slane %v1710_v53, 1 }
 0x150   : > { %750 = vrot.lane.b32.xlu0 %v742_v31, %s4198_s17  ;;  %925 = vrot.lane.b32.xlu1 %v919_v32, %s4199_s24  ;;  %v1726_v31 = vrot.slane %v1714_v42, 1  ;;  %v1443_v32 = vmul.f32 %v4622_v52, %v4439_v2  ;;  %v4652_v42 = vld [vmem:[#allocation2] sm:$0xfc] }
 0x152   : > { %v4608_v39 = vpop.permute.xlu1 %670  ;;  %v4610_v41 = vpop.permute.xlu0 %710  ;;  %v1455_v0 = vrot.slane %v1443_v32, 1 }
 0x153   : > { %7569 = vst [vmem:[#allocation21_spill] sm:$0xff] %v4608_v39  ;;  %7570 = vst [vmem:[#allocation22_spill] sm:$0xff] %v4610_v41  ;;  %v4658_v39 = vld [vmem:[#allocation2 + $0x18] sm:$0x3] }
 0x154   : > { %1735 = vrot.lane.b32.xlu0 %v1730_v51, %s4199_s24  ;;  %1922 = vrot.lane.b32.xlu1 %v4416_v57, %s4196_s11  ;;  %v1440_v57 = vmul.f32 %v4622_v52, %v4437_v1  ;;  %v4645_v51 = vsel %vm1978_vm8, %v1982_v17, %v1983_v23  ;;  %v7574_v17 = vlaneseq  ;;  %v1980_v40 = vrot.slane %v4658_v39, 2 }
 0x156   : > { %v4626_v59 = vpop.permute.xlu1 %666  ;;  %v4628_v63 = vpop.permute.xlu0 %511  ;;  %v4661_v23 = vand.u32 127, %v7574_v17  ;;  %v1979_v17 = vrot.slane %v4652_v42, 2 }
 0x157   : > { %7571 = vst [vmem:[#allocation23_spill] sm:$0xff] %v4626_v59  ;;  %7572 = vst [vmem:[#allocation24_spill] sm:$0xff] %v4628_v63  ;;  %v1167_v59 = vstv %s4624_s22  ;;  %s4929_s22 = sld [smem:[#allocation3 + $0x6c]] }
 0x158   : > { %746 = vrot.lane.b32.xlu0 %v740_v4, %s4198_s17  ;;  %748 = vrot.lane.b32.xlu1 %v741_v16, %s4198_s17  ;;  %v1727_v4 = vsel %vm1038_vm7, %v1725_v24, %v1726_v31  ;;  %v1454_v16 = vrot.slane %v1440_v57, 1  ;;  %7575 = vst [vmem:[#allocation26_spill] sm:$0xff] %v4661_v23  ;;  %v4200_v24 = vmov 0   ;;  %v4669_v31 = vld [vmem:[#allocation2 + $0x10] sm:$0xfc]  ;;  %v1170_v5 = vmul.f32 %v1167_v59, %v4397_v48 }
 0x159   : > { %4145 = vset.pattern.permute.xlu1 %v4200_v24  ;;  %4146 = vset.pattern.permute.xlu0 %v4200_v24  ;;  %v1723_v24 = vrot.slane %v1713_v35, 1  ;;  %v4683_v33 = vadd.s32 128, %v4661_v23  ;;  %v1444_v35 = vmul.f32 %v4622_v52, %v4399_v49  ;;  %v4706_v47 = vsel %vm1978_vm8, %v1979_v17, %v1980_v40 }
 0x15a   : > { %v4640_v36 = vpop.permute.xlu1 %487  ;;  %v4642_v6 = vpop.permute.xlu0 %507  ;;  %v1456_v56 = vsel %vm1038_vm7, %v1454_v16, %v1455_v0  ;;  %v1441_v0 = vmul.f32 %v4622_v52, %v4397_v48  ;;  %7581 = vst [vmem:[#allocation32_spill] sm:$0xff] %v4706_v47  ;;  %v1168_v21 = vmul.f32 %v1167_v59, %v4408_v54  ;;  %v339_v63 = vand.u32 15, %v4661_v23 }
 0x15b   : > { %7573 = vst [vmem:[#allocation25_spill] sm:$0xff] %v4642_v6  ;;  %7578 = vst [vmem:[#allocation29_spill] sm:$0xff] %v4683_v33  ;;  %v1724_v60 = vsel %vm1038_vm7, %v1722_v25, %v1723_v24  ;;  %v1458_v17 = vrot.slane %v1444_v35, 1  ;;  %v1169_v24 = vmul.f32 %v1167_v59, %v4437_v1  ;;  %v1208_v6 = vmul.f32 %v4699_v34, %v4399_v49 }
 0x15c   : > { %1990 = vrot.lane.b32.xlu0 %v4645_v51, %s4191_s6  ;;  %1733 = vrot.lane.b32.xlu1 %v1727_v4, %s4199_s24  ;;  %v1173_v4 = vmul.f32 %v1167_v59, %v4399_v49  ;;  %v1457_v25 = vrot.slane %v1441_v0, 1  ;;  %v1439_v0 = vmul.f32 %v4622_v52, %v4408_v54  ;;  %v1442_v35 = vmul.f32 %v4622_v52, %v4410_v55 }
 0x15d   : > { %vm4741_vm9 = vcmp.le.s32.totalorder %v339_v63, 14  ;;  %vm4745_vm10 = vcmp.ge.s32.totalorder %v339_v63, 1  ;;  %v7594_v52 = vmov 0  ;;  %v1204_v63 = vmul.f32 %v4699_v34, %v4437_v1 }
 0x15e   : > { %v4673_v57 = vpop.permute.xlu1 %889  ;;  %v4675_v32 = vpop.permute.xlu0 %531  ;;  %v1187_v29 = vrot.slane %v1173_v4, 1  ;;  %v4719_v4 = vstv %s4666_s28  ;;  %v1222_v49 = vrot.slane %v1208_v6, 1  ;;  %v1451_v38 = vrot.slane %v1439_v0, 1  ;;  %s4961_s28 = sld [smem:[#allocation3 + $0x6f]] }
 0x15f   : > { %7576 = vst [vmem:[#allocation27_spill] sm:$0xff] %v4673_v57  ;;  %7577 = vst [vmem:[#allocation28_spill] sm:$0xff] %v4675_v32  ;;  %v1985_v57 = vrot.slane %v4669_v31, 2  ;;  %v1171_v32 = vmul.f32 %v1167_v59, %v4410_v55  ;;  %v1452_v14 = vrot.slane %v1442_v35, 1 }
 0x160   : > { %1462 = vrot.lane.b32.xlu0 %v1456_v56, %s4198_s17  ;;  %1918 = vrot.lane.b32.xlu1 %v4426_v61, %s4196_s11  ;;  %v1186_v56 = vrot.slane %v1170_v5, 1  ;;  %v4702_v61 = vstv %s4650_s25  ;;  %v4716_v5 = vstv %s4656_s27  ;;  %s4942_s25 = sld [smem:[#allocation3 + $0x6e]]  ;;  %s4959_s27 = sld [smem:[#allocation3 + $0x57]] }
 0x161   : > { %v4722_v40 = vsel %vm1978_vm8, %v1985_v57, %v1986_v43  ;;  %v1180_v43 = vrot.slane %v1168_v21, 1  ;;  %v1181_v57 = vrot.slane %v1171_v32, 1  ;;  %v7591_v21 = vmov 0 }
 0x162   : > { %v4694_v53 = vpop.permute.xlu1 %885  ;;  %v4696_v16 = vpop.permute.xlu0 %647  ;;  %7582 = vst [vmem:[#allocation33_spill] sm:$0xff] %v4722_v40  ;;  %v1207_v32 = vmul.f32 %v4699_v34, %v4439_v2 }
 0x163   : > { %7579 = vst [vmem:[#allocation30_spill] sm:$0xff] %v4694_v53  ;;  %7580 = vst [vmem:[#allocation31_spill] sm:$0xff] %v4696_v16  ;;  %v346_v53 = vand.u32 15, %v4683_v33  ;;  %v1172_v33 = vmul.f32 %v1167_v59, %v4439_v2  ;;  %v7588_v59 = vmov 0  ;;  %v1182_v46 = vsel %vm1038_vm7, %v1180_v43, %v1181_v57 }
 0x164   : > { %1731 = vrot.lane.b32.xlu1 %v1724_v60, %s4199_s24  ;;  %1988 = vrot.lane.b32.xlu0 %v4706_v47, %s4191_s6  ;;  %v1188_v60 = vsel %vm1038_vm7, %v1186_v56, %v1187_v29  ;;  %v1205_v47 = vmul.f32 %v4699_v34, %v4397_v48  ;;  %v7585_v29 = vmov 0  ;;  %v7589_v59 = vsel %vm4745_vm10, 4294967295, %v7588_v59 }
 0x165   : > { %v7586_v29 = vsel %vm4741_vm9, 4294967295, %v7585_v29  ;;  %7590 = vst [vmem:[#allocation37_spill] sm:$0xff] %v7589_v59  ;;  %vm4754_vm13 = vcmp.le.s32.totalorder %v346_v53, 14  ;;  %vm4758_vm14 = vcmp.ge.s32.totalorder %v346_v53, 1  ;;  %v1184_v41 = vrot.slane %v1172_v33, 1 }
 0x166   : > { %v4725_v16 = vpop.permute.xlu1 %706  ;;  %v4727_v23 = vpop.permute.xlu0 %449  ;;  %7587 = vst [vmem:[#allocation36_spill] sm:$0xff] %v7586_v29  ;;  %v7592_v21 = vsel %vm4754_vm13, 4294967295, %v7591_v21  ;;  %v7595_v52 = vsel %vm4758_vm14, 4294967295, %v7594_v52  ;;  %v1459_v53 = vsel %vm1038_vm7, %v1457_v25, %v1458_v17  ;;  %v546_v33 = vsel %vm545_vm12, %v4476_v19, %v4538_v18 }
 0x167   : > { %7583 = vst [vmem:[#allocation34_spill] sm:$0xff] %v4725_v16  ;;  %7584 = vst [vmem:[#allocation35_spill] sm:$0xff] %v4727_v23  ;;  %v1183_v23 = vrot.slane %v1169_v24, 1  ;;  %v1221_v16 = vrot.slane %v1205_v47, 1  ;;  %v941_v47 = vmul.f32 %v4702_v61, %v4279_v9  ;;  %v4804_v17 = vmul.f32 %v4702_v61, %v4301_v10 }
 0x168   : > { %1992 = vrot.lane.b32.xlu1 %v4722_v40, %s4191_s6  ;;  %1193 = vrot.lane.b32.xlu0 %v1188_v60, %s4197_s15  ;;  %7593 = vst [vmem:[#allocation38_spill] sm:$0xff] %v7592_v21  ;;  %7596 = vst [vmem:[#allocation39_spill] sm:$0xff] %v7595_v52  ;;  %s4772_s6 = sld [smem:[#allocation3 + $0x39]]  ;;  %v376_v40 = vsel %vm375_vm11, %v4458_v7, %v4530_v11  ;;  %v547_v7 = vsel %vm545_vm12, %v4538_v18, %v4467_v13  ;;  %v401_v57 = vstv %s4762_s12  ;;  %s5037_s12 = sld [smem:[#allocation3 + $0x5e]] }
 0x169   : > { %v1185_v25 = vsel %vm1038_vm7, %v1183_v23, %v1184_v41  ;;  %v1223_v19 = vsel %vm1038_vm7, %v1221_v16, %v1222_v49  ;;  %v4808_v13 = vmul.f32 %v4699_v34, %v4408_v54  ;;  %v4812_v18 = vsel %vm4745_vm10, %v376_v40, 0.0 }
 0x16a   : > { %v4768_v56 = vpop.permute.xlu1 %428  ;;  %v4770_v60 = vpop.permute.xlu0 %866  ;;  %7600 = vst [vmem:[#allocation43_spill] sm:$0xff] %v4812_v18  ;;  %v395_v41 = vstv %s4735_s29  ;;  %v1453_v23 = vsel %vm1038_vm7, %v1451_v38, %v1452_v14  ;;  %v4822_v49 = vsel %vm4741_vm9, %v546_v33, 0.0  ;;  %v4826_v16 = vsel %vm4754_vm13, %v547_v7, 0.0  ;;  %s5009_s29 = sld [smem:[#allocation3 + $0x87]] }
 0x16b   : > { %7597 = vst [vmem:[#allocation40_spill] sm:$0xff] %v4768_v56  ;;  %7598 = vst [vmem:[#allocation41_spill] sm:$0xff] %v4770_v60  ;;  %v377_v60 = vsel %vm375_vm11, %v4530_v11, %v4465_v12  ;;  %v1218_v12 = vrot.slane %v1204_v63, 1  ;;  %v1219_v11 = vrot.slane %v1207_v32, 1  ;;  %v565_v40 = vstv %s4752_s30  ;;  %s5024_s30 = sld [smem:[#allocation3 + $0x89]] }
 0x16c   : > { %1464 = vrot.lane.b32.xlu1 %v1459_v53, %s4198_s17  ;;  %1189 = vrot.lane.b32.xlu0 %v1182_v46, %s4197_s15  ;;  %v4816_v24 = vsel %vm4758_vm14, %v377_v60, 0.0  ;;  %7602 = vst [vmem:[#allocation45_spill] sm:$0xff] %v4822_v49  ;;  %7603 = vst [vmem:[#allocation46_spill] sm:$0xff] %v4826_v16  ;;  %v4832_v43 = vmul.f32 %v4699_v34, %v4410_v55  ;;  %v595_v38 = vsel %vm594_vm15, %v4488_v27, %v4548_v26 }
 0x16d   : > { %7601 = vst [vmem:[#allocation44_spill] sm:$0xff] %v4816_v24  ;;  %v596_v14 = vsel %vm594_vm15, %v4548_v26, %v4478_v20  ;;  %v1220_v0 = vsel %vm1038_vm7, %v1218_v12, %v1219_v11  ;;  %v397_v35 = vmul.f32 %v395_v41, %v4816_v24  ;;  %v396_v34 = vmul.f32 %v395_v41, %v4812_v18 }
 0x16e   : > { %v4796_v46 = vpop.permute.xlu1 %1052  ;;  %v4798_v6 = vpop.permute.xlu0 %668  ;;  %v614_v60 = vstv %s4772_s6  ;;  %v566_v27 = vmul.f32 %v565_v40, %v4822_v49  ;;  %v567_v53 = vmul.f32 %v565_v40, %v4826_v16  ;;  %v4856_v33 = vsel %vm4745_vm10, %v595_v38, 0.0  ;;  %s5041_s6 = sld [smem:[#allocation3 + $0x8a]] }
 0x16f   : > { %7599 = vst [vmem:[#allocation42_spill] sm:$0xff] %v4798_v6  ;;  %7604 = vst [vmem:[#allocation47_spill] sm:$0xff] %v4856_v33  ;;  %v4860_v7 = vsel %vm4758_vm14, %v596_v14, 0.0  ;;  %v403_v38 = vmul.f32 %v401_v57, %v4816_v24  ;;  %v407_v6 = vstv %s4929_s22  ;;  %s5178_s22 = sld [smem:[#allocation3 + $0x19]] }
 0x170   : > { %1191 = vrot.lane.b32.xlu1 %v1185_v25, %s4197_s15  ;;  %1228 = vrot.lane.b32.xlu0 %v1223_v19, %s4197_s15  ;;  %7605 = vst [vmem:[#allocation48_spill] sm:$0xff] %v4860_v7  ;;  %v2043_v25 = vmul.f32 %v4716_v5, %v4671_v22  ;;  %v620_v19 = vstv %s4794_s14  ;;  %s5145_s14 = sld [smem:[#allocation3 + $0x2e]] }
 0x172   : > { %v470_v63 = vpop.permute.xlu1 %469  ;;  %v4845_v32 = vpop.permute.xlu0 %1048 }
 0x173   : > { %v473_v20 = vsel %vm432_vm0, %v4576_v58, %v470_v63  ;;  %v474_v26 = vsel %vm432_vm0, %v470_v63, %v4568_v44  ;;  %v571_v58 = vstv %s4792_s13  ;;  %v2040_v44 = vmul.f32 %v4716_v5, %v4669_v31  ;;  %s5138_s13 = sld [smem:[#allocation3 + $0x16]] }
 0x174   : > { %v477_v12 = vadd.f32 %v473_v20, %v396_v34  ;;  %v478_v11 = vadd.f32 %v474_v26, %v397_v35  ;;  %1460 = vrot.lane.b32.xlu1 %v1453_v23, %s4198_s17  ;;  %949 = vrot.lane.b32.xlu0 %v941_v47, %s4199_s24  ;;  %v402_v35 = vmul.f32 %v401_v57, %v4812_v18 }
 0x175   : > { %v615_v34 = vmul.f32 %v614_v60, %v4856_v33  ;;  %v616_v20 = vmul.f32 %v614_v60, %v4860_v7  ;;  %v573_v57 = vmul.f32 %v571_v58, %v4826_v16  ;;  %v2039_v60 = vmul.f32 %v4716_v5, %v4612_v45 }
 0x176   : > { %v568_v41 = vadd.f32 %v566_v27, %v477_v12  ;;  %v569_v40 = vadd.f32 %v567_v53, %v478_v11  ;;  %v490_v14 = vpop.permute.xlu1 %489  ;;  %v4874_v23 = vpop.permute.xlu0 %1306  ;;  %v572_v27 = vmul.f32 %v571_v58, %v4822_v49  ;;  %v2042_v12 = vmul.f32 %v4716_v5, %v4614_v50 }
 0x177   : > { %7606 = vst [vmem:[#allocation49_spill] sm:$0xff] %v4874_v23  ;;  %v493_v47 = vsel %vm432_vm0, %v4640_v36, %v490_v14  ;;  %v494_v63 = vsel %vm432_vm0, %v490_v14, %v4584_v3 }
 0x178   : > { %v497_v26 = vadd.f32 %v493_v47, %v402_v35  ;;  %v498_v53 = vadd.f32 %v494_v63, %v403_v38  ;;  %1226 = vrot.lane.b32.xlu1 %v1220_v0, %s4197_s15  ;;  %2248 = vrot.lane.b32.xlu0 %v4645_v51, %s4192_s7  ;;  %v617_v3 = vadd.f32 %v615_v34, %v568_v41  ;;  %v1216_v47 = vrot.slane %v4832_v43, 1 }
 0x179   : > { %v618_v36 = vadd.f32 %v616_v20, %v569_v40  ;;  %v621_v0 = vmul.f32 %v620_v19, %v4856_v33  ;;  %v622_v35 = vmul.f32 %v620_v19, %v4860_v7  ;;  %v939_v41 = vmul.f32 %v4702_v61, %v4275_v8 }
 0x17a   : > { %v574_v11 = vadd.f32 %v572_v27, %v497_v26  ;;  %v575_v14 = vadd.f32 %v573_v57, %v498_v53  ;;  %v4895_v38 = vpop.permute.xlu1 %1310  ;;  %v4897_v58 = vpop.permute.xlu0 %887  ;;  %v1215_v40 = vrot.slane %v4808_v13, 1  ;;  %v2056_v63 = vrot.slane %v2040_v44, 2 }
 0x17b   : > { %7607 = vst [vmem:[#allocation50_spill] sm:$0xff] %v4895_v38  ;;  %7608 = vst [vmem:[#allocation51_spill] sm:$0xff] %v4897_v58  ;;  %v2057_v34 = vrot.slane %v2043_v25, 2  ;;  %v4915_v19 = vmul.f32 %v4719_v4, %v4437_v1  ;;  %v958_v61 = vstv %s4865_s16  ;;  %v765_v13 = vsel %vm764_vm1, %v4490_v28, %v4522_v62  ;;  %s5151_s16 = sld [smem:[#allocation3 + $0x46]] }
 0x17c   : > { %947 = vrot.lane.b32.xlu1 %v4804_v17, %s4199_s24  ;;  %v4909_v20 = vadd.f32 %v621_v0, %v574_v11  ;;  %v4911_v27 = vadd.f32 %v622_v35, %v575_v14  ;;  %945 = vrot.lane.b32.xlu0 %v939_v41, %s4199_s24  ;;  %v766_v17 = vsel %vm764_vm1, %v4522_v62, %v4499_v37  ;;  %v2053_v25 = vrot.slane %v2039_v60, 2 }
 0x17d   : > { %v2054_v26 = vrot.slane %v2042_v12, 2  ;;  %v1217_v53 = vsel %vm1038_vm7, %v1215_v40, %v1216_v47  ;;  %v961_v28 = vmul.f32 %v958_v61, %v4279_v9  ;;  %v4936_v57 = vstv %s4882_s19  ;;  %s5154_s19 = sld [smem:[#allocation3 + $0x61]] }
 0x17e   : > { %v4925_v43 = vpop.permute.xlu1 %1358  ;;  %v4927_v44 = vpop.permute.xlu0 %1354  ;;  %v2058_v37 = vsel %vm1978_vm8, %v2056_v63, %v2057_v34  ;;  %v960_v62 = vmul.f32 %v958_v61, %v4301_v10  ;;  %v959_v11 = vmul.f32 %v958_v61, %v4275_v8  ;;  %v4947_v12 = vsel %vm4741_vm9, %v765_v13, 0.0 }
 0x17f   : > { %7609 = vst [vmem:[#allocation52_spill] sm:$0xff] %v4925_v43  ;;  %7610 = vst [vmem:[#allocation53_spill] sm:$0xff] %v4927_v44  ;;  %v4951_v9 = vsel %vm4754_vm13, %v766_v17, 0.0  ;;  %v784_v14 = vstv %s4889_s20  ;;  %v4957_v10 = vmul.f32 %v4719_v4, %v4439_v2  ;;  %v2055_v35 = vsel %vm1978_vm8, %v2053_v25, %v2054_v26  ;;  %v7613_v26 = vld [vmem:[#allocation33_spill] sm:$0xff]  ;;  %v7619_v43 = vld [vmem:[#allocation34_spill] sm:$0xff]  ;;  %s5156_s20 = sld [smem:[#allocation3 + $0x79]] }
 0x180   : > { %1224 = vrot.lane.b32.xlu1 %v1217_v53, %s4197_s15  ;;  %7611 = vst [vmem:[#allocation54_spill] sm:$0xff] %v4947_v12  ;;  %7612 = vst [vmem:[#allocation55_spill] sm:$0xff] %v4951_v9  ;;  %969 = vrot.lane.b32.xlu0 %v961_v28, %s4199_s24  ;;  %v4968_v41 = vmul.f32 %v4716_v5, %v4652_v42  ;;  %v4972_v40 = vmul.f32 %v4716_v5, %v4658_v39  ;;  %v790_v34 = vstv %s4905_s21  ;;  %v7615_v53 = vld [vmem:[#allocation7_spill] sm:$0xff]  ;;  %v7616_v28 = vld [vmem:[#allocation8_spill] sm:$0xff]  ;;  %s5172_s21 = sld [smem:[#allocation3 + $0x94]] }
 0x181   : > { %v4981_v61 = vmul.f32 %v4936_v57, %v4397_v48  ;;  %v785_v25 = vmul.f32 %v784_v14, %v4947_v12  ;;  %v786_v5 = vmul.f32 %v784_v14, %v4951_v9  ;;  %v792_v44 = vmul.f32 %v790_v34, %v4951_v9 }
 0x182   : > { %v689_v8 = vpop.permute.xlu1 %688  ;;  %v4963_v0 = vpop.permute.xlu0 %1050 }
 0x183   : > { %v692_v47 = vsel %vm651_vm3, %v4602_v30, %v689_v8  ;;  %v693_v63 = vsel %vm651_vm3, %v689_v8, %v4592_v15  ;;  %v7614_v30 = vld [vmem:[#allocation11_spill] sm:$0xff] }
 0x184   : > { %v696_v13 = vadd.f32 %v692_v47, %v617_v3  ;;  %v697_v17 = vadd.f32 %v693_v63, %v618_v36  ;;  %2250 = vrot.lane.b32.xlu1 %v7613_v26, %s4192_s7  ;;  %v814_v15 = vsel %vm813_vm2, %v7615_v53, %v7614_v30  ;;  %v815_v8 = vsel %vm813_vm2, %v7614_v30, %v7616_v28  ;;  %v7617_v36 = vld [vmem:[#allocation6_spill] sm:$0xff] }
 0x185   : > { %2063 = vrot.lane.b32.xlu0 %v2058_v37, %s4197_s15  ;;  %v1761_v3 = vrot.slane %v4957_v10, 1  ;;  %v4997_v47 = vmul.f32 %v4936_v57, %v7617_v36  ;;  %v833_v53 = vstv %s4931_s23  ;;  %v7620_v37 = vld [vmem:[#allocation22_spill] sm:$0xff]  ;;  %v791_v28 = vmul.f32 %v790_v34, %v4947_v12  ;;  %s5180_s23 = sld [smem:[#allocation3 + $0x31]] }
 0x186   : > { %v787_v14 = vadd.f32 %v785_v25, %v696_v13  ;;  %v788_v63 = vadd.f32 %v786_v5, %v697_v17  ;;  %v709_v60 = vpop.permute.xlu1 %708  ;;  %v4999_v58 = vpop.permute.xlu0 %1308  ;;  %v5013_v13 = vsel %vm4745_vm10, %v814_v15, 0.0  ;;  %v5017_v17 = vsel %vm4758_vm14, %v815_v8, 0.0 }
 0x187   : > { %7618 = vst [vmem:[#allocation33_spill] sm:$0xff] %v4999_v58  ;;  %v712_v30 = vsel %vm651_vm3, %v7619_v43, %v709_v60  ;;  %v713_v10 = vsel %vm651_vm3, %v709_v60, %v7620_v37  ;;  %7621 = vst [vmem:[#allocation11_spill] sm:$0xff] %v5013_v13  ;;  %v577_v60 = vstv %s4942_s25  ;;  %v2050_v34 = vrot.slane %v4968_v41, 2  ;;  %s5183_s25 = sld [smem:[#allocation3 + $0x49]] }
 0x188   : > { %7622 = vst [vmem:[#allocation7_spill] sm:$0xff] %v5017_v17  ;;  %v716_v25 = vadd.f32 %v712_v30, %v4909_v20  ;;  %v717_v43 = vadd.f32 %v713_v10, %v4911_v27  ;;  %967 = vrot.lane.b32.xlu1 %v960_v62, %s4199_s24  ;;  %v839_v5 = vstv %s4959_s27  ;;  %v626_v15 = vstv %s4961_s28  ;;  %v7624_v27 = vld [vmem:[#allocation25_spill] sm:$0xff]  ;;  %s5185_s27 = sld [smem:[#allocation3 + $0x64]] }
 0x189   : > { %965 = vrot.lane.b32.xlu0 %v959_v11, %s4199_s24  ;;  %v409_v8 = vmul.f32 %v407_v6, %v4816_v24  ;;  %v408_v20 = vmul.f32 %v407_v6, %v4812_v18  ;;  %v7625_v11 = vld [vmem:[#allocation24_spill] sm:$0xff]  ;;  %v834_v41 = vmul.f32 %v833_v53, %v5013_v13  ;;  %s5203_s28 = sld [smem:[#allocation3 + $0x7c]] }
 0x18a   : > { %v793_v37 = vadd.f32 %v791_v28, %v716_v25  ;;  %v794_v56 = vadd.f32 %v792_v44, %v717_v43  ;;  %v510_v38 = vpop.permute.xlu1 %509  ;;  %v5031_v30 = vpop.permute.xlu0 %1356  ;;  %v835_v28 = vmul.f32 %v833_v53, %v5017_v17  ;;  %v578_v44 = vmul.f32 %v577_v60, %v4822_v49 }
 0x18b   : > { %7623 = vst [vmem:[#allocation8_spill] sm:$0xff] %v5031_v30  ;;  %v513_v62 = vsel %vm432_vm0, %v7624_v27, %v510_v38  ;;  %v514_v10 = vsel %vm432_vm0, %v510_v38, %v7625_v11  ;;  %v579_v43 = vmul.f32 %v577_v60, %v4826_v16  ;;  %v5048_v38 = vadd.f32 %v834_v41, %v787_v14 }
 0x18c   : > { %v517_v6 = vadd.f32 %v513_v62, %v408_v20  ;;  %v518_v25 = vadd.f32 %v514_v10, %v409_v8  ;;  %2061 = vrot.lane.b32.xlu1 %v2055_v35, %s4197_s15  ;;  %v5050_v27 = vadd.f32 %v835_v28, %v788_v63  ;;  %v841_v53 = vmul.f32 %v839_v5, %v5017_v17 }
 0x18d   : > { %2296 = vrot.lane.b32.xlu0 %v4645_v51, %s4193_s8  ;;  %v840_v11 = vmul.f32 %v839_v5, %v5013_v13  ;;  %v628_v35 = vmul.f32 %v626_v15, %v4860_v7  ;;  %v627_v60 = vmul.f32 %v626_v15, %v4856_v33  ;;  %v413_v62 = vstv %s5009_s29  ;;  %v7628_v5 = vld [vmem:[#allocation32_spill] sm:$0xff]  ;;  %s5212_s29 = sld [smem:[#allocation3 + $0x97]] }
 0x18e   : > { %v580_v30 = vadd.f32 %v578_v44, %v517_v6  ;;  %v581_v23 = vadd.f32 %v579_v43, %v518_v25  ;;  %v5054_v20 = vpop.permute.xlu1 %1616  ;;  %v5056_v8 = vpop.permute.xlu0 %1614  ;;  %v2051_v14 = vrot.slane %v4972_v40, 2  ;;  %v5062_v63 = vadd.f32 %v841_v53, %v794_v56 }
 0x18f   : > { %7626 = vst [vmem:[#allocation6_spill] sm:$0xff] %v5054_v20  ;;  %7627 = vst [vmem:[#allocation34_spill] sm:$0xff] %v5056_v8  ;;  %v5064_v10 = vadd.f32 %v840_v11, %v793_v37  ;;  %v7629_v41 = vrot.slane %v4915_v19, 1  ;;  %v1747_v44 = vmul.f32 %v4719_v4, %v4397_v48  ;;  %v583_v56 = vstv %s5024_s30  ;;  %v5132_v20 = vld [vmem:[#allocation2] sm:$0xfe]  ;;  %s5214_s30 = sld [smem:[#allocation3 + $0x34]] }
 0x190   : > { %2246 = vrot.lane.b32.xlu1 %v7628_v5, %s4192_s7  ;;  %v5073_v15 = vadd.f32 %v628_v35, %v581_v23  ;;  %v5075_v6 = vadd.f32 %v627_v60, %v580_v30  ;;  %v1750_v40 = vmul.f32 %v4719_v4, %v7617_v36  ;;  %v1474_v19 = vmul.f32 %v4936_v57, %v4408_v54  ;;  %s5085_s7 = sld [smem:[#allocation3 + $0x76]]  ;;  %v7631_v30 = vld [vmem:[#allocation28_spill] sm:$0xff] }
 0x191   : > { %v1762_v28 = vsel %vm1038_vm7, %v7629_v41, %v1761_v3  ;;  %v1477_v3 = vmul.f32 %v4936_v57, %v4410_v55  ;;  %v415_v48 = vmul.f32 %v413_v62, %v4816_v24  ;;  %v2052_v43 = vsel %vm1978_vm8, %v2050_v34, %v2051_v14 }
 0x192   : > { %1768 = vrot.lane.b32.xlu0 %v1762_v28, %s4199_s24  ;;  %v530_v23 = vpop.permute.xlu1 %529  ;;  %v5088_v37 = vpop.permute.xlu0 %1121  ;;  %v5094_v53 = vstv %s5037_s12  ;;  %v632_v36 = vstv %s5041_s6  ;;  %v585_v54 = vmul.f32 %v583_v56, %v4826_v16  ;;  %v1492_v55 = vrot.slane %v4981_v61, 1  ;;  %s5227_s12 = sld [smem:[#allocation3 + $0x4c]]  ;;  %s5229_s6 = sld [smem:[#allocation3 + $0x67]] }
 0x193   : > { %7630 = vst [vmem:[#allocation22_spill] sm:$0xff] %v5088_v37  ;;  %v534_v25 = vsel %vm432_vm0, %v530_v23, %v7631_v30  ;;  %v1493_v35 = vrot.slane %v4997_v47, 1  ;;  %v1763_v60 = vrot.slane %v1747_v44, 1  ;;  %v1764_v41 = vrot.slane %v1750_v40, 1  ;;  %v5116_v40 = vld [vmem:[#allocation2 + $0x28] sm:$0x1] }
 0x194   : > { %v538_v11 = vadd.f32 %v534_v25, %v415_v48  ;;  %2059 = vrot.lane.b32.xlu1 %v2052_v43, %s4197_s15  ;;  %v1486_v28 = vrot.slane %v1474_v19, 1  ;;  %v1487_v30 = vrot.slane %v1477_v3, 1  ;;  %v1475_v25 = vmul.f32 %v4936_v57, %v4437_v1  ;;  %v5112_v43 = vld [vmem:[#allocation2 + $0x10] sm:$0xfe] }
 0x195   : > { %v1478_v61 = vmul.f32 %v4936_v57, %v4439_v2  ;;  %v634_v47 = vmul.f32 %v632_v36, %v4860_v7  ;;  %v1511_v44 = vmul.f32 %v5112_v43, %v5094_v53  ;;  %v1514_v19 = vmul.f32 %v5116_v40, %v5094_v53 }
 0x196   : > { %2294 = vrot.lane.b32.xlu0 %v7628_v5, %s4193_s8  ;;  %v587_v34 = vadd.f32 %v585_v54, %v538_v11  ;;  %v5103_v14 = vpop.permute.xlu1 %1123  ;;  %v5105_v48 = vpop.permute.xlu0 %1429  ;;  %v1494_v1 = vsel %vm1038_vm7, %v1492_v55, %v1493_v35  ;;  %v1765_v2 = vsel %vm1038_vm7, %v1763_v60, %v1764_v41  ;;  %v1488_v57 = vsel %vm1038_vm7, %v1486_v28, %v1487_v30  ;;  %v5141_v28 = vld [vmem:[#allocation2 + $0x18] sm:$0x1] }
 0x197   : > { %7632 = vst [vmem:[#allocation25_spill] sm:$0xff] %v5103_v14  ;;  %7633 = vst [vmem:[#allocation24_spill] sm:$0xff] %v5105_v48  ;;  %v1237_v11 = vstv %s5085_s7  ;;  %v414_v48 = vmul.f32 %v413_v62, %v4812_v18  ;;  %v1489_v37 = vrot.slane %v1475_v25, 1  ;;  %v1490_v8 = vrot.slane %v1478_v61, 1  ;;  %s5256_s7 = sld [smem:[#allocation3 + $0x3e]] }
 0x198   : > { %2298 = vrot.lane.b32.xlu1 %v7613_v26, %s4193_s8  ;;  %v5123_v3 = vadd.f32 %v634_v47, %v587_v34  ;;  %v1745_v55 = vmul.f32 %v5132_v20, %v4719_v4  ;;  %s5136_s8 = sld [smem:[#allocation3 + $0x91]]  ;;  %v1527_v60 = vrot.slane %v1511_v44, 1  ;;  %v1528_v41 = vrot.slane %v1514_v19, 1  ;;  %v5164_v19 = vld [vmem:[#allocation2 + $0x8] sm:$0xfe] }
 0x199   : > { %v1748_v62 = vmul.f32 %v5141_v28, %v4719_v4  ;;  %v584_v30 = vmul.f32 %v583_v56, %v4822_v49  ;;  %v1240_v25 = vmul.f32 %v5112_v43, %v1237_v11  ;;  %v1243_v61 = vmul.f32 %v5116_v40, %v1237_v11 }
 0x19a   : > { %1499 = vrot.lane.b32.xlu0 %v1494_v1, %s4198_s17  ;;  %v5129_v54 = vpop.permute.xlu1 %1119  ;;  %v528_v14 = vpop.permute.xlu0 %527  ;;  %v1491_v56 = vsel %vm1038_vm7, %v1489_v37, %v1490_v8  ;;  %v1757_v47 = vrot.slane %v1745_v55, 1  ;;  %v1510_v1 = vmul.f32 %v5164_v19, %v5094_v53  ;;  %v1529_v8 = vsel %vm1038_vm7, %v1527_v60, %v1528_v41 }
 0x19b   : > { %7634 = vst [vmem:[#allocation32_spill] sm:$0xff] %v5129_v54  ;;  %v533_v35 = vsel %vm432_vm0, %v528_v14, %v530_v23  ;;  %v1758_v44 = vrot.slane %v1748_v62, 1  ;;  %v1256_v37 = vrot.slane %v1240_v25, 1  ;;  %v1239_v60 = vmul.f32 %v5164_v19, %v1237_v11 }
 0x19c   : > { %v537_v34 = vadd.f32 %v533_v35, %v414_v48  ;;  %1770 = vrot.lane.b32.xlu1 %v1765_v2, %s4199_s24  ;;  %v633_v48 = vmul.f32 %v632_v36, %v4856_v33  ;;  %v5168_v2 = vld [vmem:[#allocation2 + $0x20] sm:$0x1]  ;;  %v1257_v36 = vrot.slane %v1243_v61, 1  ;;  %v1524_v61 = vrot.slane %v1510_v1, 1 }
 0x19d   : > { %v1242_v41 = vmul.f32 %v5168_v2, %v1237_v11  ;;  %v1759_v25 = vsel %vm1038_vm7, %v1757_v47, %v1758_v44  ;;  %v1509_v47 = vmul.f32 %v5132_v20, %v5094_v53  ;;  %v1512_v44 = vmul.f32 %v5141_v28, %v5094_v53 }
 0x19e   : > { %1495 = vrot.lane.b32.xlu0 %v1488_v57, %s4198_s17  ;;  %v586_v4 = vadd.f32 %v584_v30, %v537_v34  ;;  %v5158_v23 = vpop.permute.xlu1 %1427  ;;  %v5160_v14 = vpop.permute.xlu0 %1662  ;;  %v1513_v57 = vmul.f32 %v5168_v2, %v5094_v53  ;;  %v5194_v30 = vstv %s5136_s8  ;;  %v5197_v34 = vstv %s5138_s13  ;;  %s5267_s8 = sld [smem:[#allocation3 + $0x3f]]  ;;  %s5285_s13 = sld [smem:[#allocation3 + $0x5]] }
 0x19f   : > { %7635 = vst [vmem:[#allocation28_spill] sm:$0xff] %v5158_v23  ;;  %7636 = vst [vmem:[#allocation56_spill] sm:$0xff] %v5160_v14  ;;  %v5210_v23 = vstv %s5151_s16  ;;  %v5222_v1 = vstv %s5154_s19  ;;  %v1275_v53 = vmul.f32 %v5112_v43, %v5194_v30  ;;  %v2346_v14 = vmul.f32 %v5197_v34, %v4669_v31  ;;  %s5334_s16 = sld [smem:[#allocation3]]  ;;  %s5338_s19 = sld [smem:[#allocation3 + $0x59]] }
 0x1a0   : > { %1497 = vrot.lane.b32.xlu1 %v1491_v56, %s4198_s17  ;;  %v5176_v55 = vadd.f32 %v633_v48, %v586_v4  ;;  %v1525_v4 = vrot.slane %v1513_v57, 1  ;;  %v5201_v56 = vstv %s5145_s14  ;;  %v1258_v48 = vsel %vm1038_vm7, %v1256_v37, %v1257_v36  ;;  %s5314_s14 = sld [smem:[#allocation3 + $0x1b]] }
 0x1a1   : > { %v5225_v57 = vstv %s5156_s20  ;;  %v1253_v36 = vrot.slane %v1239_v60, 1  ;;  %v5252_v7 = vstv %s5180_s23  ;;  %v5259_v33 = vstv %s5183_s25  ;;  %s5342_s20 = sld [smem:[#allocation3 + $0x6]]  ;;  %s5367_s23 = sld [smem:[#allocation3 + $0x71]] }
 0x1a2   : > { %1534 = vrot.lane.b32.xlu0 %v1529_v8, %s4198_s17  ;;  %v5187_v35 = vpop.permute.xlu1 %1612  ;;  %v5189_v62 = vpop.permute.xlu0 %1156  ;;  %v1238_v8 = vmul.f32 %v5132_v20, %v1237_v11  ;;  %v1526_v54 = vsel %vm1038_vm7, %v1524_v61, %v1525_v4  ;;  %7641 = vst [vmem:[#allocation61_spill] sm:$0xff] %v5252_v7  ;;  %v1521_v61 = vrot.slane %v1509_v47, 1  ;;  %v1522_v4 = vrot.slane %v1512_v44, 1  ;;  %7642 = vst [vmem:[#allocation62_spill] sm:$0xff] %v5259_v33  ;;  %v7651_v33 = vld [vmem:[#allocation10_spill] sm:$0xff]  ;;  %s5381_s25 = sld [smem:[#allocation3 + $0x72]] }
 0x1a3   : > { %7637 = vst [vmem:[#allocation57_spill] sm:$0xff] %v5187_v35  ;;  %7638 = vst [vmem:[#allocation58_spill] sm:$0xff] %v5189_v62  ;;  %v1241_v62 = vmul.f32 %v5141_v28, %v1237_v11  ;;  %v5245_v35 = vstv %s5172_s21  ;;  %v5262_v16 = vstv %s5185_s27  ;;  %v1291_v49 = vrot.slane %v1275_v53, 1  ;;  %s5344_s21 = sld [smem:[#allocation3 + $0x20]]  ;;  %s5409_s27 = sld [smem:[#allocation3 + $0x1d]] }
 0x1a4   : > { %1766 = vrot.lane.b32.xlu1 %v1759_v25, %s4199_s24  ;;  %v1254_v25 = vrot.slane %v1242_v41, 1  ;;  %v1250_v60 = vrot.slane %v1238_v8, 1  ;;  %7643 = vst [vmem:[#allocation63_spill] sm:$0xff] %v5262_v16  ;;  %v2362_v47 = vrot.slane %v2346_v14, 2  ;;  %v1274_v18 = vmul.f32 %v5164_v19, %v5194_v30 }
 0x1a5   : > { %v1251_v41 = vrot.slane %v1241_v62, 1  ;;  %v1277_v16 = vmul.f32 %v5168_v2, %v5194_v30  ;;  %v5283_v53 = vstv %s5212_s29  ;;  %v1523_v14 = vsel %vm1038_vm7, %v1521_v61, %v1522_v4  ;;  %s5419_s29 = sld [smem:[#allocation3 + $0x8]] }
 0x1a6   : > { %1263 = vrot.lane.b32.xlu0 %v1258_v48, %s4197_s15  ;;  %v5231_v11 = vpop.permute.xlu1 %1425  ;;  %v5233_v37 = vpop.permute.xlu0 %1660  ;;  %v1278_v48 = vmul.f32 %v5116_v40, %v5194_v30  ;;  %v1255_v8 = vsel %vm1038_vm7, %v1253_v36, %v1254_v25  ;;  %v5277_v36 = vmul.f32 %v5132_v20, %v5194_v30  ;;  %v5280_v25 = vstv %s5203_s28  ;;  %7646 = vst [vmem:[#allocation66_spill] sm:$0xff] %v5283_v53  ;;  %s5417_s28 = sld [smem:[#allocation3 + $0x2]] }
 0x1a7   : > { %7639 = vst [vmem:[#allocation59_spill] sm:$0xff] %v5231_v11  ;;  %7640 = vst [vmem:[#allocation60_spill] sm:$0xff] %v5233_v37  ;;  %v2349_v11 = vmul.f32 %v5197_v34, %v4671_v22  ;;  %v5249_v37 = vstv %s5178_s22  ;;  %v1276_v61 = vmul.f32 %v5141_v28, %v5194_v30  ;;  %s5359_s22 = sld [smem:[#allocation3 + $0x5a]] }
 0x1a8   : > { %1532 = vrot.lane.b32.xlu1 %v1526_v54, %s4198_s17  ;;  %v1292_v24 = vrot.slane %v1278_v48, 1  ;;  %7645 = vst [vmem:[#allocation65_spill] sm:$0xff] %v5280_v25  ;;  %v5293_v48 = vstv %s5227_s12  ;;  %s5495_s12 = sld [smem:[#allocation3 + $0x3]] }
 0x1a9   : > { %v2363_v44 = vrot.slane %v2349_v11, 2  ;;  %v5290_v11 = vstv %s5214_s30  ;;  %7647 = vst [vmem:[#allocation67_spill] sm:$0xff] %v5293_v48  ;;  %v1289_v48 = vrot.slane %v1277_v16, 1  ;;  %s5447_s30 = sld [smem:[#allocation3 + $0x8c]] }
 0x1aa   : > { %2554 = vrot.lane.b32.xlu0 %v4645_v51, %s4194_s9  ;;  %v5264_v54 = vpop.permute.xlu1 %1664  ;;  %v910_v62 = vpop.permute.xlu0 %909 }
 0x1ab   : > { %7644 = vst [vmem:[#allocation64_spill] sm:$0xff] %v5264_v54  ;;  %v1252_v54 = vsel %vm1038_vm7, %v1250_v60, %v1251_v41  ;;  %v7649_v60 = vld [vmem:[#allocation12_spill] sm:$0xff]  ;;  %v7650_v41 = vld [vmem:[#allocation9_spill] sm:$0xff]  ;;  %v2364_v4 = vsel %vm1978_vm8, %v2362_v47, %v2363_v44  ;;  %v1286_v47 = vrot.slane %v1276_v61, 1  ;;  %v2077_v44 = vmul.f32 %v5201_v56, %v4614_v50 }
 0x1ac   : > { %1261 = vrot.lane.b32.xlu1 %v1255_v8, %s4197_s15  ;;  %v5296_v8 = vstv %s5229_s6  ;;  %v984_v58 = vsel %vm983_vm4, %v7650_v41, %v7649_v60  ;;  %v985_v53 = vsel %vm983_vm4, %v7649_v60, %v7651_v33  ;;  %v5312_v41 = vmul.f32 %v5197_v34, %v4612_v45  ;;  %s5501_s6 = sld [smem:[#allocation3 + $0x21]] }
 0x1ad   : > { %7648 = vst [vmem:[#allocation68_spill] sm:$0xff] %v5296_v8  ;;  %v1288_v8 = vrot.slane %v1274_v18, 1  ;;  %v1054_v33 = vsel %vm375_vm11, %v4845_v32, %v4963_v0  ;;  %v2348_v18 = vmul.f32 %v5197_v34, %v4614_v50  ;;  %v5328_v16 = vsel %vm4741_vm9, %v984_v58, 0.0 }
 0x1ae   : > { %1259 = vrot.lane.b32.xlu0 %v1252_v54, %s4197_s15  ;;  %v5304_v25 = vpop.permute.xlu1 %1158  ;;  %v906_v7 = vpop.permute.xlu0 %905  ;;  %v1293_v54 = vsel %vm1038_vm7, %v1291_v49, %v1292_v24  ;;  %v1055_v24 = vsel %vm375_vm11, %v4963_v0, %v4796_v46  ;;  %v1285_v49 = vrot.slane %v5277_v36, 1  ;;  %7653 = vst [vmem:[#allocation9_spill] sm:$0xff] %v5328_v16  ;;  %v5332_v30 = vsel %vm4754_vm13, %v985_v53, 0.0 }
 0x1af   : > { %7652 = vst [vmem:[#allocation12_spill] sm:$0xff] %v5304_v25  ;;  %7654 = vst [vmem:[#allocation10_spill] sm:$0xff] %v5332_v30  ;;  %v1003_v46 = vstv %s5256_s7  ;;  %v2074_v32 = vmul.f32 %v5201_v56, %v4612_v45  ;;  %v1073_v36 = vstv %s5267_s8  ;;  %v5351_v53 = vsel %vm4745_vm10, %v1054_v33, 0.0  ;;  %s5511_s7 = sld [smem:[#allocation3 + $0x1e]]  ;;  %s5568_s8 = sld [smem:[#allocation3 + $0x7f]] }
 0x1b0   : > { %1530 = vrot.lane.b32.xlu1 %v1523_v14, %s4198_s17  ;;  %7655 = vst [vmem:[#allocation69_spill] sm:$0xff] %v5351_v53  ;;  %v5355_v45 = vsel %vm4758_vm14, %v1055_v24, 0.0  ;;  %v1004_v50 = vmul.f32 %v1003_v46, %v5328_v16  ;;  %v1005_v25 = vmul.f32 %v1003_v46, %v5332_v30 }
 0x1b1   : > { %7656 = vst [vmem:[#allocation70_spill] sm:$0xff] %v5355_v45 }
 0x1b2   : > { %1298 = vrot.lane.b32.xlu0 %v1293_v54, %s4197_s15  ;;  %v908_v58 = vpop.permute.xlu1 %907  ;;  %v930_v0 = vpop.permute.xlu0 %929 }
 0x1b3   : > { %v911_v14 = vsel %vm870_vm5, %v906_v7, %v908_v58  ;;  %v912_v60 = vsel %vm870_vm5, %v908_v58, %v910_v62  ;;  %v1290_v7 = vsel %vm1038_vm7, %v1288_v8, %v1289_v48  ;;  %v2359_v48 = vrot.slane %v5312_v41, 2 }
 0x1b4   : > { %v915_v54 = vadd.f32 %v911_v14, %v5048_v38  ;;  %v916_v61 = vadd.f32 %v912_v60, %v5050_v27  ;;  %2556 = vrot.lane.b32.xlu1 %v7613_v26, %s4194_s9  ;;  %v2344_v38 = vmul.f32 %v5197_v34, %v4652_v42  ;;  %v2347_v27 = vmul.f32 %v5197_v34, %v4658_v39 }
 0x1b5   : > { %v1074_v14 = vmul.f32 %v1073_v36, %v5351_v53  ;;  %v1075_v60 = vmul.f32 %v1073_v36, %v5355_v45  ;;  %v2360_v8 = vrot.slane %v2348_v18, 2  ;;  %v2088_v42 = vrot.slane %v2074_v32, 2 }
 0x1b6   : > { %2369 = vrot.lane.b32.xlu0 %v2364_v4, %s4198_s17  ;;  %v1006_v62 = vadd.f32 %v1004_v50, %v915_v54  ;;  %v1007_v24 = vadd.f32 %v1005_v25, %v916_v61  ;;  %v5376_v46 = vpop.permute.xlu1 %1154  ;;  %v731_v58 = vpop.permute.xlu0 %730  ;;  %v2089_v4 = vrot.slane %v2077_v44, 2  ;;  %v1287_v34 = vsel %vm1038_vm7, %v1285_v49, %v1286_v47 }
 0x1b7   : > { %7657 = vst [vmem:[#allocation71_spill] sm:$0xff] %v5376_v46  ;;  %v1009_v41 = vstv %s5338_s19  ;;  %v5395_v18 = vmul.f32 %v5112_v43, %v5210_v23  ;;  %v5399_v32 = vmul.f32 %v5116_v40, %v5210_v23  ;;  %v2356_v50 = vrot.slane %v2344_v38, 2  ;;  %s5818_s19 = sld [smem:[#allocation3 + $0xb]] }
 0x1b8   : > { %1296 = vrot.lane.b32.xlu1 %v1290_v7, %s4197_s15  ;;  %v5386_v25 = vadd.f32 %v1074_v14, %v1006_v62  ;;  %v5388_v54 = vadd.f32 %v1075_v60, %v1007_v24  ;;  %v2357_v7 = vrot.slane %v2347_v27, 2  ;;  %v2361_v24 = vsel %vm1978_vm8, %v2359_v48, %v2360_v8 }
 0x1b9   : > { %v2090_v14 = vsel %vm1978_vm8, %v2088_v42, %v2089_v4  ;;  %v1079_v60 = vstv %s5359_s22  ;;  %v1011_v36 = vmul.f32 %v1009_v41, %v5332_v30  ;;  %v796_v44 = vstv %s5367_s23  ;;  %s5609_s23 = scalar_lea.vmem %s7462_s2, %s4269_s26  ;;  %s5830_s22 = sld [smem:[#allocation3 + $0x8f]] }
 0x1ba   : > { %1294 = vrot.lane.b32.xlu0 %v1287_v34, %s4197_s15  ;;  %v928_v47 = vpop.permute.xlu1 %927  ;;  %v5403_v61 = vpop.permute.xlu0 %1920  ;;  %v2075_v38 = vmul.f32 %v5201_v56, %v4669_v31  ;;  %v2078_v27 = vmul.f32 %v5201_v56, %v4671_v22  ;;  %v1780_v48 = vmul.f32 %v5132_v20, %v5210_v23  ;;  %v2358_v4 = vsel %vm1978_vm8, %v2356_v50, %v2357_v7 }
 0x1bb   : > { %7658 = vst [vmem:[#allocation72_spill] sm:$0xff] %v5403_v61  ;;  %v932_v62 = vsel %vm870_vm5, %v928_v47, %v930_v0  ;;  %v1798_v0 = vrot.slane %v5395_v18, 1  ;;  %v845_v39 = vstv %s5381_s25  ;;  %s5619_s25 = sld [smem:[#allocation3 + $0x41]] }
 0x1bc   : > { %v936_v34 = vadd.f32 %v932_v62, %v5062_v63  ;;  %2367 = vrot.lane.b32.xlu1 %v2361_v24, %s4198_s17  ;;  %v1799_v63 = vrot.slane %v5399_v32, 1  ;;  %v1783_v62 = vmul.f32 %v5141_v28, %v5210_v23  ;;  %v1081_v24 = vmul.f32 %v1079_v60, %v5355_v45 }
 0x1bd   : > { %v798_v32 = vmul.f32 %v796_v44, %v4951_v9  ;;  %v2092_v7 = vrot.slane %v2078_v27, 2  ;;  %v1792_v33 = vrot.slane %v1780_v48, 1  ;;  %v5458_v27 = vmul.f32 %v5168_v2, %v5210_v23 }
 0x1be   : > { %2602 = vrot.lane.b32.xlu0 %v4645_v51, %s4195_s10  ;;  %v1013_v8 = vadd.f32 %v1011_v36, %v936_v34  ;;  %v729_v31 = vpop.permute.xlu1 %728  ;;  %v727_v42 = vpop.permute.xlu0 %726  ;;  %v797_v36 = vmul.f32 %v796_v44, %v4947_v12 }
 0x1bf   : > { %v733_v18 = vsel %vm651_vm3, %v729_v31, %v731_v58  ;;  %v732_v22 = vsel %vm651_vm3, %v727_v42, %v729_v31  ;;  %v2091_v58 = vrot.slane %v2075_v38, 2  ;;  %v5451_v31 = vmul.f32 %v5164_v19, %v5210_v23 }
 0x1c0   : > { %v737_v49 = vadd.f32 %v733_v18, %v5073_v15  ;;  %v736_v34 = vadd.f32 %v732_v22, %v5075_v6  ;;  %2552 = vrot.lane.b32.xlu1 %v7628_v5, %s4194_s9  ;;  %v5444_v50 = vadd.f32 %v1081_v24, %v1013_v8  ;;  %v847_v8 = vmul.f32 %v845_v39, %v5017_v17  ;;  %s5464_s9 = sld [smem:[#allocation3 + $0x8d]] }
 0x1c1   : > { %v1793_v38 = vrot.slane %v1783_v62, 1  ;;  %v1010_v18 = vmul.f32 %v1009_v41, %v5328_v16  ;;  %v1820_v22 = vmul.f32 %v5116_v40, %v5222_v1  ;;  %v1818_v23 = vmul.f32 %v5141_v28, %v5222_v1 }
 0x1c2   : > { %2096 = vrot.lane.b32.xlu0 %v2090_v14, %s4197_s15  ;;  %v800_v15 = vadd.f32 %v798_v32, %v737_v49  ;;  %v799_v44 = vadd.f32 %v797_v36, %v736_v34  ;;  %v926_v6 = vpop.permute.xlu1 %925  ;;  %v751_v42 = vpop.permute.xlu0 %750  ;;  %v846_v14 = vmul.f32 %v845_v39, %v5013_v13  ;;  %v5462_v49 = vmul.f32 %v5112_v43, %v5222_v1  ;;  %v5484_v34 = vld [vmem:[#allocation2] sm:$0xfc] }
 0x1c3   : > { %v931_v24 = vsel %vm870_vm5, %v926_v6, %v928_v47  ;;  %v1080_v6 = vmul.f32 %v1079_v60, %v5351_v53  ;;  %v1545_v60 = vmul.f32 %v5164_v19, %v5225_v57 }
 0x1c4   : > { %v935_v48 = vadd.f32 %v931_v24, %v5064_v10  ;;  %2365 = vrot.lane.b32.xlu1 %v2358_v4, %s4198_s17  ;;  %v5469_v39 = vadd.f32 %v847_v8, %v800_v15  ;;  %v5471_v47 = vadd.f32 %v846_v14, %v799_v44  ;;  %v2073_v4 = vmul.f32 %v5484_v34, %v5201_v56  ;;  %v5488_v15 = vld [vmem:[#allocation2 + $0x18] sm:$0x3] }
 0x1c5   : > { %v2076_v44 = vmul.f32 %v5488_v15, %v5201_v56  ;;  %v1800_v8 = vsel %vm1038_vm7, %v1798_v0, %v1799_v63  ;;  %v2093_v14 = vsel %vm1978_vm8, %v2091_v58, %v2092_v7  ;;  %v1795_v24 = vrot.slane %v5451_v31, 1 }
 0x1c6   : > { %2600 = vrot.lane.b32.xlu0 %v7628_v5, %s4195_s10  ;;  %v1012_v36 = vadd.f32 %v1010_v18, %v935_v48  ;;  %v5480_v10 = vpop.permute.xlu1 %1922  ;;  %v5482_v41 = vpop.permute.xlu0 %1735  ;;  %v1796_v48 = vrot.slane %v5458_v27, 1  ;;  %v1794_v56 = vsel %vm1038_vm7, %v1792_v33, %v1793_v38  ;;  %v1833_v18 = vrot.slane %v5462_v49, 1 }
 0x1c7   : > { %7659 = vst [vmem:[#allocation73_spill] sm:$0xff] %v5480_v10  ;;  %7660 = vst [vmem:[#allocation74_spill] sm:$0xff] %v5482_v41  ;;  %v802_v0 = vstv %s5447_s30  ;;  %v1548_v63 = vmul.f32 %v5168_v2, %v5225_v57  ;;  %v1816_v58 = vmul.f32 %v5164_v19, %v5222_v1  ;;  %v1819_v33 = vmul.f32 %v5168_v2, %v5222_v1  ;;  %s5699_s30 = sld [smem:[#allocation3 + $0x5c]] }
 0x1c8   : > { %2604 = vrot.lane.b32.xlu1 %v7613_v26, %s4195_s10  ;;  %v5509_v32 = vadd.f32 %v1080_v6, %v1012_v36  ;;  %v1834_v38 = vrot.slane %v1820_v22, 1  ;;  %v2085_v27 = vrot.slane %v2073_v4, 2  ;;  %v2086_v49 = vrot.slane %v2076_v44, 2  ;;  %s5550_s10 = sld [smem:[#allocation3 + $0x23]] }
 0x1c9   : > { %v1815_v36 = vmul.f32 %v5132_v20, %v5222_v1  ;;  %v851_v62 = vstv %s5464_s9  ;;  %v804_v41 = vmul.f32 %v802_v0, %v4951_v9  ;;  %v803_v22 = vmul.f32 %v802_v0, %v4947_v12  ;;  %s5724_s9 = sld [smem:[#allocation3 + $0x74]] }
 0x1ca   : > { %1805 = vrot.lane.b32.xlu0 %v1800_v8, %s4199_s24  ;;  %v749_v7 = vpop.permute.xlu1 %748  ;;  %v747_v31 = vpop.permute.xlu0 %746  ;;  %v1560_v44 = vrot.slane %v1548_v63, 1  ;;  %v853_v0 = vmul.f32 %v851_v62, %v5017_v17  ;;  %v1835_v63 = vsel %vm1038_vm7, %v1833_v18, %v1834_v38  ;;  %v1580_v38 = vmul.f32 %v5164_v19, %v5245_v35 }
 0x1cb   : > { %v753_v6 = vsel %vm651_vm3, %v749_v7, %v751_v42  ;;  %v752_v8 = vsel %vm651_vm3, %v747_v31, %v749_v7  ;;  %v1559_v42 = vrot.slane %v1545_v60, 1  ;;  %v1830_v7 = vrot.slane %v1816_v58, 1  ;;  %v7670_v58 = vld [vmem:[#allocation61_spill] sm:$0xff] }
 0x1cc   : > { %v757_v46 = vadd.f32 %v753_v6, %v5123_v3  ;;  %v756_v4 = vadd.f32 %v752_v8, %v5176_v55  ;;  %2098 = vrot.lane.b32.xlu1 %v2093_v14, %s4197_s15  ;;  %v1831_v31 = vrot.slane %v1819_v33, 1  ;;  %v852_v55 = vmul.f32 %v851_v62, %v5013_v13 }
 0x1cd   : > { %v1797_v14 = vsel %vm1038_vm7, %v1795_v24, %v1796_v48  ;;  %v1827_v61 = vrot.slane %v1815_v36, 1  ;;  %v2087_v62 = vsel %vm1978_vm8, %v2085_v27, %v2086_v49  ;;  %v1561_v24 = vsel %vm1038_vm7, %v1559_v42, %v1560_v44  ;;  %v5571_v36 = vld [vmem:[#allocation2 + $0x8] sm:$0xfc] }
 0x1ce   : > { %1801 = vrot.lane.b32.xlu0 %v1794_v56, %s4199_s24  ;;  %v806_v1 = vadd.f32 %v804_v41, %v757_v46  ;;  %v805_v10 = vadd.f32 %v803_v22, %v756_v4  ;;  %v5534_v3 = vpop.permute.xlu1 %1733  ;;  %v5536_v6 = vpop.permute.xlu0 %1990  ;;  %v1828_v56 = vrot.slane %v1818_v23, 1  ;;  %v1546_v23 = vmul.f32 %v5112_v43, %v5225_v57  ;;  %v5575_v4 = vld [vmem:[#allocation2 + $0x20] sm:$0x3] }
 0x1cf   : > { %7661 = vst [vmem:[#allocation75_spill] sm:$0xff] %v5534_v3  ;;  %7662 = vst [vmem:[#allocation76_spill] sm:$0xff] %v5536_v6  ;;  %v1832_v18 = vsel %vm1038_vm7, %v1830_v7, %v1831_v31  ;;  %v1583_v27 = vmul.f32 %v5168_v2, %v5245_v35  ;;  %v2651_v22 = vmul.f32 %v5571_v36, %v5249_v37 }
 0x1d0   : > { %1803 = vrot.lane.b32.xlu1 %v1797_v14, %s4199_s24  ;;  %v5545_v46 = vadd.f32 %v853_v0, %v806_v1  ;;  %v5547_v41 = vadd.f32 %v852_v55, %v805_v10  ;;  %v1549_v10 = vmul.f32 %v5116_v40, %v5225_v57  ;;  %v1829_v49 = vsel %vm1038_vm7, %v1827_v61, %v1828_v56  ;;  %v5593_v14 = vld [vmem:[#allocation2 + $0x10] sm:$0xfc]  ;;  %v5597_v56 = vld [vmem:[#allocation2 + $0x28] sm:$0x3] }
 0x1d1   : > { %7667 = vst [vmem:[#allocation81_spill] sm:$0xff] %v5575_v4  ;;  %v2654_v42 = vmul.f32 %v5575_v4, %v5249_v37  ;;  %v1544_v44 = vmul.f32 %v5132_v20, %v5225_v57  ;;  %v1547_v7 = vmul.f32 %v5141_v28, %v5225_v57  ;;  %v1581_v61 = vmul.f32 %v5112_v43, %v5245_v35 }
 0x1d2   : > { %7663 = vst [vmem:[#allocation77_spill] sm:$0xff] %v5545_v46  ;;  %7664 = vst [vmem:[#allocation78_spill] sm:$0xff] %v5547_v41  ;;  %1840 = vrot.lane.b32.xlu0 %v1835_v63, %s4199_s24  ;;  %v5557_v48 = vpop.permute.xlu1 %1918  ;;  %v5559_v33 = vpop.permute.xlu0 %1462  ;;  %v1584_v31 = vmul.f32 %v5116_v40, %v5245_v35  ;;  %v2650_v1 = vmul.f32 %v5484_v34, %v5249_v37  ;;  %v1562_v0 = vrot.slane %v1546_v23, 1  ;;  %v1594_v23 = vrot.slane %v1580_v38, 1 }
 0x1d3   : > { %7665 = vst [vmem:[#allocation79_spill] sm:$0xff] %v5557_v48  ;;  %7666 = vst [vmem:[#allocation80_spill] sm:$0xff] %v5559_v33  ;;  %v2653_v55 = vmul.f32 %v5488_v15, %v5249_v37  ;;  %v2652_v57 = vmul.f32 %v5593_v14, %v5249_v37  ;;  %v2655_v63 = vmul.f32 %v5597_v56, %v5249_v37  ;;  %v1595_v37 = vrot.slane %v1583_v27, 1 }
 0x1d4   : > { %2094 = vrot.lane.b32.xlu1 %v2087_v62, %s4197_s15  ;;  %v2381_v8 = vmul.f32 %v5593_v14, %v7670_v58  ;;  %v2384_v33 = vmul.f32 %v5597_v56, %v7670_v58  ;;  %v2665_v6 = vrot.slane %v2651_v22, 2  ;;  %v1556_v3 = vrot.slane %v1544_v44, 1 }
 0x1d5   : > { %v1597_v48 = vrot.slane %v1581_v61, 1  ;;  %v1598_v52 = vrot.slane %v1584_v31, 1  ;;  %v2662_v59 = vrot.slane %v2650_v1, 2  ;;  %v2663_v38 = vrot.slane %v2653_v55, 2  ;;  %v7673_v31 = vld [vmem:[#allocation62_spill] sm:$0xff] }
 0x1d6   : > { %1567 = vrot.lane.b32.xlu0 %v1561_v24, %s4198_s17  ;;  %v5601_v62 = vpop.permute.xlu1 %1731  ;;  %v5603_v60 = vpop.permute.xlu0 %1988  ;;  %v1563_v24 = vrot.slane %v1549_v10, 1  ;;  %v2906_v10 = vld [vmem:[%s5609_s23] sm:$0xff]  ;;  %v2668_v13 = vrot.slane %v2652_v57, 2  ;;  %v2669_v9 = vrot.slane %v2655_v63, 2  ;;  %v2398_v44 = vrot.slane %v2384_v33, 2 }
 0x1d7   : > { %7668 = vst [vmem:[#allocation82_spill] sm:$0xff] %v5601_v62  ;;  %7669 = vst [vmem:[#allocation83_spill] sm:$0xff] %v5603_v60  ;;  %v2666_v62 = vrot.slane %v2654_v42, 2  ;;  %v1557_v60 = vrot.slane %v1547_v7, 1  ;;  %v2397_v42 = vrot.slane %v2381_v8, 2  ;;  %v5628_v7 = vstv %s5568_s8  ;;  %s5739_s8 = sld [smem:[#allocation3 + $0x75]] }
 0x1d8   : > { %1838 = vrot.lane.b32.xlu1 %v1832_v18, %s4199_s24  ;;  %v5625_v18 = vmul.f32 %v5132_v20, %v5245_v35  ;;  %7672 = vst [vmem:[#allocation84_spill] sm:$0xff] %v5628_v7  ;;  %v1564_v61 = vsel %vm1038_vm7, %v1562_v0, %v1563_v24  ;;  %v5637_v1 = vmul.f32 %v5571_v36, %v7673_v31 }
 0x1d9   : > { %v5641_v8 = vmul.f32 %v5575_v4, %v7673_v31  ;;  %v1596_v33 = vsel %vm1038_vm7, %v1594_v23, %v1595_v37  ;;  %v2667_v55 = vsel %vm1978_vm8, %v2665_v6, %v2666_v62  ;;  %v5647_v0 = vmul.f32 %v5571_v36, %v7670_v58  ;;  %v7674_v62 = vld [vmem:[#allocation33_spill] sm:$0xff] }
 0x1da   : > { %1836 = vrot.lane.b32.xlu0 %v1829_v49, %s4199_s24  ;;  %v5621_v27 = vpop.permute.xlu1 %1992  ;;  %v1194_v22 = vpop.permute.xlu0 %1193  ;;  %v5633_v49 = vmul.f32 %v5141_v28, %v5245_v35  ;;  %v5651_v35 = vmul.f32 %v5575_v4, %v7670_v58  ;;  %v1558_v57 = vsel %vm1038_vm7, %v1556_v3, %v1557_v60  ;;  %v5657_v63 = vsel %vm1038_vm7, %v1597_v48, %v1598_v52  ;;  %v7675_v23 = vld [vmem:[#allocation49_spill] sm:$0xff] }
 0x1db   : > { %7671 = vst [vmem:[#allocation61_spill] sm:$0xff] %v5621_v27  ;;  %v5660_v24 = vsel %vm1978_vm8, %v2662_v59, %v2663_v38  ;;  %v5663_v6 = vsel %vm1978_vm8, %v2668_v13, %v2669_v9  ;;  %v1312_v37 = vsel %vm545_vm12, %v7675_v23, %v7674_v62  ;;  %v5674_v52 = vsel %vm1978_vm8, %v2397_v42, %v2398_v44  ;;  %v7678_v44 = vld [vmem:[#allocation63_spill] sm:$0xff]  ;;  %v7679_v23 = vld [vmem:[#allocation65_spill] sm:$0xff] }
 0x1dc   : > { %2913 = vperm.xlu1 %4145, %v2906_v10   ;;  %v7676_v10 = vld [vmem:[#allocation50_spill] sm:$0xff]  ;;  %v1591_v59 = vrot.slane %v5625_v18, 1  ;;  %v1592_v9 = vrot.slane %v5633_v49, 1  ;;  %v2123_v13 = vrot.slane %v5637_v1, 2  ;;  %v2124_v60 = vrot.slane %v5641_v8, 2 }
 0x1dd   : > { %v1313_v17 = vsel %vm545_vm12, %v7674_v62, %v7676_v10  ;;  %v2379_v48 = vmul.f32 %v5484_v34, %v7670_v58  ;;  %v2394_v38 = vrot.slane %v5647_v0, 2  ;;  %v2395_v62 = vrot.slane %v5651_v35, 2 }
 0x1de   : > { %2862 = vrot.lane.b32.xlu0 %v7613_v26, %s4196_s11  ;;  %v5671_v26 = vpop.permute.xlu1 %1464  ;;  %v1190_v3 = vpop.permute.xlu0 %1189  ;;  %v2382_v42 = vmul.f32 %v5488_v15, %v7670_v58  ;;  %v2144_v18 = vmul.f32 %v5571_v36, %v7678_v44  ;;  %v5691_v49 = vsel %vm4741_vm9, %v1312_v37, 0.0  ;;  %v5695_v1 = vsel %vm4754_vm13, %v1313_v17, 0.0 }
 0x1df   : > { %7677 = vst [vmem:[#allocation62_spill] sm:$0xff] %v5671_v26  ;;  %v2147_v8 = vmul.f32 %v5575_v4, %v7678_v44  ;;  %v2110_v0 = vmul.f32 %v5593_v14, %v7673_v31  ;;  %v2113_v35 = vmul.f32 %v5597_v56, %v7673_v31  ;;  %v1851_v37 = vmul.f32 %v5164_v19, %v7679_v23 }
 0x1e0   : > { %1569 = vrot.lane.b32.xlu1 %v1564_v61, %s4198_s17  ;;  %v1331_v61 = vstv %s5619_s25  ;;  %v1854_v17 = vmul.f32 %v5168_v2, %v7679_v23  ;;  %v2108_v27 = vmul.f32 %v5484_v34, %v7673_v31  ;;  %v2111_v29 = vmul.f32 %v5488_v15, %v7673_v31  ;;  %s5839_s25 = sld [smem:[#allocation3 + $0x90]] }
 0x1e1   : > { %v1332_v7 = vmul.f32 %v1331_v61, %v5691_v49  ;;  %v1333_v41 = vmul.f32 %v1331_v61, %v5695_v1  ;;  %v2159_v46 = vrot.slane %v2147_v8, 2  ;;  %v2127_v61 = vrot.slane %v2113_v35, 2 }
 0x1e2   : > { %1602 = vrot.lane.b32.xlu0 %v1596_v33, %s4198_s17  ;;  %v1192_v58 = vpop.permute.xlu1 %1191  ;;  %v1229_v26 = vpop.permute.xlu0 %1228  ;;  %v1866_v4 = vrot.slane %v1854_v17, 1 }
 0x1e3   : > { %v1195_v33 = vsel %vm432_vm0, %v1190_v3, %v1192_v58  ;;  %v1196_v10 = vsel %vm432_vm0, %v1192_v58, %v1194_v22  ;;  %v2391_v22 = vrot.slane %v2379_v48, 2  ;;  %v2392_v3 = vrot.slane %v2382_v42, 2 }
 0x1e4   : > { %v1199_v21 = vadd.f32 %v1195_v33, %v5386_v25  ;;  %v1200_v12 = vadd.f32 %v1196_v10, %v5388_v54  ;;  %2860 = vrot.lane.b32.xlu1 %v4645_v51, %s4196_s11  ;;  %v2158_v58 = vrot.slane %v2144_v18, 2  ;;  %v2126_v33 = vrot.slane %v2110_v0, 2 }
 0x1e5   : > { %v5733_v51 = vsel %vm1038_vm7, %v1591_v59, %v1592_v9  ;;  %v5737_v48 = vmul.f32 %v5484_v34, %v7678_v44  ;;  %v1337_v59 = vstv %s5699_s30  ;;  %v5753_v9 = vmul.f32 %v5488_v15, %v7678_v44  ;;  %s5945_s30 = sld [smem:[#allocation3 + $0xe]] }
 0x1e6   : > { %2673 = vrot.lane.b32.xlu0 %v2667_v55, %s4199_s24  ;;  %v5726_v31 = vadd.f32 %v1332_v7, %v1199_v21  ;;  %v5728_v25 = vadd.f32 %v1333_v41, %v1200_v12  ;;  %v5730_v54 = vpop.permute.xlu1 %1460  ;;  %v950_v10 = vpop.permute.xlu0 %949  ;;  %v1865_v55 = vrot.slane %v1851_v37, 1  ;;  %v5743_v21 = vsel %vm1978_vm8, %v2123_v13, %v2124_v60  ;;  %v7683_v60 = vld [vmem:[#allocation66_spill] sm:$0xff] }
 0x1e7   : > { %7682 = vst [vmem:[#allocation50_spill] sm:$0xff] %v5730_v54  ;;  %v5746_v12 = vsel %vm1978_vm8, %v2394_v38, %v2395_v62  ;;  %v2120_v41 = vrot.slane %v2108_v27, 2  ;;  %v2121_v7 = vrot.slane %v2111_v29, 2  ;;  %v5757_v42 = vmul.f32 %v5593_v14, %v7678_v44 }
 0x1e8   : > { %7680 = vst [vmem:[#allocation33_spill] sm:$0xff] %v5726_v31  ;;  %7681 = vst [vmem:[#allocation49_spill] sm:$0xff] %v5728_v25  ;;  %1565 = vrot.lane.b32.xlu1 %v1558_v57, %s4198_s17  ;;  %v5761_v57 = vmul.f32 %v5597_v56, %v7678_v44  ;;  %v5764_v29 = vsel %vm1978_vm8, %v2391_v22, %v2392_v3  ;;  %v5770_v27 = vsel %vm1978_vm8, %v2126_v33, %v2127_v61 }
 0x1e9   : > { %v5774_v38 = vmul.f32 %v5164_v19, %v7683_v60  ;;  %v5780_v44 = vsel %vm1038_vm7, %v1865_v55, %v1866_v4  ;;  %v2155_v8 = vrot.slane %v5737_v48, 2  ;;  %v1339_v35 = vmul.f32 %v1337_v59, %v5695_v1 }
 0x1ea   : > { %2858 = vrot.lane.b32.xlu0 %v7628_v5, %s4196_s11  ;;  %v1227_v13 = vpop.permute.xlu1 %1226  ;;  %v5767_v5 = vsel %vm1978_vm8, %v2158_v58, %v2159_v46  ;;  %v5777_v18 = vpop.permute.xlu0 %2248  ;;  %v5785_v46 = vmul.f32 %v5168_v2, %v7683_v60  ;;  %v5792_v19 = vsel %vm1978_vm8, %v2120_v41, %v2121_v7  ;;  %v5796_v4 = vmul.f32 %v5112_v43, %v7679_v23  ;;  %s5816_s11 = sld [smem:[#allocation3 + $0x9]] }
 0x1eb   : > { %v1231_v62 = vsel %vm432_vm0, %v1227_v13, %v1229_v26  ;;  %7684 = vst [vmem:[#allocation63_spill] sm:$0xff] %v5777_v18  ;;  %v1015_v2 = vstv %s5724_s9  ;;  %v2156_v26 = vrot.slane %v5753_v9, 2  ;;  %v2162_v37 = vrot.slane %v5761_v57, 2  ;;  %s5984_s9 = sld [smem:[#allocation3 + $0x9a]] }
 0x1ec   : > { %v1235_v0 = vadd.f32 %v1231_v62, %v5444_v50  ;;  %1604 = vrot.lane.b32.xlu1 %v5657_v63, %s4198_s17  ;;  %v2161_v50 = vrot.slane %v5757_v42, 2  ;;  %v1900_v22 = vrot.slane %v5774_v38, 1  ;;  %v1855_v3 = vmul.f32 %v5116_v40, %v7679_v23 }
 0x1ed   : > { %v1885_v58 = vmul.f32 %v5132_v20, %v7683_v60  ;;  %v1901_v61 = vrot.slane %v5785_v46, 1  ;;  %v1888_v55 = vmul.f32 %v5141_v28, %v7683_v60  ;;  %v1085_v48 = vstv %s5739_s8  ;;  %s6027_s8 = sld [smem:[#allocation3 + $0x4f]] }
 0x1ee   : > { %2671 = vrot.lane.b32.xlu0 %v5660_v24, %s4199_s24  ;;  %v5804_v17 = vadd.f32 %v1339_v35, %v1235_v0  ;;  %v948_v63 = vpop.permute.xlu1 %947  ;;  %v946_v33 = vpop.permute.xlu0 %945  ;;  %v1017_v7 = vmul.f32 %v1015_v2, %v5332_v30  ;;  %v1016_v42 = vmul.f32 %v1015_v2, %v5328_v16  ;;  %v1853_v38 = vmul.f32 %v5141_v28, %v7679_v23 }
 0x1ef   : > { %v952_v24 = vsel %vm870_vm5, %v948_v63, %v950_v10  ;;  %v951_v9 = vsel %vm870_vm5, %v946_v33, %v948_v63  ;;  %v1868_v10 = vrot.slane %v5796_v4, 1  ;;  %v1897_v0 = vrot.slane %v1885_v58, 1 }
 0x1f0   : > { %7685 = vst [vmem:[#allocation65_spill] sm:$0xff] %v5804_v17  ;;  %v956_v41 = vadd.f32 %v952_v24, %v5469_v39  ;;  %2675 = vrot.lane.b32.xlu1 %v5663_v6, %s4199_s24  ;;  %v955_v57 = vadd.f32 %v951_v9, %v5471_v47  ;;  %v1850_v39 = vmul.f32 %v5132_v20, %v7679_v23  ;;  %v1869_v6 = vrot.slane %v1855_v3, 1  ;;  %v7689_v9 = vld [vmem:[#allocation67_spill] sm:$0xff] }
 0x1f1   : > { %v1087_v35 = vmul.f32 %v1085_v48, %v5355_v45  ;;  %v1898_v63 = vrot.slane %v1888_v55, 1  ;;  %v1338_v24 = vmul.f32 %v1337_v59, %v5691_v49  ;;  %v5847_v28 = vmul.f32 %v5593_v14, %v5290_v11 }
 0x1f2   : > { %2404 = vrot.lane.b32.xlu0 %v5674_v52, %s4198_s17  ;;  %v1019_v62 = vadd.f32 %v1017_v7, %v956_v41  ;;  %v1225_v46 = vpop.permute.xlu1 %1224  ;;  %v1018_v4 = vadd.f32 %v1016_v42, %v955_v57  ;;  %v970_v2 = vpop.permute.xlu0 %969  ;;  %v1086_v52 = vmul.f32 %v1085_v48, %v5351_v53  ;;  %v1863_v3 = vrot.slane %v1853_v38, 1  ;;  %v7696_v42 = vld [vmem:[#allocation84_spill] sm:$0xff] }
 0x1f3   : > { %v1230_v47 = vsel %vm432_vm0, %v1225_v46, %v1227_v13  ;;  %v1862_v13 = vrot.slane %v1850_v39, 1  ;;  %v5864_v33 = vsel %vm1978_vm8, %v2155_v8, %v2156_v26  ;;  %v5872_v55 = vmul.f32 %v5116_v40, %v7683_v60 }
 0x1f4   : > { %v1234_v20 = vadd.f32 %v1230_v47, %v5509_v32  ;;  %1600 = vrot.lane.b32.xlu1 %v5733_v51, %s4198_s17  ;;  %v5849_v23 = vadd.f32 %v1087_v35, %v1019_v62  ;;  %v5855_v32 = vmul.f32 %v5597_v56, %v5290_v11  ;;  %v5857_v59 = vadd.f32 %v1086_v52, %v1018_v4  ;;  %v7691_v47 = vld [vmem:[#allocation77_spill] sm:$0xff] }
 0x1f5   : > { %v5877_v41 = vsel %vm1978_vm8, %v2161_v50, %v2162_v37  ;;  %v5880_v7 = vsel %vm1038_vm7, %v1900_v22, %v1901_v61  ;;  %v5884_v8 = vmul.f32 %v5593_v14, %v7689_v9  ;;  %v5895_v40 = vsel %vm1038_vm7, %v1868_v10, %v1869_v6  ;;  %v2907_v37 = vld [vmem:[%s5609_s23 + $0x8] sm:$0xff]  ;;  %s5943_s23 = sld [smem:[#allocation3 + $0xc]] }
 0x1f6   : > { %2131 = vrot.lane.b32.xlu0 %v5743_v21, %s4197_s15  ;;  %v5859_v51 = vadd.f32 %v1338_v24, %v1234_v20  ;;  %v5861_v58 = vpop.permute.xlu1 %2250  ;;  %v5868_v21 = vmul.f32 %v5112_v43, %v7683_v60  ;;  %v5888_v43 = vmul.f32 %v5597_v56, %v7689_v9  ;;  %v5898_v60 = vsel %vm1038_vm7, %v1897_v0, %v1898_v63 }
 0x1f7   : > { %7687 = vst [vmem:[#allocation85_spill] sm:$0xff] %v5861_v58  ;;  %v5874_v48 = vpop.permute.xlu0 %2063  ;;  %v1021_v50 = vstv %s5830_s22  ;;  %v5905_v22 = vsel %vm1038_vm7, %v1862_v13, %v1863_v3  ;;  %v5913_v38 = vmul.f32 %v5571_v36, %v5290_v11  ;;  %v2432_v0 = vrot.slane %v5884_v8, 2  ;;  %v7692_v3 = vld [vmem:[#allocation78_spill] sm:$0xff]  ;;  %s6069_s22 = sld [smem:[#allocation3 + $0x6a]] }
 0x1f8   : > { %7686 = vst [vmem:[#allocation66_spill] sm:$0xff] %v5859_v51  ;;  %7688 = vst [vmem:[#allocation86_spill] sm:$0xff] %v5874_v48  ;;  %2402 = vrot.lane.b32.xlu1 %v5746_v12, %s4198_s17  ;;  %v2433_v35 = vrot.slane %v5888_v43, 2  ;;  %v1091_v4 = vstv %s5839_s25  ;;  %v1023_v52 = vmul.f32 %v1021_v50, %v5332_v30  ;;  %v2414_v24 = vmul.f32 %v5484_v34, %v7689_v9  ;;  %s6506_s25 = sld [smem:[#allocation3 + $0x5f]] }
 0x1f9   : > { %v1022_v13 = vmul.f32 %v1021_v50, %v5328_v16  ;;  %v2417_v8 = vmul.f32 %v5488_v15, %v7689_v9  ;;  %v2415_v43 = vmul.f32 %v5571_v36, %v7689_v9  ;;  %v2180_v26 = vmul.f32 %v5593_v14, %v7696_v42 }
 0x1fa   : > { %2400 = vrot.lane.b32.xlu0 %v5764_v29, %s4198_s17  ;;  %v968_v12 = vpop.permute.xlu1 %967  ;;  %v7690_v29 = vld [vmem:[#allocation81_spill] sm:$0xff]  ;;  %v2700_v10 = vrot.slane %v5913_v38, 2  ;;  %v2426_v57 = vrot.slane %v2414_v24, 2 }
 0x1fb   : > { %v5917_v62 = vmul.f32 %v7690_v29, %v5290_v11  ;;  %v972_v46 = vsel %vm870_vm5, %v968_v12, %v970_v2  ;;  %v966_v6 = vpop.permute.xlu0 %965 }
 0x1fc   : > { %v976_v63 = vadd.f32 %v972_v46, %v7691_v47  ;;  %v971_v20 = vsel %vm870_vm5, %v966_v6, %v968_v12  ;;  %2916 = vperm.xlu1 %4145, %v2907_v37   ;;  %v2418_v37 = vmul.f32 %v7690_v29, %v7689_v9  ;;  %v7694_v12 = vld [vmem:[#allocation68_spill] sm:$0xff]  ;;  %v1093_v6 = vmul.f32 %v1091_v4, %v5355_v45 }
 0x1fd   : > { %v975_v2 = vadd.f32 %v971_v20, %v7692_v3  ;;  %v2451_v50 = vmul.f32 %v5593_v14, %v7694_v12  ;;  %v1092_v9 = vmul.f32 %v1091_v4, %v5351_v53  ;;  %v2688_v3 = vmul.f32 %v5488_v15, %v5290_v11 }
 0x1fe   : > { %2166 = vrot.lane.b32.xlu0 %v5767_v5, %s4197_s15  ;;  %v1025_v46 = vadd.f32 %v1023_v52, %v976_v63  ;;  %v5936_v47 = vpop.permute.xlu1 %2061  ;;  %v2454_v63 = vmul.f32 %v5597_v56, %v7694_v12  ;;  %v2685_v52 = vmul.f32 %v5484_v34, %v5290_v11  ;;  %v2450_v4 = vmul.f32 %v5571_v36, %v7694_v12 }
 0x1ff   : > { %7693 = vst [vmem:[#allocation67_spill] sm:$0xff] %v5936_v47  ;;  %v1024_v5 = vadd.f32 %v1022_v13, %v975_v2  ;;  %v5947_v20 = vpop.permute.xlu0 %2296  ;;  %v2183_v13 = vmul.f32 %v5597_v56, %v7696_v42  ;;  %v2701_v61 = vrot.slane %v5917_v62, 2  ;;  %v2467_v48 = vrot.slane %v2451_v50, 2 }
 0x200   : > { %7695 = vst [vmem:[#allocation81_spill] sm:$0xff] %v5947_v20  ;;  %2133 = vrot.lane.b32.xlu1 %v5770_v27, %s4197_s15  ;;  %v5962_v2 = vadd.f32 %v1093_v6, %v1025_v46  ;;  %v2453_v27 = vmul.f32 %v7690_v29, %v7694_v12  ;;  %v2427_v46 = vrot.slane %v2417_v8, 2  ;;  %v2429_v6 = vrot.slane %v2415_v43, 2 }
 0x201   : > { %v5971_v11 = vadd.f32 %v1092_v9, %v1024_v5  ;;  %v2468_v38 = vrot.slane %v2454_v63, 2  ;;  %v2697_v58 = vrot.slane %v2685_v52, 2  ;;  %v2698_v20 = vrot.slane %v2688_v3, 2 }
 0x202   : > { %1873 = vrot.lane.b32.xlu0 %v5780_v44, %s4199_s24  ;;  %v5973_v39 = vpop.permute.xlu1 %2246  ;;  %v2430_v44 = vrot.slane %v2418_v37, 2  ;;  %v2196_v5 = vrot.slane %v2180_v26, 2  ;;  %v2197_v9 = vrot.slane %v2183_v13, 2  ;;  %v5982_v62 = vmul.f32 %v5484_v34, %v7696_v42 }
 0x203   : > { %7697 = vst [vmem:[#allocation77_spill] sm:$0xff] %v5973_v39  ;;  %v2464_v24 = vrot.slane %v2450_v4, 2  ;;  %v2465_v8 = vrot.slane %v2453_v27, 2  ;;  %v5990_v43 = vmul.f32 %v5488_v15, %v7696_v42  ;;  %v7700_v37 = vrot.slane %v5855_v32, 2 }
 0x204   : > { %v5976_v54 = vpop.permute.xlu0 %1768  ;;  %2129 = vrot.lane.b32.xlu1 %v5792_v19, %s4197_s15  ;;  %v5994_v19 = vmul.f32 %v5571_v36, %v7696_v42  ;;  %v7701_v50 = vrot.slane %v5847_v28, 2  ;;  %v7703_v52 = vrot.slane %v5868_v21, 1  ;;  %v6011_v13 = vsel %vm1978_vm8, %v2432_v0, %v2433_v35  ;;  %v7705_v35 = vld [vmem:[#allocation54_spill] sm:$0xff] }
 0x205   : > { %7698 = vst [vmem:[#allocation78_spill] sm:$0xff] %v5976_v54  ;;  %v6015_v4 = vmul.f32 %v7690_v29, %v7696_v42  ;;  %v6025_v21 = vsel %vm1978_vm8, %v2426_v57, %v2427_v46  ;;  %v6032_v42 = vsel %vm1978_vm8, %v2429_v6, %v2430_v44  ;;  %v6035_v0 = vsel %vm1978_vm8, %v2467_v48, %v2468_v38  ;;  %v7707_v6 = vld [vmem:[#allocation55_spill] sm:$0xff] }
 0x206   : > { %2164 = vrot.lane.b32.xlu0 %v5864_v33, %s4197_s15  ;;  %v5996_v26 = vpop.permute.xlu1 %2059  ;;  %v2705_v63 = vsel %vm1978_vm8, %v7701_v50, %v7700_v37  ;;  %v7702_v33 = vrot.slane %v5872_v55, 1  ;;  %v6022_v55 = vsel %vm1978_vm8, %v2700_v10, %v2701_v61  ;;  %v6038_v61 = vsel %vm1978_vm8, %v2697_v58, %v2698_v20  ;;  %v7724_v48 = vld [vmem:[#allocation7_spill] sm:$0xff] }
 0x207   : > { %7699 = vst [vmem:[#allocation68_spill] sm:$0xff] %v5996_v26  ;;  %v6041_v57 = vsel %vm1978_vm8, %v2196_v5, %v2197_v9  ;;  %v7706_v20 = vstv %s5285_s13  ;;  %v7709_v38 = vstv %s5344_s21  ;;  %v7713_v37 = vstv %s5314_s14  ;;  %s6153_s13 = sld [smem:[#allocation3 + $0x82]]  ;;  %s6207_s14 = sld [smem:[#allocation3 + $0x77]] }
 0x208   : > { %v6008_v3 = vsel %vm1038_vm7, %v7703_v52, %v7702_v33  ;;  %v6019_v28 = vpop.permute.xlu0 %2294  ;;  %2168 = vrot.lane.b32.xlu1 %v5877_v41, %s4197_s15  ;;  %v6046_v41 = vsel %vm1978_vm8, %v2464_v24, %v2465_v8  ;;  %v6054_v46 = vmul.f32 %v7706_v20, %v7705_v35  ;;  %v7708_v44 = vmov %v7706_v20  ;;  %v7712_v8 = vld [vmem:[#allocation43_spill] sm:$0xff]  ;;  %v7715_v33 = vld [vmem:[#allocation44_spill] sm:$0xff]  ;;  %s6293_s21 = sld [smem:[#allocation3 + $0xf]] }
 0x209   : > { %7704 = vst [vmem:[#allocation84_spill] sm:$0xff] %v6019_v28  ;;  %v6064_v5 = vmul.f32 %v7709_v38, %v7705_v35  ;;  %v6074_v50 = vmul.f32 %v7713_v37, %v7712_v8  ;;  %v7716_v52 = vmov %v7713_v37  ;;  %v7718_v35 = vstv %s5334_s16  ;;  %v7722_v24 = vld [vmem:[#allocation11_spill] sm:$0xff]  ;;  %s6212_s16 = sld [smem:[#allocation3 + $0x9d]] }
 0x20a   : > { %1908 = vrot.lane.b32.xlu0 %v5880_v7, %s4199_s24  ;;  %v6059_v7 = vmul.f32 %v7708_v44, %v7707_v6  ;;  %v6066_v9 = vpop.permute.xlu1 %2298  ;;  %v6079_v20 = vmul.f32 %v7716_v52, %v7715_v33  ;;  %v6084_v44 = vmul.f32 %v7718_v35, %v7715_v33  ;;  %v6089_v32 = vmul.f32 %v7709_v38, %v7707_v6 }
 0x20b   : > { %7710 = vst [vmem:[#allocation54_spill] sm:$0xff] %v6064_v5  ;;  %7711 = vst [vmem:[#allocation55_spill] sm:$0xff] %v6066_v9  ;;  %v7721_v37 = vmov %v7718_v35  ;;  %v7723_v10 = vstv %s5342_s20  ;;  %v2212_v6 = vstv %s5984_s9  ;;  %v7726_v35 = vld [vmem:[#allocation45_spill] sm:$0xff]  ;;  %v7727_v38 = vstv %s5409_s27  ;;  %s6275_s20 = sld [smem:[#allocation3 + $0x85]]  ;;  %s6319_s27 = sld [smem:[#allocation3 + $0x92]] }
 0x20c   : > { %7714 = vst [vmem:[#allocation43_spill] sm:$0xff] %v6074_v50  ;;  %7717 = vst [vmem:[#allocation44_spill] sm:$0xff] %v6079_v20  ;;  %v6091_v27 = vpop.permute.xlu0 %1499  ;;  %v6096_v58 = vmul.f32 %v7721_v37, %v7712_v8  ;;  %v6101_v52 = vmul.f32 %v7723_v10, %v7722_v24  ;;  %v7725_v54 = vmov %v7723_v10  ;;  %1875 = vrot.lane.b32.xlu1 %v5895_v40, %s4199_s24  ;;  %v7729_v8 = vld [vmem:[#allocation46_spill] sm:$0xff]  ;;  %v7730_v37 = vmov %v7727_v38  ;;  %v7733_v40 = vld [vmem:[#allocation47_spill] sm:$0xff]  ;;  %s6570_s9 = sld [smem:[#allocation3 + $0x47]] }
 0x20d   : > { %7719 = vst [vmem:[#allocation87_spill] sm:$0xff] %v6089_v32  ;;  %7720 = vst [vmem:[#allocation88_spill] sm:$0xff] %v6091_v27  ;;  %v6106_v33 = vmul.f32 %v7725_v54, %v7724_v48  ;;  %v6114_v9 = vmul.f32 %v7727_v38, %v7726_v35  ;;  %v6119_v28 = vmul.f32 %v7730_v37, %v7729_v8  ;;  %v7732_v10 = vstv %s5417_s28  ;;  %v7741_v32 = vld [vmem:[#allocation48_spill] sm:$0xff]  ;;  %s6341_s28 = sld [smem:[#allocation3 + $0xa0]] }
 0x20e   : > { %v6124_v26 = vmul.f32 %v7732_v10, %v7726_v35  ;;  %1906 = vrot.lane.b32.xlu0 %v5898_v60, %s4199_s24  ;;  %v6129_v54 = vmul.f32 %v5593_v14, %v2212_v6  ;;  %v7734_v47 = vstv %s5495_s12  ;;  %v7735_v38 = vmov %v7732_v10  ;;  %v6151_v60 = vpop.permute.xlu1 %1770  ;;  %s6451_s12 = sld [smem:[#allocation3 + $0x44]] }
 0x20f   : > { %7728 = vst [vmem:[#allocation45_spill] sm:$0xff] %v6114_v9  ;;  %7731 = vst [vmem:[#allocation46_spill] sm:$0xff] %v6119_v28  ;;  %v6134_v39 = vmul.f32 %v7734_v47, %v7733_v40  ;;  %v6139_v18 = vmul.f32 %v7735_v38, %v7729_v8  ;;  %v7736_v37 = vstv %s5419_s29  ;;  %v7742_v5 = vmov %v7734_v47  ;;  %s6392_s29 = sld [smem:[#allocation3 + $0x42]] }
 0x210   : > { %v6144_v48 = vmul.f32 %v7736_v37, %v5328_v16  ;;  %v7738_v35 = vmov %v7736_v37  ;;  %7740 = vst [vmem:[#allocation90_spill] sm:$0xff] %v6151_v60  ;;  %v6158_v47 = vmul.f32 %v7742_v5, %v7741_v32  ;;  %v7743_v24 = vstv %s5511_s7  ;;  %v6165_v38 = vpop.permute.xlu0 %1495  ;;  %1871 = vrot.lane.b32.xlu1 %v5905_v22, %s4199_s24  ;;  %s6484_s7 = sld [smem:[#allocation3 + $0x5d]] }
 0x211   : > { %v6149_v10 = vmul.f32 %v7738_v35, %v5332_v30  ;;  %v6163_v8 = vmul.f32 %v7743_v24, %v7733_v40  ;;  %7745 = vst [vmem:[#allocation91_spill] sm:$0xff] %v6165_v38  ;;  %v2218_v37 = vmul.f32 %v5597_v56, %v2212_v6  ;;  %v2719_v16 = vstv %s6027_s8  ;;  %s6637_s8 = sld [smem:[#allocation3 + $0x62]] }
 0x212   : > { %7737 = vst [vmem:[#allocation47_spill] sm:$0xff] %v6144_v48  ;;  %v7746_v35 = vmov %v7743_v24  ;;  %v2449_v5 = vmul.f32 %v5484_v34, %v7694_v12  ;;  %v2452_v24 = vmul.f32 %v5488_v15, %v7694_v12  ;;  %v2721_v40 = vmul.f32 %v5571_v36, %v2719_v16  ;;  %2710 = vrot.lane.b32.xlu0 %v2705_v63, %s4199_s24 }
 0x213   : > { %7739 = vst [vmem:[#allocation89_spill] sm:$0xff] %v6149_v10  ;;  %7744 = vst [vmem:[#allocation48_spill] sm:$0xff] %v6163_v8  ;;  %v6172_v30 = vmul.f32 %v7746_v35, %v7741_v32  ;;  %v2231_v60 = vrot.slane %v6129_v54, 2  ;;  %v2724_v8 = vmul.f32 %v7690_v29, %v2719_v16  ;;  %v2214_v32 = vmul.f32 %v5571_v36, %v2212_v6 }
 0x214   : > { %v2217_v35 = vmul.f32 %v7690_v29, %v2212_v6  ;;  %v2720_v22 = vmul.f32 %v5484_v34, %v2719_v16  ;;  %v2723_v28 = vmul.f32 %v5488_v15, %v2719_v16  ;;  %v2213_v12 = vmul.f32 %v5484_v34, %v2212_v6  ;;  %v6194_v17 = vpop.permute.xlu0 %1534  ;;  %1910 = vrot.lane.b32.xlu1 %v6008_v3, %s4199_s24 }
 0x215   : > { %7747 = vst [vmem:[#allocation92_spill] sm:$0xff] %v6172_v30  ;;  %v6186_v30 = vpop.permute.xlu1 %1497  ;;  %v6192_v51 = vstv %s6069_s22  ;;  %7749 = vst [vmem:[#allocation94_spill] sm:$0xff] %v6194_v17  ;;  %v2232_v63 = vrot.slane %v2218_v37, 2  ;;  %v2216_v54 = vmul.f32 %v5488_v15, %v2212_v6  ;;  %v2461_v9 = vrot.slane %v2449_v5, 2  ;;  %s6674_s22 = sld [smem:[#allocation3 + $0x11]] }
 0x216   : > { %7748 = vst [vmem:[#allocation93_spill] sm:$0xff] %v6186_v30  ;;  %v2757_v45 = vmul.f32 %v5593_v14, %v6192_v51  ;;  %v2760_v10 = vmul.f32 %v5597_v56, %v6192_v51  ;;  %v2462_v48 = vrot.slane %v2452_v24, 2  ;;  %v2722_v25 = vmul.f32 %v5593_v14, %v2719_v16  ;;  %2439 = vrot.lane.b32.xlu0 %v6011_v13, %s4198_s17 }
 0x217   : > { %v2725_v31 = vmul.f32 %v5597_v56, %v2719_v16  ;;  %v2735_v6 = vrot.slane %v2721_v40, 2  ;;  %v2736_v37 = vrot.slane %v2724_v8, 2  ;;  %v2228_v17 = vrot.slane %v2214_v32, 2 }
 0x218   : > { %v2229_v53 = vrot.slane %v2217_v35, 2  ;;  %v2732_v27 = vrot.slane %v2720_v22, 2  ;;  %v2733_v38 = vrot.slane %v2723_v28, 2  ;;  %v2225_v3 = vrot.slane %v2213_v12, 2  ;;  %v1264_v24 = vpop.permute.xlu0 %1263  ;;  %2708 = vrot.lane.b32.xlu1 %v6022_v55, %s4199_s24  ;;  %v7756_v12 = vld [vmem:[#allocation15_spill] sm:$0xff] }
 0x219   : > { %v6209_v20 = vpop.permute.xlu1 %1766  ;;  %v2483_v5 = vstv %s6153_s13  ;;  %v2226_v30 = vrot.slane %v2216_v54, 2  ;;  %v2773_v16 = vrot.slane %v2757_v45, 2  ;;  %v2774_v50 = vrot.slane %v2760_v10, 2  ;;  %s7007_s13 = sld [smem:[#allocation3 + $0x48]] }
 0x21a   : > { %7750 = vst [vmem:[#allocation95_spill] sm:$0xff] %v6209_v20  ;;  %v6215_v13 = vmul.f32 %v5593_v14, %v2483_v5  ;;  %v7751_v8 = vrot.slane %v5990_v43, 2  ;;  %v7752_v40 = vrot.slane %v5982_v62, 2  ;;  %v2738_v32 = vrot.slane %v2722_v25, 2  ;;  %2435 = vrot.lane.b32.xlu0 %v6025_v21, %s4198_s17  ;;  %v7755_v25 = vld [vmem:[#allocation40_spill] sm:$0xff]  ;;  %v7793_v20 = vld [vmem:[#allocation33_spill] sm:$0xff] }
 0x21b   : > { %v2739_v35 = vrot.slane %v2725_v31, 2  ;;  %v6227_v22 = vmul.f32 %v5597_v56, %v2483_v5  ;;  %v7753_v45 = vrot.slane %v6015_v4, 2  ;;  %v7754_v10 = vrot.slane %v5994_v19, 2 }
 0x21c   : > { %v6224_v28 = vsel %vm1978_vm8, %v7752_v40, %v7751_v8  ;;  %v6239_v62 = vsel %vm1978_vm8, %v2231_v60, %v2232_v63  ;;  %v6242_v43 = vsel %vm1978_vm8, %v2461_v9, %v2462_v48  ;;  %v6246_v31 = vmul.f32 %v5571_v36, %v6192_v51  ;;  %v6263_v9 = vpop.permute.xlu0 %2554  ;;  %2437 = vrot.lane.b32.xlu1 %v6032_v42, %s4198_s17 }
 0x21d   : > { %v6236_v55 = vsel %vm1978_vm8, %v7754_v10, %v7753_v45  ;;  %v433_v21 = vsel %vm432_vm0, %v7756_v12, %v7755_v25  ;;  %v6251_v4 = vpop.permute.xlu1 %1532  ;;  %v6254_v19 = vsel %vm1978_vm8, %v2735_v6, %v2736_v37  ;;  %v6257_v60 = vsel %vm1978_vm8, %v2228_v17, %v2229_v53  ;;  %7757 = vst [vmem:[#allocation40_spill] sm:$0xff] %v6263_v9  ;;  %v7758_v53 = vld [vmem:[#allocation13_spill] sm:$0xff] }
 0x21e   : > { %v6261_v48 = vmul.f32 %v7690_v29, %v6192_v51  ;;  %v6266_v63 = vsel %vm1978_vm8, %v2732_v27, %v2733_v38  ;;  %v6269_v54 = vsel %vm1978_vm8, %v2225_v3, %v2226_v30  ;;  %v6272_v8 = vsel %vm1978_vm8, %v2773_v16, %v2774_v50  ;;  %2474 = vrot.lane.b32.xlu0 %v6035_v0, %s4198_s17 }
 0x21f   : > { %v2502_v6 = vrot.slane %v6215_v13, 2  ;;  %v434_v17 = vsel %vm432_vm0, %v7755_v25, %v7758_v53  ;;  %v6283_v27 = vsel %vm1978_vm8, %v2738_v32, %v2739_v35  ;;  %v2503_v30 = vrot.slane %v6227_v22, 2 }
 0x220   : > { %v2484_v50 = vmul.f32 %v5484_v34, %v2483_v5  ;;  %v437_v38 = vadd.f32 %v433_v21, %v6096_v58  ;;  %v1343_v37 = vstv %s6207_s14  ;;  %v2770_v3 = vrot.slane %v6246_v31, 2  ;;  %v1260_v22 = vpop.permute.xlu0 %1259  ;;  %2706 = vrot.lane.b32.xlu1 %v6038_v61, %s4199_s24  ;;  %s7013_s14 = sld [smem:[#allocation3 + $0x4a]] }
 0x221   : > { %v2487_v16 = vmul.f32 %v5488_v15, %v2483_v5  ;;  %v1262_v42 = vpop.permute.xlu1 %1261  ;;  %v2771_v13 = vrot.slane %v6261_v48, 2  ;;  %v2485_v40 = vmul.f32 %v5571_v36, %v2483_v5  ;;  %v2488_v32 = vmul.f32 %v7690_v29, %v2483_v5 }
 0x222   : > { %v6299_v35 = vstv %s6212_s16  ;;  %v438_v58 = vadd.f32 %v434_v17, %v6084_v44  ;;  %v1266_v0 = vsel %vm432_vm0, %v1262_v42, %v1264_v24  ;;  %v1345_v25 = vmul.f32 %v1343_v37, %v5695_v1  ;;  %2203 = vrot.lane.b32.xlu0 %v6041_v57, %s4197_s15  ;;  %s6710_s16 = scalar_lea.vmem %s7463_s3, %s4269_s26 }
 0x223   : > { %v2521_v45 = vmul.f32 %v5593_v14, %v6299_v35  ;;  %v2524_v10 = vmul.f32 %v5597_v56, %v6299_v35  ;;  %v1270_v31 = vadd.f32 %v1266_v0, %v5849_v23  ;;  %v1265_v12 = vsel %vm432_vm0, %v1260_v22, %v1262_v42 }
 0x224   : > { %v2755_v44 = vmul.f32 %v5484_v34, %v6192_v51  ;;  %v556_v5 = vadd.f32 %v6124_v26, %v437_v38  ;;  %v1344_v24 = vmul.f32 %v1343_v37, %v5691_v49  ;;  %v1269_v21 = vadd.f32 %v1265_v12, %v5857_v59  ;;  %v1299_v59 = vpop.permute.xlu0 %1298  ;;  %2472 = vrot.lane.b32.xlu1 %v6046_v41, %s4198_s17  ;;  %v7763_v12 = vld [vmem:[#allocation16_spill] sm:$0xff] }
 0x225   : > { %v2758_v23 = vmul.f32 %v5488_v15, %v6192_v51  ;;  %v6323_v48 = vadd.f32 %v1345_v25, %v1270_v31  ;;  %v6325_v61 = vpop.permute.xlu1 %1530  ;;  %v2496_v53 = vrot.slane %v2484_v50, 2  ;;  %v2497_v17 = vrot.slane %v2487_v16, 2  ;;  %v7762_v25 = vld [vmem:[#allocation31_spill] sm:$0xff] }
 0x226   : > { %v2499_v42 = vrot.slane %v2485_v40, 2  ;;  %v557_v26 = vadd.f32 %v6139_v18, %v438_v58  ;;  %v6328_v38 = vadd.f32 %v1344_v24, %v1269_v21  ;;  %v2500_v37 = vrot.slane %v2488_v32, 2  ;;  %2199 = vrot.lane.b32.xlu0 %v6224_v28, %s4197_s15  ;;  %v6385_v21 = vld [vmem:[#allocation2 + $0x18] sm:$0x3] }
 0x227   : > { %v6331_v57 = vstv %s6275_s20  ;;  %v2537_v15 = vrot.slane %v2521_v45, 2  ;;  %v2538_v51 = vrot.slane %v2524_v10, 2  ;;  %v6339_v50 = vmul.f32 %v5571_v36, %v6299_v35  ;;  %s6758_s20 = sld [smem:[#allocation3 + $0x27]] }
 0x228   : > { %7759 = vst [vmem:[#allocation15_spill] sm:$0xff] %v6328_v38  ;;  %v2791_v0 = vmul.f32 %v5571_v36, %v6331_v57  ;;  %v605_v18 = vadd.f32 %v6134_v39, %v556_v5  ;;  %v6347_v16 = vsel %vm1978_vm8, %v2502_v6, %v2503_v30  ;;  %v2767_v41 = vrot.slane %v2755_v44, 2  ;;  %v6359_v10 = vpop.permute.xlu0 %2369  ;;  %2201 = vrot.lane.b32.xlu1 %v6236_v55, %s4197_s15  ;;  %v7764_v55 = vld [vmem:[#allocation14_spill] sm:$0xff] }
 0x229   : > { %v2768_v40 = vrot.slane %v2758_v23, 2  ;;  %v6350_v58 = vpop.permute.xlu1 %2556  ;;  %v2794_v22 = vmul.f32 %v7690_v29, %v6331_v57  ;;  %v2523_v45 = vmul.f32 %v7690_v29, %v6299_v35  ;;  %v2790_v39 = vmul.f32 %v5484_v34, %v6331_v57  ;;  %7761 = vst [vmem:[#allocation96_spill] sm:$0xff] %v6359_v10 }
 0x22a   : > { %7760 = vst [vmem:[#allocation13_spill] sm:$0xff] %v6350_v58  ;;  %v606_v28 = vadd.f32 %v6158_v47, %v557_v26  ;;  %v6362_v6 = vsel %vm1978_vm8, %v2770_v3, %v2771_v13  ;;  %v6365_v30 = vsel %vm1978_vm8, %v2496_v53, %v2497_v17  ;;  %v6368_v31 = vsel %vm1978_vm8, %v2499_v42, %v2500_v37 }
 0x22b   : > { %v652_v44 = vsel %vm651_vm3, %v7763_v12, %v7762_v25  ;;  %v6376_v34 = vsel %vm1978_vm8, %v2537_v15, %v2538_v51  ;;  %v2805_v47 = vrot.slane %v2791_v0, 2  ;;  %v2534_v3 = vrot.slane %v6339_v50, 2  ;;  %2238 = vrot.lane.b32.xlu0 %v6239_v62, %s4197_s15  ;;  %v6395_v0 = vld [vmem:[#allocation2] sm:$0xfc] }
 0x22c   : > { %v656_v13 = vadd.f32 %v652_v44, %v605_v18  ;;  %v1349_v5 = vstv %s6319_s27  ;;  %v6383_v24 = vsel %vm1978_vm8, %v2767_v41, %v2768_v40  ;;  %v2793_v23 = vmul.f32 %v6385_v21, %v6331_v57  ;;  %v1295_v51 = vpop.permute.xlu0 %1294  ;;  %2470 = vrot.lane.b32.xlu1 %v6242_v43, %s4198_s17  ;;  %s6874_s27 = sld [smem:[#allocation3 + $0x18]] }
 0x22d   : > { %v653_v53 = vsel %vm651_vm3, %v7762_v25, %v7764_v55  ;;  %v1297_v17 = vpop.permute.xlu1 %1296  ;;  %v2806_v42 = vrot.slane %v2794_v22, 2  ;;  %v2535_v26 = vrot.slane %v2523_v45, 2  ;;  %v2802_v37 = vrot.slane %v2790_v39, 2  ;;  %v7770_v55 = vld [vmem:[#allocation53_spill] sm:$0xff] }
 0x22e   : > { %v657_v15 = vadd.f32 %v653_v53, %v606_v28  ;;  %v1301_v62 = vsel %vm432_vm0, %v1297_v17, %v1299_v59  ;;  %v2519_v50 = vmul.f32 %v6395_v0, %v6299_v35  ;;  %v2522_v18 = vmul.f32 %v6385_v21, %v6299_v35 }
 0x22f   : > { %v1305_v41 = vadd.f32 %v1301_v62, %v5962_v2  ;;  %v1351_v40 = vmul.f32 %v1349_v5, %v5695_v1  ;;  %v1300_v22 = vsel %vm432_vm0, %v1295_v51, %v1297_v17  ;;  %v6407_v45 = vstv %s6341_s28  ;;  %2743 = vrot.lane.b32.xlu0 %v6254_v19, %s4199_s24  ;;  %v7771_v17 = vld [vmem:[#allocation52_spill] sm:$0xff]  ;;  %s6902_s28 = sld [smem:[#allocation3 + $0x1a]] }
 0x230   : > { %v775_v59 = vadd.f32 %v6054_v46, %v656_v13  ;;  %v1350_v39 = vmul.f32 %v1349_v5, %v5691_v49  ;;  %v1304_v28 = vadd.f32 %v1300_v22, %v5971_v11  ;;  %v2803_v35 = vrot.slane %v2793_v23, 2  ;;  %v6433_v44 = vpop.permute.xlu0 %2602  ;;  %v7769_v23 = vld [vmem:[#allocation8_spill] sm:$0xff]  ;;  %2236 = vrot.lane.b32.xlu1 %v6257_v60, %s4197_s15  ;;  %v7776_v22 = vld [vmem:[#allocation18_spill] sm:$0xff] }
 0x231   : > { %v6414_v2 = vadd.f32 %v1351_v40, %v1305_v41  ;;  %v6416_v25 = vpop.permute.xlu1 %2367  ;;  %v6420_v12 = vmul.f32 %v5593_v14, %v6407_v45  ;;  %v6424_v43 = vmul.f32 %v5597_v56, %v6407_v45  ;;  %v6428_v46 = vmul.f32 %v5593_v14, %v6331_v57  ;;  %7768 = vst [vmem:[#allocation97_spill] sm:$0xff] %v6433_v44  ;;  %v7775_v40 = vld [vmem:[#allocation35_spill] sm:$0xff] }
 0x232   : > { %7766 = vst [vmem:[#allocation16_spill] sm:$0xff] %v6416_v25  ;;  %v776_v11 = vadd.f32 %v6059_v7, %v657_v15  ;;  %v6431_v19 = vadd.f32 %v1350_v39, %v1304_v28  ;;  %v6436_v13 = vsel %vm1978_vm8, %v2805_v47, %v2806_v42  ;;  %v2531_v5 = vrot.slane %v2519_v50, 2  ;;  %v7778_v39 = vld [vmem:[#allocation20_spill] sm:$0xff] }
 0x233   : > { %7765 = vst [vmem:[#allocation31_spill] sm:$0xff] %v6414_v2  ;;  %v1360_v53 = vsel %vm594_vm15, %v7770_v55, %v7769_v23  ;;  %v1361_v62 = vsel %vm594_vm15, %v7769_v23, %v7771_v17  ;;  %v2532_v14 = vrot.slane %v2522_v18, 2  ;;  %v6448_v7 = vmul.f32 %v5597_v56, %v6331_v57  ;;  %2741 = vrot.lane.b32.xlu0 %v6266_v63, %s4199_s24  ;;  %v7780_v55 = vld [vmem:[#allocation19_spill] sm:$0xff]  ;;  %v7791_v56 = vld [vmem:[#allocation69_spill] sm:$0xff] }
 0x234   : > { %7767 = vst [vmem:[#allocation14_spill] sm:$0xff] %v6431_v19  ;;  %v824_v47 = vadd.f32 %v6101_v52, %v775_v59  ;;  %v6456_v42 = vsel %vm1978_vm8, %v2534_v3, %v2535_v26  ;;  %v6459_v15 = vsel %vm1978_vm8, %v2802_v37, %v2803_v35  ;;  %v6463_v60 = vmul.f32 %v5571_v36, %v6407_v45  ;;  %v6486_v41 = vpop.permute.xlu0 %2096  ;;  %v7777_v59 = vld [vmem:[#allocation41_spill] sm:$0xff]  ;;  %v7788_v35 = vld [vmem:[#allocation88_spill] sm:$0xff] }
 0x235   : > { %v6465_v51 = vpop.permute.xlu1 %2552  ;;  %v6472_v63 = vmul.f32 %v7690_v29, %v6407_v45  ;;  %v825_v3 = vadd.f32 %v6106_v33, %v776_v11  ;;  %v6477_v37 = vsel %vm4745_vm10, %v1360_v53, 0.0  ;;  %v6481_v50 = vsel %vm4758_vm14, %v1361_v62, 0.0  ;;  %2234 = vrot.lane.b32.xlu1 %v6269_v54, %s4197_s15  ;;  %v7779_v11 = vld [vmem:[#allocation17_spill] sm:$0xff]  ;;  %s6510_s15 = sld [smem:[#allocation3 + $0x45]]  ;;  %v7782_v62 = vld [vmem:[#allocation34_spill] sm:$0xff]  ;;  %v7787_v54 = vld [vmem:[#allocation91_spill] sm:$0xff] }
 0x236   : > { %7772 = vst [vmem:[#allocation8_spill] sm:$0xff] %v6465_v51  ;;  %v1379_v18 = vstv %s6392_s29  ;;  %v453_v29 = vsel %vm432_vm0, %v7776_v22, %v7775_v40  ;;  %v871_v33 = vsel %vm870_vm5, %v7778_v39, %v7777_v59  ;;  %v6497_v28 = vsel %vm1978_vm8, %v2531_v5, %v2532_v14  ;;  %v7781_v5 = vld [vmem:[#allocation6_spill] sm:$0xff]  ;;  %v7802_v19 = vld [vmem:[#allocation45_spill] sm:$0xff]  ;;  %s6913_s29 = sld [smem:[#allocation3 + $0x29]] }
 0x237   : > { %v454_v23 = vsel %vm432_vm0, %v7775_v40, %v7779_v11  ;;  %v872_v53 = vsel %vm870_vm5, %v7777_v59, %v7780_v55  ;;  %v875_v17 = vadd.f32 %v871_v33, %v824_v47  ;;  %2780 = vrot.lane.b32.xlu0 %v6272_v8, %s4199_s24  ;;  %v1619_v14 = vsel %vm764_vm1, %v7782_v62, %v7781_v5  ;;  %v7783_v40 = vld [vmem:[#allocation57_spill] sm:$0xff]  ;;  %v7785_v8 = vld [vmem:[#allocation43_spill] sm:$0xff] }
 0x238   : > { %v1618_v22 = vsel %vm764_vm1, %v7783_v40, %v7782_v62  ;;  %v1380_v47 = vmul.f32 %v1379_v18, %v6477_v37  ;;  %v1381_v59 = vmul.f32 %v1379_v18, %v6481_v50  ;;  %v457_v33 = vadd.f32 %v453_v29, %v7785_v8  ;;  %v7786_v55 = vld [vmem:[#allocation93_spill] sm:$0xff]  ;;  %v6530_v32 = vpop.permute.xlu0 %2600  ;;  %v7790_v62 = vld [vmem:[#allocation44_spill] sm:$0xff] }
 0x239   : > { %v6521_v39 = vpop.permute.xlu1 %2365  ;;  %v876_v11 = vadd.f32 %v872_v53, %v825_v3  ;;  %v1501_v57 = vsel %vm651_vm3, %v7787_v54, %v7786_v55  ;;  %v1502_v5 = vsel %vm651_vm3, %v7786_v55, %v7788_v35  ;;  %7789 = vst [vmem:[#allocation52_spill] sm:$0xff] %v6530_v32  ;;  %v6533_v40 = vadd.f32 %v454_v23, %v7790_v62  ;;  %v7794_v3 = vld [vmem:[#allocation49_spill] sm:$0xff]  ;;  %v7795_v54 = vld [vmem:[#allocation47_spill] sm:$0xff] }
 0x23a   : > { %7784 = vst [vmem:[#allocation53_spill] sm:$0xff] %v6521_v39  ;;  %v7792_v18 = vstv %s5816_s11  ;;  %v1382_v29 = vadd.f32 %v1380_v47, %v7793_v20  ;;  %v1383_v53 = vadd.f32 %v1381_v59, %v7794_v3  ;;  %2745 = vrot.lane.b32.xlu1 %v6283_v27, %s4199_s24  ;;  %v994_v8 = vadd.f32 %v7795_v54, %v875_v17  ;;  %v7798_v20 = vld [vmem:[#allocation56_spill] sm:$0xff]  ;;  %v7803_v2 = vld [vmem:[#allocation89_spill] sm:$0xff] }
 0x23b   : > { %v1062_v52 = vmul.f32 %v7792_v18, %v7791_v56  ;;  %v6545_v55 = vsel %vm4754_vm13, %v1619_v14, 0.0  ;;  %v6549_v62 = vsel %vm4741_vm9, %v1618_v22, 0.0  ;;  %v1637_v18 = vstv %s6451_s12  ;;  %2509 = vrot.lane.b32.xlu0 %v6347_v16, %s4198_s17  ;;  %v7799_v47 = vld [vmem:[#allocation60_spill] sm:$0xff]  ;;  %v7804_v16 = vld [vmem:[#allocation70_spill] sm:$0xff]  ;;  %s6943_s12 = sld [smem:[#allocation3 + $0x63]] }
 0x23c   : > { %v1666_v59 = vsel %vm813_vm2, %v7799_v47, %v7798_v20  ;;  %v7800_v3 = vld [vmem:[#allocation64_spill] sm:$0xff]  ;;  %v1505_v17 = vadd.f32 %v1501_v57, %v1382_v29  ;;  %v1506_v14 = vadd.f32 %v1502_v5, %v1383_v53  ;;  %v6563_v22 = vadd.f32 %v7802_v19, %v457_v33  ;;  %v1806_v47 = vpop.permute.xlu0 %1805 }
 0x23d   : > { %v1667_v27 = vsel %vm813_vm2, %v7798_v20, %v7800_v3  ;;  %v6560_v54 = vpop.permute.xlu1 %2604  ;;  %v995_v38 = vadd.f32 %v7803_v2, %v876_v11  ;;  %v7805_v32 = vstv %s5816_s11  ;;  %v1385_v44 = vstv %s6484_s7  ;;  %v7806_v20 = vld [vmem:[#allocation22_spill] sm:$0xff]  ;;  %v7807_v57 = vld [vmem:[#allocation32_spill] sm:$0xff]  ;;  %v7809_v11 = vld [vmem:[#allocation79_spill] sm:$0xff]  ;;  %s6595_s11 = sld [smem:[#allocation3 + $0x60]]  ;;  %s6958_s7 = sld [smem:[#allocation3 + $0x2a]] }
 0x23e   : > { %7801 = vst [vmem:[#allocation37_spill] sm:$0xff] %v6560_v54  ;;  %v1063_v10 = vmul.f32 %v7805_v32, %v7804_v16  ;;  %v1064_v39 = vadd.f32 %v1062_v52, %v994_v8  ;;  %v1125_v5 = vsel %vm432_vm0, %v7807_v57, %v7806_v20  ;;  %v1638_v29 = vmul.f32 %v1637_v18, %v6549_v62  ;;  %v7808_v33 = vld [vmem:[#allocation72_spill] sm:$0xff] }
 0x23f   : > { %v1639_v53 = vmul.f32 %v1637_v18, %v6545_v55  ;;  %2778 = vrot.lane.b32.xlu1 %v6362_v6, %s4199_s24  ;;  %v6581_v2 = vsel %vm4745_vm10, %v1666_v59, 0.0  ;;  %v6585_v32 = vsel %vm4758_vm14, %v1667_v27, 0.0  ;;  %v1643_v19 = vstv %s6506_s25  ;;  %2505 = vrot.lane.b32.xlu0 %v6365_v30, %s4198_s17  ;;  %v7810_v27 = vld [vmem:[#allocation94_spill] sm:$0xff]  ;;  %s6975_s25 = sld [smem:[#allocation3 + $0x2c]] }
 0x240   : > { %v1685_v52 = vstv %s6510_s15  ;;  %v1924_v8 = vsel %vm983_vm4, %v7809_v11, %v7808_v33  ;;  %v1640_v18 = vadd.f32 %v1638_v29, %v1505_v17  ;;  %v1387_v3 = vmul.f32 %v1385_v44, %v6481_v50  ;;  %v1802_v11 = vpop.permute.xlu0 %1801  ;;  %v7812_v17 = vld [vmem:[#allocation65_spill] sm:$0xff]  ;;  %s6982_s15 = sld [smem:[#allocation3 + $0x95]] }
 0x241   : > { %v1641_v6 = vadd.f32 %v1639_v53, %v1506_v14  ;;  %v2099_v59 = vpop.permute.xlu1 %2098  ;;  %v1129_v57 = vadd.f32 %v1125_v5, %v1064_v39  ;;  %v1537_v54 = vsel %vm651_vm3, %v6251_v4, %v7810_v27  ;;  %v1386_v30 = vmul.f32 %v1385_v44, %v6477_v37  ;;  %v7813_v44 = vld [vmem:[#allocation25_spill] sm:$0xff] }
 0x242   : > { %v6603_v25 = vsel %vm432_vm0, %v6486_v41, %v2099_v59  ;;  %v1389_v29 = vadd.f32 %v1387_v3, %v7812_v17  ;;  %v1536_v14 = vsel %vm651_vm3, %v6325_v61, %v6251_v4  ;;  %v1686_v39 = vmul.f32 %v1685_v52, %v6581_v2  ;;  %v7815_v17 = vld [vmem:[#allocation66_spill] sm:$0xff] }
 0x243   : > { %7811 = vst [vmem:[#allocation39_spill] sm:$0xff] %v6603_v25  ;;  %2507 = vrot.lane.b32.xlu1 %v6368_v31, %s4198_s17  ;;  %v1687_v5 = vmul.f32 %v1685_v52, %v6585_v32  ;;  %v1126_v53 = vsel %vm432_vm0, %v7806_v20, %v7813_v44  ;;  %v7814_v59 = vstv %s5818_s19  ;;  %v6621_v3 = vsel %vm4741_vm9, %v1924_v8, 0.0  ;;  %2544 = vrot.lane.b32.xlu0 %v6376_v34, %s4198_s17 }
 0x244   : > { %v1320_v27 = vmul.f32 %v7814_v59, %v5691_v49  ;;  %v1388_v4 = vadd.f32 %v1386_v30, %v7815_v17  ;;  %v1541_v61 = vadd.f32 %v1537_v54, %v1389_v29  ;;  %v1645_v31 = vmul.f32 %v1643_v19, %v6545_v55  ;;  %v1841_v51 = vpop.permute.xlu0 %1840  ;;  %v7816_v54 = vld [vmem:[#allocation46_spill] sm:$0xff] }
 0x245   : > { %v1804_v52 = vpop.permute.xlu1 %1803  ;;  %v1688_v25 = vadd.f32 %v1686_v39, %v1640_v18  ;;  %v1689_v58 = vadd.f32 %v1687_v5, %v1641_v6  ;;  %v7551_v44 = vstv %s6570_s9  ;;  %v563_v18 = vadd.f32 %v7816_v54, %v6533_v40  ;;  %v7817_v6 = vld [vmem:[#allocation42_spill] sm:$0xff] }
 0x246   : > { %v1540_v20 = vadd.f32 %v1536_v14, %v1388_v4  ;;  %v1807_v59 = vsel %vm870_vm5, %v1802_v11, %v1804_v52  ;;  %v1808_v8 = vsel %vm870_vm5, %v1804_v52, %v1806_v47  ;;  %v1322_v9 = vadd.f32 %v1320_v27, %v1129_v57  ;;  %v7818_v11 = vld [vmem:[#allocation23_spill] sm:$0xff]  ;;  %v7820_v27 = vld [vmem:[#allocation28_spill] sm:$0xff] }
 0x247   : > { %v1811_v30 = vadd.f32 %v1807_v59, %v1688_v25  ;;  %v6630_v17 = vadd.f32 %v1808_v8, %v1689_v58  ;;  %v1944_v34 = vmul.f32 %v7551_v44, %v6621_v3  ;;  %2776 = vrot.lane.b32.xlu1 %v6383_v24, %s4199_s24  ;;  %v672_v47 = vsel %vm651_vm3, %v7818_v11, %v7817_v6  ;;  %v7821_v4 = vld [vmem:[#allocation59_spill] sm:$0xff] }
 0x248   : > { %v1065_v29 = vadd.f32 %v1063_v10, %v995_v38  ;;  %v1644_v25 = vmul.f32 %v1643_v19, %v6549_v62  ;;  %2813 = vrot.lane.b32.xlu0 %v6436_v13, %s4199_s24  ;;  %v7819_v58 = vstv %s5943_s23  ;;  %v1647_v24 = vadd.f32 %v1645_v31, %v1541_v61  ;;  %v6660_v13 = vpop.permute.xlu0 %1567  ;;  %v7822_v19 = vld [vmem:[#allocation48_spill] sm:$0xff]  ;;  %v7823_v61 = vld [vmem:[#allocation21_spill] sm:$0xff] }
 0x249   : > { %v1368_v57 = vmul.f32 %v7819_v58, %v6477_v37  ;;  %v6650_v14 = vadd.f32 %v1944_v34, %v1811_v30  ;;  %v2095_v39 = vpop.permute.xlu1 %2094  ;;  %v1691_v5 = vstv %s6595_s11  ;;  %v1431_v52 = vsel %vm651_vm3, %v7821_v4, %v7820_v27  ;;  %s6987_s11 = sld [smem:[#allocation3 + $0x65]] }
 0x24a   : > { %v1130_v40 = vadd.f32 %v1126_v53, %v1065_v29  ;;  %v1646_v38 = vadd.f32 %v1644_v25, %v1540_v20  ;;  %v6658_v10 = vsel %vm432_vm0, %v2095_v39, %v6486_v41  ;;  %v611_v59 = vadd.f32 %v7822_v19, %v6563_v22  ;;  %v7824_v20 = vld [vmem:[#allocation92_spill] sm:$0xff] }
 0x24b   : > { %v673_v31 = vsel %vm651_vm3, %v7817_v6, %v7823_v61  ;;  %v1370_v8 = vadd.f32 %v1368_v57, %v1322_v9  ;;  %2542 = vrot.lane.b32.xlu1 %v6456_v42, %s4198_s17  ;;  %v1693_v53 = vmul.f32 %v1691_v5, %v6585_v32  ;;  %v612_v30 = vadd.f32 %v7824_v20, %v563_v18 }
 0x24c   : > { %v7825_v41 = vstv %s5818_s19  ;;  %2811 = vrot.lane.b32.xlu0 %v6459_v15, %s4199_s24  ;;  %v1692_v22 = vmul.f32 %v1691_v5, %v6581_v2  ;;  %v7826_v9 = vrot.slane %v6424_v43, 2  ;;  %v7827_v42 = vrot.slane %v6420_v12, 2  ;;  %v1837_v43 = vpop.permute.xlu0 %1836  ;;  %s6689_s19 = sld [smem:[#allocation3 + $0x12]] }
 0x24d   : > { %v1321_v34 = vmul.f32 %v7825_v41, %v5695_v1  ;;  %v676_v6 = vadd.f32 %v672_v47, %v611_v59  ;;  %v1435_v18 = vadd.f32 %v1431_v52, %v1370_v8  ;;  %v1839_v11 = vpop.permute.xlu1 %1838  ;;  %v1695_v29 = vadd.f32 %v1693_v53, %v1647_v24  ;;  %v7832_v53 = vld [vmem:[#allocation11_spill] sm:$0xff] }
 0x24e   : > { %v2845_v54 = vsel %vm1978_vm8, %v7827_v42, %v7826_v9  ;;  %v2841_v25 = vrot.slane %v6472_v63, 2  ;;  %v677_v58 = vadd.f32 %v673_v31, %v612_v30  ;;  %v1843_v15 = vsel %vm870_vm5, %v1839_v11, %v1841_v51 }
 0x24f   : > { %v1323_v57 = vadd.f32 %v1321_v34, %v1130_v40  ;;  %v1694_v39 = vadd.f32 %v1692_v22, %v1646_v38  ;;  %v7828_v12 = vstv %s5945_s30  ;;  %v7550_v47 = vstv %s6637_s8  ;;  %2540 = vrot.lane.b32.xlu1 %v6497_v28, %s4198_s17  ;;  %v7830_v28 = vld [vmem:[#allocation24_spill] sm:$0xff]  ;;  %s6724_s17 = sld [smem:[#allocation3 + $0x24]] }
 0x250   : > { %v1626_v5 = vmul.f32 %v7828_v12, %v6549_v62  ;;  %v6692_v4 = vadd.f32 %v1843_v15, %v1695_v29  ;;  %v1842_v24 = vsel %vm870_vm5, %v1837_v43, %v1839_v11  ;;  %v7829_v63 = vstv %s5943_s23  ;;  %2850 = vrot.lane.b32.xlu0 %v2845_v54, %s4199_s24  ;;  %v6728_v22 = vpop.permute.xlu0 %2862  ;;  %v7836_v54 = vld [vmem:[#allocation54_spill] sm:$0xff]  ;;  %v7838_v11 = vld [vmem:[#allocation7_spill] sm:$0xff]  ;;  %s6744_s23 = sld [smem:[#allocation3 + $0x26]] }
 0x251   : > { %v1369_v51 = vmul.f32 %v7829_v63, %v6481_v50  ;;  %v1950_v40 = vmul.f32 %v7550_v47, %v6621_v3  ;;  %v1846_v52 = vadd.f32 %v1842_v24, %v1694_v39  ;;  %v2825_v38 = vmul.f32 %v6395_v0, %v6407_v45  ;;  %v2908_v0 = vld [vmem:[%s6710_s16] sm:$0xff] }
 0x252   : > { %v1432_v19 = vsel %vm651_vm3, %v7820_v27, %v7830_v28  ;;  %v1628_v59 = vadd.f32 %v1626_v5, %v1435_v18  ;;  %v7831_v61 = vstv %s6293_s21  ;;  %v2828_v8 = vmul.f32 %v6385_v21, %v6407_v45  ;;  %v7837_v21 = vld [vmem:[#allocation87_spill] sm:$0xff]  ;;  %v7843_v5 = vld [vmem:[#allocation82_spill] sm:$0xff] }
 0x253   : > { %v1674_v31 = vmul.f32 %v7831_v61, %v6581_v2  ;;  %v7833_v20 = vstv %s5501_s6  ;;  %v1371_v41 = vadd.f32 %v1369_v51, %v1323_v57  ;;  %v6726_v34 = vadd.f32 %v1950_v40, %v1846_v52  ;;  %v7840_v57 = vld [vmem:[#allocation9_spill] sm:$0xff]  ;;  %s6753_s6 = sld [smem:[#allocation3 + $0x78]]  ;;  %v7845_v51 = vld [vmem:[#allocation76_spill] sm:$0xff]  ;;  %v7846_v40 = vld [vmem:[#allocation83_spill] sm:$0xff] }
 0x254   : > { %v828_v30 = vmul.f32 %v7833_v20, %v7832_v53  ;;  %v7834_v27 = vrot.slane %v6448_v7, 2  ;;  %v7835_v9 = vrot.slane %v6428_v46, 2  ;;  %v781_v18 = vadd.f32 %v7836_v54, %v676_v6  ;;  %v7842_v7 = vld [vmem:[#allocation75_spill] sm:$0xff]  ;;  %2925 = vperm.xlu0 %4146, %v2908_v0   ;;  %v7848_v53 = vld [vmem:[#allocation30_spill] sm:$0xff] }
 0x255   : > { %v782_v45 = vadd.f32 %v7837_v21, %v677_v58  ;;  %v7839_v29 = vmov %v7833_v20  ;;  %v7841_v39 = vstv %s5550_s10  ;;  %v1436_v12 = vadd.f32 %v1432_v19, %v1371_v41  ;;  %v7847_v61 = vld [vmem:[#allocation51_spill] sm:$0xff]  ;;  %v7852_v21 = vld [vmem:[#allocation73_spill] sm:$0xff] }
 0x256   : > { %v2810_v42 = vsel %vm1978_vm8, %v7835_v9, %v7834_v27  ;;  %v829_v15 = vmul.f32 %v7839_v29, %v7838_v11  ;;  %v998_v43 = vmul.f32 %v7841_v39, %v7840_v57  ;;  %v1931_v46 = vstv %s6674_s22  ;;  %v6772_v27 = vpop.permute.xlu0 %1602  ;;  %v7853_v57 = vld [vmem:[#allocation61_spill] sm:$0xff]  ;;  %s6993_s22 = sld [smem:[#allocation3 + $0x96]] }
 0x257   : > { %2815 = vrot.lane.b32.xlu1 %v2810_v42, %s4199_s24  ;;  %v1737_v6 = vsel %vm870_vm5, %v7843_v5, %v7842_v7  ;;  %v7844_v58 = vrot.slane %v6463_v60, 2  ;;  %v1676_v63 = vadd.f32 %v1674_v31, %v1628_v59  ;;  %v1994_v52 = vsel %vm375_vm11, %v7846_v40, %v7845_v51  ;;  %v7849_v60 = vld [vmem:[#allocation27_spill] sm:$0xff] }
 0x258   : > { %v2837_v28 = vrot.slane %v2825_v38, 2  ;;  %v2838_v19 = vrot.slane %v2828_v8, 2  ;;  %v891_v20 = vsel %vm870_vm5, %v7848_v53, %v7847_v61  ;;  %v7850_v41 = vstv %s5945_s30  ;;  %s6790_s30 = sld [smem:[#allocation3 + $0x14]] }
 0x259   : > { %v2842_v24 = vsel %vm1978_vm8, %v7844_v58, %v2841_v25  ;;  %v892_v25 = vsel %vm870_vm5, %v7847_v61, %v7849_v60  ;;  %v1627_v0 = vmul.f32 %v7850_v41, %v6545_v55  ;;  %v7851_v59 = vstv %s6293_s21  ;;  %s6796_s21 = sld [smem:[#allocation3 + $0x15]]  ;;  %v2909_v60 = vld [vmem:[%s6710_s16 + $0x8] sm:$0xff]  ;;  %s7032_s16 = sld [smem:[#allocation3 + $0x98]] }
 0x25a   : > { %v1675_v31 = vmul.f32 %v7851_v59, %v6585_v32  ;;  %v830_v38 = vadd.f32 %v828_v30, %v781_v18  ;;  %v831_v8 = vadd.f32 %v829_v15, %v782_v45  ;;  %v1741_v9 = vadd.f32 %v1737_v6, %v1676_v63  ;;  %v7854_v18 = vld [vmem:[#allocation74_spill] sm:$0xff]  ;;  %v6798_v63 = vpop.permute.xlu0 %2673  ;;  %v7858_v59 = vld [vmem:[#allocation77_spill] sm:$0xff] }
 0x25b   : > { %v2001_v42 = vstv %s6689_s19  ;;  %2848 = vrot.lane.b32.xlu1 %v2842_v24, %s4199_s24  ;;  %v1629_v54 = vadd.f32 %v1627_v0, %v1436_v12  ;;  %v1925_v11 = vsel %vm983_vm4, %v7808_v33, %v7852_v21  ;;  %v6781_v29 = vsel %vm4745_vm10, %v1994_v52, 0.0  ;;  %v7855_v33 = vld [vmem:[#allocation10_spill] sm:$0xff]  ;;  %v7860_v21 = vld [vmem:[#allocation68_spill] sm:$0xff]  ;;  %s7003_s19 = sld [smem:[#allocation3 + $0x2d]] }
 0x25c   : > { %v1995_v39 = vsel %vm375_vm11, %v7845_v51, %v7853_v57  ;;  %v895_v5 = vadd.f32 %v891_v20, %v830_v38  ;;  %v896_v30 = vadd.f32 %v892_v25, %v831_v8  ;;  %v1738_v45 = vsel %vm870_vm5, %v7842_v7, %v7854_v18  ;;  %v7862_v18 = vld [vmem:[#allocation84_spill] sm:$0xff] }
 0x25d   : > { %v1932_v15 = vmul.f32 %v1931_v46, %v6621_v3  ;;  %v7856_v12 = vstv %s5550_s10  ;;  %v1067_v58 = vstv %s6724_s17  ;;  %v1677_v24 = vadd.f32 %v1675_v31, %v1629_v54  ;;  %v7859_v54 = vld [vmem:[#allocation67_spill] sm:$0xff]  ;;  %s6835_s10 = sld [smem:[#allocation3 + $0x93]] }
 0x25e   : > { %v999_v6 = vmul.f32 %v7856_v12, %v7855_v33  ;;  %v2839_v51 = vsel %vm1978_vm8, %v2837_v28, %v2838_v19  ;;  %v6803_v7 = vsel %vm4754_vm13, %v1925_v11, 0.0  ;;  %v6807_v52 = vsel %vm4758_vm14, %v1995_v39, 0.0  ;;  %v7857_v19 = vld [vmem:[#allocation63_spill] sm:$0xff]  ;;  %v6824_v57 = vpop.permute.xlu0 %2858  ;;  %s7048_s17 = sld [smem:[#allocation3 + $0x4b]] }
 0x25f   : > { %v1934_v40 = vadd.f32 %v1932_v15, %v1741_v9  ;;  %v2002_v61 = vmul.f32 %v2001_v42, %v6781_v29  ;;  %2846 = vrot.lane.b32.xlu1 %v2839_v51, %s4199_s24  ;;  %v1325_v53 = vstv %s6744_s23  ;;  %v1742_v20 = vadd.f32 %v1738_v45, %v1677_v24  ;;  %s6832_s24 = sld [smem:[#allocation3 + $0x17]]  ;;  %v7863_v45 = vld [vmem:[#allocation85_spill] sm:$0xff]  ;;  %v7864_v33 = vld [vmem:[#allocation55_spill] sm:$0xff]  ;;  %s7077_s23 = sld [smem:[#allocation3 + $0x7a]] }
 0x260   : > { %v1391_v25 = vstv %s6753_s6  ;;  %v1000_v41 = vadd.f32 %v998_v43, %v895_v5  ;;  %v1001_v0 = vadd.f32 %v999_v6, %v896_v30  ;;  %v1373_v28 = vstv %s6758_s20  ;;  %v6826_v43 = vpop.permute.xlu1 %2913  ;;  %v7861_v30 = vld [vmem:[#allocation81_spill] sm:$0xff]  ;;  %v7865_v6 = vld [vmem:[#allocation12_spill] sm:$0xff]  ;;  %s7098_s6 = sld [smem:[#allocation3 + $0x7b]]  ;;  %s7103_s20 = sld [smem:[#allocation3 + $0x66]] }
 0x261   : > { %v2252_v31 = vsel %vm545_vm12, %v7858_v59, %v7857_v19  ;;  %v1069_v38 = vmul.f32 %v1067_v58, %v7804_v16  ;;  %v1933_v8 = vmul.f32 %v1931_v46, %v6803_v7  ;;  %v2003_v9 = vmul.f32 %v2001_v42, %v6807_v52 }
 0x262   : > { %v2065_v11 = vsel %vm432_vm0, %v7860_v21, %v7859_v54  ;;  %v1068_v39 = vmul.f32 %v1067_v58, %v7791_v56  ;;  %v2004_v5 = vadd.f32 %v2002_v61, %v1934_v40  ;;  %v2300_v16 = vsel %vm594_vm15, %v7862_v18, %v7861_v30  ;;  %v7866_v58 = vld [vmem:[#allocation58_spill] sm:$0xff] }
 0x263   : > { %2928 = vperm.xlu1 %4145, %v2909_v60   ;;  %v1393_v46 = vmul.f32 %v1391_v25, %v6481_v50  ;;  %v1935_v42 = vadd.f32 %v1933_v8, %v1742_v20  ;;  %v2253_v15 = vsel %vm545_vm12, %v7857_v19, %v7863_v45  ;;  %v6842_v56 = vsel %vm4741_vm9, %v2252_v31, 0.0  ;;  %v7867_v40 = vld [vmem:[#allocation86_spill] sm:$0xff]  ;;  %v6859_v31 = vpop.permute.xlu0 %2671 }
 0x264   : > { %v2301_v12 = vsel %vm594_vm15, %v7861_v30, %v7864_v33  ;;  %v1161_v24 = vsel %vm432_vm0, %v7866_v58, %v7865_v6  ;;  %v2259_v51 = vstv %s6790_s30  ;;  %v2066_v61 = vsel %vm432_vm0, %v7859_v54, %v7867_v40  ;;  %v1570_v8 = vpop.permute.xlu1 %1569  ;;  %s7125_s30 = sld [smem:[#allocation3 + $0x32]] }
 0x265   : > { %v2069_v20 = vadd.f32 %v2065_v11, %v2004_v5  ;;  %v2005_v60 = vadd.f32 %v2003_v9, %v1935_v42  ;;  %v6856_v19 = vsel %vm4745_vm10, %v2300_v16, 0.0  ;;  %v2307_v59 = vstv %s6796_s21  ;;  %s7136_s21 = sld [smem:[#allocation3 + $0x7d]] }
 0x266   : > { %v1395_v21 = vadd.f32 %v1393_v46, %v6323_v48  ;;  %v6864_v30 = vsel %vm4754_vm13, %v2253_v15, 0.0  ;;  %v2260_v18 = vmul.f32 %v2259_v51, %v6842_v56  ;;  %v6869_v9 = vsel %vm4758_vm14, %v2301_v12, 0.0 }
 0x267   : > { %v1572_v54 = vsel %vm651_vm3, %v6660_v13, %v1570_v8  ;;  %v1071_v11 = vadd.f32 %v1069_v38, %v1001_v0  ;;  %v1327_v5 = vmul.f32 %v1325_v53, %v5695_v1  ;;  %v2070_v16 = vadd.f32 %v2066_v61, %v2005_v60  ;;  %v6885_v38 = vpop.permute.xlu0 %2404  ;;  %v7868_v61 = vld [vmem:[#allocation40_spill] sm:$0xff] }
 0x268   : > { %v6876_v48 = vadd.f32 %v1572_v54, %v1395_v21  ;;  %v1070_v46 = vadd.f32 %v1068_v39, %v1000_v41  ;;  %v1326_v42 = vmul.f32 %v1325_v53, %v5691_v49  ;;  %v2262_v45 = vadd.f32 %v2260_v18, %v2069_v20  ;;  %v2861_v6 = vpop.permute.xlu1 %2860  ;;  %v7869_v60 = vld [vmem:[#allocation8_spill] sm:$0xff]  ;;  %v7873_v21 = vld [vmem:[#allocation37_spill] sm:$0xff] }
 0x269   : > { %v2308_v15 = vmul.f32 %v2307_v59, %v6856_v19  ;;  %v1165_v33 = vadd.f32 %v1161_v24, %v1071_v11  ;;  %v1375_v12 = vmul.f32 %v1373_v28, %v6481_v50  ;;  %v2261_v0 = vmul.f32 %v2259_v51, %v6864_v30  ;;  %v7870_v24 = vld [vmem:[#allocation13_spill] sm:$0xff]  ;;  %v7871_v8 = vld [vmem:[#allocation16_spill] sm:$0xff]  ;;  %v7875_v11 = vld [vmem:[#allocation71_spill] sm:$0xff] }
 0x26a   : > { %v2309_v1 = vmul.f32 %v2307_v59, %v6869_v9  ;;  %v2565_v40 = vstv %s6832_s24  ;;  %v2558_v41 = vsel %vm764_vm1, %v7869_v60, %v7868_v61  ;;  %v1392_v49 = vmul.f32 %v1391_v25, %v6477_v37  ;;  %v7872_v51 = vld [vmem:[#allocation53_spill] sm:$0xff]  ;;  %v7876_v60 = vld [vmem:[#allocation96_spill] sm:$0xff]  ;;  %s7152_s24 = sld [smem:[#allocation3 + $0x33]] }
 0x26b   : > { %v1397_v53 = vstv %s6835_s10  ;;  %v2263_v39 = vadd.f32 %v2261_v0, %v2070_v16  ;;  %v2559_v20 = vsel %vm764_vm1, %v7868_v61, %v7870_v24  ;;  %v2371_v59 = vsel %vm651_vm3, %v7872_v51, %v7871_v8  ;;  %v7874_v18 = vld [vmem:[#allocation97_spill] sm:$0xff]  ;;  %v7877_v61 = vld [vmem:[#allocation52_spill] sm:$0xff]  ;;  %v6919_v47 = vpop.permute.xlu0 %2131  ;;  %s7159_s10 = sld [smem:[#allocation3 + $0x35]] }
 0x26c   : > { %v2607_v54 = vsel %vm813_vm2, %v7874_v18, %v7873_v21  ;;  %v1160_v25 = vsel %vm432_vm0, %v7875_v11, %v7866_v58  ;;  %v2372_v16 = vsel %vm651_vm3, %v7871_v8, %v7876_v60  ;;  %v2310_v0 = vadd.f32 %v2308_v15, %v2262_v45  ;;  %v1566_v58 = vpop.permute.xlu1 %1565  ;;  %v7878_v11 = vld [vmem:[#allocation15_spill] sm:$0xff] }
 0x26d   : > { %v2606_v24 = vsel %vm813_vm2, %v7877_v61, %v7874_v18  ;;  %v2311_v51 = vadd.f32 %v2309_v1, %v2263_v39  ;;  %v6917_v21 = vsel %vm4741_vm9, %v2558_v41, 0.0  ;;  %v1394_v44 = vadd.f32 %v1392_v49, %v7878_v11 }
 0x26e   : > { %v1399_v8 = vmul.f32 %v1397_v53, %v6481_v50  ;;  %v6925_v45 = vsel %vm4754_vm13, %v2559_v20, 0.0  ;;  %v2375_v15 = vadd.f32 %v2371_v59, %v2310_v0  ;;  %v6929_v18 = vsel %vm4758_vm14, %v2607_v54, 0.0  ;;  %v7879_v54 = vld [vmem:[#allocation31_spill] sm:$0xff] }
 0x26f   : > { %v1571_v1 = vsel %vm651_vm3, %v1566_v58, %v6660_v13  ;;  %v2376_v41 = vadd.f32 %v2372_v16, %v2311_v51  ;;  %v6935_v39 = vsel %vm4745_vm10, %v2606_v24, 0.0  ;;  %v2613_v49 = vstv %s6874_s27  ;;  %v6948_v59 = vpop.permute.xlu0 %2400  ;;  %s7167_s27 = sld [smem:[#allocation3 + $0x4d]] }
 0x270   : > { %v6938_v60 = vadd.f32 %v1571_v1, %v1394_v44  ;;  %v1329_v50 = vadd.f32 %v1327_v5, %v1165_v33  ;;  %v1164_v61 = vadd.f32 %v1160_v25, %v1070_v46  ;;  %v2566_v20 = vmul.f32 %v2565_v40, %v6917_v21  ;;  %v1605_v44 = vpop.permute.xlu1 %1604  ;;  %v7880_v33 = vld [vmem:[#allocation62_spill] sm:$0xff]  ;;  %v7881_v25 = vld [vmem:[#allocation80_spill] sm:$0xff] }
 0x271   : > { %v2864_v36 = vsel %vm983_vm4, %v6824_v57, %v2861_v6  ;;  %v2567_v13 = vmul.f32 %v2565_v40, %v6925_v45  ;;  %v2865_v26 = vsel %vm983_vm4, %v2861_v6, %v6728_v22  ;;  %v1401_v5 = vadd.f32 %v1399_v8, %v7879_v54  ;;  %v7882_v54 = vld [vmem:[#allocation50_spill] sm:$0xff] }
 0x272   : > { %v2615_v46 = vmul.f32 %v2613_v49, %v6929_v18  ;;  %v1467_v57 = vsel %vm651_vm3, %v7881_v25, %v7880_v33  ;;  %v2568_v16 = vadd.f32 %v2566_v20, %v2375_v15  ;;  %v2614_v0 = vmul.f32 %v2613_v49, %v6935_v39 }
 0x273   : > { %v1607_v40 = vsel %vm651_vm3, %v6772_v27, %v1605_v44  ;;  %v2569_v22 = vadd.f32 %v2567_v13, %v2376_v41  ;;  %v6962_v6 = vsel %vm4741_vm9, %v2864_v36, 0.0  ;;  %v2871_v51 = vstv %s6902_s28  ;;  %v6980_v41 = vpop.permute.xlu0 %2166  ;;  %s7171_s28 = sld [smem:[#allocation3 + $0x4e]] }
 0x274   : > { %v6964_v24 = vadd.f32 %v1607_v40, %v1401_v5  ;;  %v1328_v58 = vadd.f32 %v1326_v42, %v1164_v61  ;;  %v1377_v11 = vadd.f32 %v1375_v12, %v1329_v50  ;;  %v6969_v8 = vsel %vm4754_vm13, %v2865_v26, 0.0  ;;  %v2676_v49 = vpop.permute.xlu1 %2675  ;;  %v7883_v5 = vld [vmem:[#allocation26_spill] sm:$0xff] }
 0x275   : > { %v1631_v15 = vstv %s6913_s29  ;;  %v1374_v1 = vmul.f32 %v1373_v28, %v6477_v37  ;;  %v2677_v23 = vsel %vm870_vm5, %v6859_v31, %v6798_v63  ;;  %v2617_v42 = vadd.f32 %v2615_v46, %v2569_v22  ;;  %v7884_v46 = vld [vmem:[#allocation14_spill] sm:$0xff]  ;;  %s7187_s29 = sld [smem:[#allocation3 + $0x7e]] }
 0x276   : > { %v1471_v12 = vadd.f32 %v1467_v57, %v1377_v11  ;;  %v2616_v50 = vadd.f32 %v2614_v0, %v2568_v16  ;;  %v2678_v35 = vsel %vm870_vm5, %v6798_v63, %v2676_v49  ;;  %v2872_v28 = vmul.f32 %v2871_v51, %v6962_v6 }
 0x277   : > { %v1398_v61 = vmul.f32 %v1397_v53, %v6477_v37  ;;  %v2682_v20 = vadd.f32 %v2678_v35, %v2617_v42  ;;  %v2873_v31 = vmul.f32 %v2871_v51, %v6969_v8  ;;  %v1633_v36 = vmul.f32 %v1631_v15, %v6545_v55  ;;  %v7000_v37 = vpop.permute.xlu0 %1873  ;;  %v7886_v42 = vld [vmem:[#allocation90_spill] sm:$0xff] }
 0x278   : > { %v1376_v13 = vadd.f32 %v1374_v1, %v1328_v58  ;;  %v2681_v26 = vadd.f32 %v2677_v23, %v2616_v50  ;;  %v2019_v44 = vstv %s6943_s12  ;;  %v1466_v63 = vsel %vm651_vm3, %v7882_v54, %v7881_v25  ;;  %v1601_v53 = vpop.permute.xlu1 %1600  ;;  %s7195_s12 = sld [smem:[#allocation3 + $0x68]] }
 0x279   : > { %vm2918_vm6 = vcmp.eq.s32.totalorder %v7883_v5, %v6826_v43  ;;  %v1400_v33 = vadd.f32 %v1398_v61, %v7884_v46  ;;  %v2875_v57 = vadd.f32 %v2873_v31, %v2682_v20  ;;  %v1635_v16 = vadd.f32 %v1633_v36, %v1471_v12  ;;  %v7887_v12 = vld [vmem:[#allocation78_spill] sm:$0xff] }
 0x27a   : > { %v1606_v0 = vsel %vm651_vm3, %v1601_v53, %v6772_v27  ;;  %v2874_v40 = vadd.f32 %v2872_v28, %v2681_v26  ;;  %vm2942_vm7 = vcmask 64512   ;;  %v1679_v25 = vstv %s6958_s7  ;;  %s7204_s7 = sld [smem:[#allocation3 + $0x50]] }
 0x27b   : > { %v1610_v22 = vadd.f32 %v1606_v0, %v1400_v33  ;;  %2949 = vmatprep.subr.mxu1 %v2875_v57  ;;  %v2020_v51 = vmul.f32 %v2019_v44, %v6781_v29  ;;  %v1470_v58 = vadd.f32 %v1466_v63, %v1376_v13  ;;  %v1681_v11 = vmul.f32 %v1679_v25, %v6585_v32  ;;  %v2165_v28 = vpop.permute.xlu0 %2164 }
 0x27c   : > { %v7885_v1 = vmov 0.0   ;;  %2950 = vmatpush1.msra.mxu1 %v2874_v40  ;;  %v1632_v23 = vmul.f32 %v1631_v15, %v6549_v62  ;;  %v1937_v49 = vstv %s6975_s25  ;;  %v1773_v50 = vsel %vm870_vm5, %v7887_v12, %v7886_v42  ;;  %v7028_v61 = vpop.permute.xlu1 %2402  ;;  %s7211_s25 = sld [smem:[#allocation3 + $0x80]] }
 0x27d   : > { %v7020_v27 = vsel %vm2918_vm6, 1.0, %v7885_v1  ;;  %v2022_v35 = vadd.f32 %v2020_v51, %v6726_v34  ;;  %v1683_v43 = vadd.f32 %v1681_v11, %v1635_v16  ;;  %v1655_v20 = vstv %s6982_s15  ;;  %s7237_s15 = sld [smem:[#allocation3 + $0x81]] }
 0x27e   : > { %4055 = vmatmul.mubr.msk.f32.vlgmr.msra.gmra.mrb[0].mxu1 %vm2942_vm7, %v7020_v27  ;;  %v2277_v31 = vstv %s6987_s11  ;;  %v2170_v15 = vsel %vm432_vm0, %v2165_v28, %v6980_v41  ;;  %v7888_v34 = vstv %s6570_s9  ;;  %v1656_v13 = vmul.f32 %v1655_v20, %v6549_v62  ;;  %s7061_s9 = sld [smem:[#allocation3 + $0x2f]]  ;;  %s7217_s11 = sld [smem:[#allocation3 + $0x69]] }
 0x27f   : > { %3019 = vmatprep.mubr.f32.mxu1 %v7885_v1  ;;  %v1945_v36 = vmul.f32 %v7888_v34, %v6803_v7  ;;  %v2278_v26 = vmul.f32 %v2277_v31, %v6842_v56  ;;  %v2174_v54 = vadd.f32 %v2170_v15, %v2022_v35  ;;  %v1634_v63 = vadd.f32 %v1632_v23, %v1470_v58  ;;  %v7055_v40 = vpop.permute.xlu0 %1908  ;;  %v7890_v34 = vld [vmem:[#allocation95_spill] sm:$0xff] }
 0x280   : > { %v1777_v53 = vadd.f32 %v1773_v50, %v1683_v43  ;;  %v1703_v46 = vstv %s6993_s22  ;;  %v1680_v33 = vmul.f32 %v1679_v25, %v6581_v2  ;;  %v1658_v16 = vadd.f32 %v1656_v13, %v1610_v22  ;;  %v2917_v51 = vpop.permute.xlu1 %2916  ;;  %s7254_s22 = sld [smem:[#allocation3 + $0x99]] }
 0x281   : > { %v1947_v57 = vadd.f32 %v1945_v36, %v6630_v17  ;;  %v7053_v0 = vadd.f32 %v2278_v26, %v2174_v54  ;;  %v1939_v11 = vmul.f32 %v1937_v49, %v6803_v7  ;;  %v2007_v42 = vstv %s7003_s19  ;;  %s7269_s19 = sld [smem:[#allocation3 + $0x9b]] }
 0x282   : > { %vm2919_vm9 = vcmp.eq.s32.totalorder %v7883_v5, %v2917_v51  ;;  %v2013_v58 = vstv %s7007_s13  ;;  %v1704_v17 = vmul.f32 %v1703_v46, %v6581_v2  ;;  %v2271_v22 = vstv %s7013_s14  ;;  %s7286_s13 = sld [smem:[#allocation3 + $0x9c]]  ;;  %s7300_s14 = sld [smem:[#allocation3 + $0x6b]] }
 0x283   : > { %v7066_v25 = vsel %vm2919_vm9, 1.0, %v7885_v1  ;;  %v2015_v23 = vmul.f32 %v2013_v58, %v6807_v52  ;;  %v1941_v50 = vadd.f32 %v1939_v11, %v1777_v53  ;;  %v1682_v35 = vadd.f32 %v1680_v33, %v1634_v63  ;;  %v1907_v54 = vpop.permute.xlu0 %1906 }
 0x284   : > { %v2009_v28 = vmul.f32 %v2007_v42, %v6807_v52  ;;  %v7889_v43 = vstv %s6637_s8  ;;  %4056 = vmatmul.mubr.msk.f32.gmra.mrb[2].mxu1 %vm2942_vm7, %v7066_v25  ;;  %v1772_v36 = vsel %vm870_vm5, %v7890_v34, %v7887_v12  ;;  %v1706_v13 = vadd.f32 %v1704_v17, %v1658_v16  ;;  %v2134_v63 = vpop.permute.xlu1 %2133  ;;  %s7094_s8 = sld [smem:[#allocation3 + $0x30]] }
 0x285   : > { %v1951_v15 = vmul.f32 %v7889_v43, %v6803_v7  ;;  %v7552_v26 = vstv %s7032_s16  ;;  %v2017_v53 = vadd.f32 %v2015_v23, %v1947_v57  ;;  %3103 = vmatprep.mubr.f32.mxu1 %v7885_v1  ;;  %v1912_v51 = vsel %vm870_vm5, %v1907_v54, %v7055_v40 }
 0x286   : > { %v1962_v33 = vmul.f32 %v7552_v26, %v6621_v3  ;;  %v2136_v11 = vsel %vm432_vm0, %v6919_v47, %v2134_v63  ;;  %v2273_v43 = vmul.f32 %v2271_v22, %v6864_v30  ;;  %v1916_v12 = vadd.f32 %v1912_v51, %v1706_v13 }
 0x287   : > { %v2140_v16 = vadd.f32 %v2136_v11, %v2017_v53  ;;  %v2014_v57 = vmul.f32 %v2013_v58, %v6781_v29  ;;  %v2319_v17 = vstv %s7048_s17  ;;  %v1776_v23 = vadd.f32 %v1772_v36, %v1682_v35  ;;  %v7108_v53 = vpop.permute.xlu0 %2710  ;;  %v7891_v11 = vld [vmem:[#allocation39_spill] sm:$0xff]  ;;  %s7315_s17 = sld [smem:[#allocation3 + $0x84]] }
 0x288   : > { %v2011_v34 = vadd.f32 %v2009_v28, %v1941_v50  ;;  %v2321_v54 = vmul.f32 %v2319_v17, %v6869_v9  ;;  %v1953_v63 = vadd.f32 %v1951_v15, %v6692_v4  ;;  %v7106_v26 = vadd.f32 %v1962_v33, %v1916_v12  ;;  %v2130_v58 = vpop.permute.xlu1 %2129 }
 0x289   : > { %v2275_v13 = vadd.f32 %v2273_v43, %v2140_v16  ;;  %v2016_v51 = vadd.f32 %v2014_v57, %v6650_v14  ;;  %v1938_v50 = vmul.f32 %v1937_v49, %v6621_v3  ;;  %v2265_v35 = vstv %s7061_s9  ;;  %s7323_s9 = sld [smem:[#allocation3 + $0x86]] }
 0x28a   : > { %v2135_v28 = vsel %vm432_vm0, %v2130_v58, %v6919_v47  ;;  %v2021_v36 = vmul.f32 %v2019_v44, %v6807_v52  ;;  %v2105_v4 = vadd.f32 %v7891_v11, %v2011_v34  ;;  %v2272_v33 = vmul.f32 %v2271_v22, %v6842_v56 }
 0x28b   : > { %v2139_v15 = vadd.f32 %v2135_v28, %v2016_v51  ;;  %v7122_v43 = vadd.f32 %v2321_v54, %v2275_v13  ;;  %v1649_v14 = vstv %s7077_s23  ;;  %v1940_v49 = vadd.f32 %v1938_v50, %v1776_v23  ;;  %v7130_v44 = vpop.permute.xlu0 %2439  ;;  %s7331_s23 = sld [smem:[#allocation3 + $0x9e]] }
 0x28c   : > { %v2267_v47 = vmul.f32 %v2265_v35, %v6864_v30  ;;  %v2169_v16 = vpop.permute.xlu1 %2168  ;;  %v2023_v57 = vadd.f32 %v2021_v36, %v1953_v63  ;;  %v2008_v34 = vmul.f32 %v2007_v42, %v6781_v29  ;;  %v1650_v22 = vmul.f32 %v1649_v14, %v6549_v62 }
 0x28d   : > { %v7128_v12 = vadd.f32 %v2272_v33, %v2139_v15  ;;  %v2171_v54 = vsel %vm432_vm0, %v6980_v41, %v2169_v16  ;;  %v2313_v13 = vstv %s7094_s8  ;;  %v2279_v51 = vmul.f32 %v2277_v31, %v6864_v30  ;;  %s7341_s8 = sld [smem:[#allocation3 + $0x9f]] }
 0x28e   : > { %v2269_v23 = vadd.f32 %v2267_v47, %v2105_v4  ;;  %v2175_v58 = vadd.f32 %v2171_v54, %v2023_v57  ;;  %v2315_v50 = vmul.f32 %v2313_v13, %v6869_v9  ;;  %v1697_v63 = vstv %s7098_s6  ;;  %s7363_s6 = sld [smem:[#allocation3 + $0xa1]] }
 0x28f   : > { %v2325_v28 = vstv %s7103_s20  ;;  %v2010_v42 = vadd.f32 %v2008_v34, %v1940_v49  ;;  %v1652_v36 = vadd.f32 %v1650_v22, %v6938_v60  ;;  %v2436_v11 = vpop.permute.xlu0 %2435  ;;  %v2407_v15 = vsel %vm651_vm3, %v7028_v61, %v6885_v38 }
 0x290   : > { %v2281_v62 = vadd.f32 %v2279_v51, %v2175_v58  ;;  %v1876_v41 = vpop.permute.xlu1 %1875  ;;  %v2327_v4 = vmul.f32 %v2325_v28, %v6869_v9  ;;  %v2317_v33 = vadd.f32 %v2315_v50, %v2269_v23  ;;  %v1698_v49 = vmul.f32 %v1697_v63, %v6581_v2 }
 0x291   : > { %v2104_v31 = vadd.f32 %v6658_v10, %v2010_v42  ;;  %v2571_v60 = vstv %s7125_s30  ;;  %v2266_v16 = vmul.f32 %v2265_v35, %v6842_v56  ;;  %v1955_v54 = vstv %s7136_s21  ;;  %s293_s21 = scalar_lea.vmem %s7464_s4, %s4269_s26 }
 0x292   : > { %v7156_v47 = vadd.f32 %v2327_v4, %v2281_v62  ;;  %v2411_v57 = vadd.f32 %v2407_v15, %v2317_v33  ;;  %v1700_v38 = vadd.f32 %v1698_v49, %v1652_v36  ;;  %v2573_v23 = vmul.f32 %v2571_v60, %v6925_v45 }
 0x293   : > { %v7162_v34 = vpop.permute.xlu0 %2474  ;;  %v2268_v2 = vadd.f32 %v2266_v16, %v2104_v31  ;;  %v1956_v51 = vmul.f32 %v1955_v54, %v6621_v3  ;;  %v2314_v35 = vmul.f32 %v2313_v13, %v6856_v19  ;;  %v2406_v4 = vsel %vm651_vm3, %v6948_v59, %v7028_v61 }
 0x294   : > { %v1872_v22 = vpop.permute.xlu1 %1871  ;;  %v2575_v50 = vadd.f32 %v2573_v23, %v2411_v57  ;;  %v2619_v15 = vstv %s7152_s24  ;;  %v1651_v33 = vmul.f32 %v1649_v14, %v6545_v55  ;;  %v2877_v13 = vstv %s7159_s10 }
 0x295   : > { %v1877_v10 = vsel %vm870_vm5, %v1872_v22, %v7000_v37  ;;  %v2316_v31 = vadd.f32 %v2314_v35, %v2268_v2  ;;  %v2621_v3 = vmul.f32 %v2619_v15, %v6929_v18  ;;  %v2577_v61 = vstv %s7167_s27  ;;  %s298_s27 = scalar_lea.vmem %s7465_s5, %s4269_s26 }
 0x296   : > { %v1881_v58 = vadd.f32 %v1877_v10, %v1700_v38  ;;  %v1653_v38 = vadd.f32 %v1651_v33, %v6876_v48  ;;  %v2572_v10 = vmul.f32 %v2571_v60, %v6917_v21  ;;  %v2320_v2 = vmul.f32 %v2319_v17, %v6856_v19 }
 0x297   : > { %v7176_v36 = vpop.permute.xlu0 %2203  ;;  %v2410_v49 = vadd.f32 %v2406_v4, %v2316_v31  ;;  %v2623_v22 = vadd.f32 %v2621_v3, %v2575_v50  ;;  %v2879_v23 = vmul.f32 %v2877_v13, %v6969_v8  ;;  %v2579_v3 = vmul.f32 %v2577_v61, %v6925_v45 }
 0x298   : > { %v7174_v42 = vadd.f32 %v1956_v51, %v1881_v58  ;;  %v7178_v62 = vpop.permute.xlu1 %1910  ;;  %v1699_v58 = vmul.f32 %v1697_v63, %v6585_v32  ;;  %v2625_v51 = vstv %s7171_s28  ;;  %v2322_v60 = vadd.f32 %v2320_v2, %v7128_v12 }
 0x299   : > { %v2574_v48 = vadd.f32 %v2572_v10, %v2410_v49  ;;  %v2578_v33 = vmul.f32 %v2577_v61, %v6917_v21  ;;  %v2620_v12 = vmul.f32 %v2619_v15, %v6935_v39  ;;  %v1657_v49 = vmul.f32 %v1655_v20, %v6545_v55 }
 0x29a   : > { %v1701_v17 = vadd.f32 %v1699_v58, %v1653_v38  ;;  %v2627_v61 = vmul.f32 %v2625_v51, %v6929_v18  ;;  %v1957_v2 = vmul.f32 %v1955_v54, %v6803_v7  ;;  %v2878_v55 = vmul.f32 %v2877_v13, %v6962_v6 }
 0x29b   : > { %v7189_v16 = vpop.permute.xlu0 %2199  ;;  %v2583_v20 = vstv %s7195_s12  ;;  %vm3036_vm1 = vcmp.eq.s32.totalorder %v7883_v5, 0  ;;  %vm3126_vm2 = vcmp.eq.s32.totalorder %v7883_v5, 1  ;;  %vm3306_vm4 = vcmp.eq.s32.totalorder %v7883_v5, 3 }
 0x29c   : > { %v2709_v57 = vpop.permute.xlu1 %2708  ;;  %vm3486_vm6 = vcmp.eq.s32.totalorder %v7883_v5, 5 }
 0x29d   : > { %v2713_v59 = vsel %vm870_vm5, %v2709_v57, %v7108_v53  ;;  %v1878_v53 = vsel %vm870_vm5, %v7000_v37, %v1876_v41 }
 0x29e   : > { %v2717_v14 = vadd.f32 %v2713_v59, %v2623_v22  ;;  %v2626_v22 = vmul.f32 %v2625_v51, %v6935_v39  ;;  %v1705_v51 = vmul.f32 %v1703_v46, %v6585_v32 }
 0x29f   : > { %v7208_v35 = vpop.permute.xlu0 %2238 }
 0x2a0   : > { %v2438_v50 = vpop.permute.xlu1 %2437  ;;  %v2881_v4 = vadd.f32 %v2879_v23, %v2717_v14  ;;  %v2622_v14 = vadd.f32 %v2620_v12, %v2574_v48  ;;  %v1659_v23 = vadd.f32 %v1657_v49, %v6964_v24  ;;  %v2585_v24 = vmul.f32 %v2583_v20, %v6925_v45 }
 0x2a1   : > { %v2441_v63 = vsel %vm651_vm3, %v2436_v11, %v2438_v50  ;;  %v2442_v31 = vsel %vm651_vm3, %v2438_v50, %v7130_v44  ;;  %v1882_v11 = vadd.f32 %v1878_v53, %v1701_v17  ;;  %v2025_v44 = vstv %s7187_s29 }
 0x2a2   : > { %v2445_v37 = vadd.f32 %v2441_v63, %v2322_v60  ;;  %v2446_v41 = vadd.f32 %v2442_v31, %v7122_v43  ;;  %3039 = vmatprep.subr.mxu1 %v2881_v4  ;;  %v2026_v54 = vmul.f32 %v2025_v44, %v6781_v29  ;;  %v2283_v17 = vstv %s7211_s25 }
 0x2a3   : > { %v7227_v10 = vpop.permute.xlu0 %2743  ;;  %v1959_v48 = vadd.f32 %v1957_v2, %v1882_v11  ;;  %v2027_v63 = vmul.f32 %v2025_v44, %v6807_v52  ;;  %v1913_v31 = vsel %vm870_vm5, %v7055_v40, %v7178_v62  ;;  %v7892_v49 = vstv %s7032_s16  ;;  %s7309_s16 = sld [smem:[#allocation3 + $0x83]] }
 0x2a4   : > { %v2580_v38 = vadd.f32 %v2578_v33, %v2445_v37  ;;  %v2581_v59 = vadd.f32 %v2579_v3, %v2446_v41  ;;  %v2707_v43 = vpop.permute.xlu1 %2706  ;;  %v2631_v3 = vstv %s7217_s11  ;;  %v1707_v37 = vadd.f32 %v1705_v51, %v1659_v23 }
 0x2a5   : > { %v2712_v15 = vsel %vm870_vm5, %v2707_v43, %v2709_v57  ;;  %v2883_v57 = vstv %s7204_s7  ;;  %v1963_v40 = vmul.f32 %v7892_v49, %v6803_v7  ;;  %v2029_v62 = vadd.f32 %v2027_v63, %v1959_v48 }
 0x2a6   : > { %v2716_v58 = vadd.f32 %v2712_v15, %v2622_v14  ;;  %v2628_v53 = vadd.f32 %v2626_v22, %v2580_v38  ;;  %v7235_v50 = vadd.f32 %v2627_v61, %v2581_v59  ;;  %v2884_v12 = vmul.f32 %v2883_v57, %v6962_v6 }
 0x2a7   : > { %v2742_v13 = vpop.permute.xlu0 %2741  ;;  %v2633_v11 = vmul.f32 %v2631_v3, %v6929_v18  ;;  %v2028_v59 = vadd.f32 %v2026_v54, %v7174_v42  ;;  %v2284_v14 = vmul.f32 %v2283_v17, %v6842_v56  ;;  %v2285_v61 = vmul.f32 %v2283_v17, %v6864_v30 }
 0x2a8   : > { %v2880_v60 = vadd.f32 %v2878_v55, %v2716_v58  ;;  %v2473_v4 = vpop.permute.xlu1 %2472  ;;  %v2747_v32 = vsel %vm870_vm5, %v2742_v13, %v7227_v10  ;;  %v2331_v23 = vstv %s7237_s15 }
 0x2a9   : > { %v2477_v46 = vsel %vm651_vm3, %v2473_v4, %v7162_v34  ;;  %v2751_v41 = vadd.f32 %v2747_v32, %v2628_v53  ;;  %v2326_v34 = vmul.f32 %v2325_v28, %v6856_v19  ;;  %v2333_v42 = vmul.f32 %v2331_v23, %v6869_v9 }
 0x2aa   : > { %v2481_v33 = vadd.f32 %v2477_v46, %v7156_v47  ;;  %3040 = vmatpush1.msra.mxu1 %v2880_v60  ;;  %v1917_v47 = vadd.f32 %v1913_v31, %v1707_v37  ;;  %v2031_v60 = vstv %s7254_s22  ;;  %v2289_v31 = vstv %s7269_s19 }
 0x2ab   : > { %4057 = vmatmul.mubr.msk.f32.vlgmr.msra.gmra.mrb[4].mxu1 %vm2942_vm7, %v7020_v27  ;;  %v2781_v44 = vpop.permute.xlu0 %2780  ;;  %v7274_v7 = vadd.f32 %v2884_v12, %v2751_v41  ;;  %v2328_v51 = vadd.f32 %v2326_v34, %v7053_v0  ;;  %v2033_v17 = vmul.f32 %v2031_v60, %v6807_v52  ;;  %v2632_v41 = vmul.f32 %v2631_v3, %v6935_v39 }
 0x2ac   : > { %v2587_v22 = vadd.f32 %v2585_v24, %v2481_v33  ;;  %v2202_v38 = vpop.permute.xlu1 %2201  ;;  %3109 = vmatprep.mubr.f32.mxu1 %v7885_v1  ;;  %v2584_v24 = vmul.f32 %v2583_v20, %v6917_v21  ;;  %v2291_v12 = vmul.f32 %v2289_v31, %v6864_v30  ;;  %v2032_v49 = vmul.f32 %v2031_v60, %v6781_v29 }
 0x2ad   : > { %v2205_v43 = vsel %vm432_vm0, %v7189_v16, %v2202_v38  ;;  %v2206_v28 = vsel %vm432_vm0, %v2202_v38, %v7176_v36  ;;  %v1965_v16 = vadd.f32 %v1963_v40, %v1917_v47  ;;  %v2337_v52 = vstv %s7286_s13 }
 0x2ae   : > { %v2209_v2 = vadd.f32 %v2205_v43, %v2028_v59  ;;  %v2210_v15 = vadd.f32 %v2206_v28, %v2029_v62  ;;  %v2635_v55 = vadd.f32 %v2633_v11, %v2587_v22  ;;  %v2034_v34 = vadd.f32 %v2032_v49, %v7106_v26 }
 0x2af   : > { %4058 = vmatmul.mubr.msk.f32.gmra.mrb[6].mxu1 %vm2942_vm7, %v7066_v25  ;;  %v2510_v53 = vpop.permute.xlu0 %2509  ;;  %v2035_v37 = vadd.f32 %v2033_v17, %v1965_v16  ;;  %v2339_v3 = vmul.f32 %v2337_v52, %v6869_v9  ;;  %v2290_v30 = vmul.f32 %v2289_v31, %v6842_v56  ;;  %v2885_v26 = vmul.f32 %v2883_v57, %v6969_v8 }
 0x2b0   : > { %v2286_v58 = vadd.f32 %v2284_v14, %v2209_v2  ;;  %v2287_v36 = vadd.f32 %v2285_v61, %v2210_v15  ;;  %v2471_v48 = vpop.permute.xlu1 %2470  ;;  %3283 = vmatprep.mubr.f32.mxu1 %v7885_v1  ;;  %v2889_v43 = vstv %s7300_s14  ;;  %v2637_v16 = vstv %s7315_s17 }
 0x2b1   : > { %v2476_v54 = vsel %vm651_vm3, %v2471_v48, %v2473_v4  ;;  %v2891_v15 = vmul.f32 %v2889_v43, %v6969_v8 }
 0x2b2   : > { %v2480_v13 = vadd.f32 %v2476_v54, %v2328_v51  ;;  %v2335_v63 = vadd.f32 %v2333_v42, %v2287_v36 }
 0x2b3   : > { %v2506_v33 = vpop.permute.xlu0 %2505 }
 0x2b4   : > { %v2586_v32 = vadd.f32 %v2584_v24, %v2480_v13  ;;  %v2237_v46 = vpop.permute.xlu1 %2236  ;;  %v2638_v13 = vmul.f32 %v2637_v16, %v6935_v39 }
 0x2b5   : > { %v2241_v0 = vsel %vm432_vm0, %v2237_v46, %v7208_v35 }
 0x2b6   : > { %v2245_v4 = vadd.f32 %v2241_v0, %v2035_v37  ;;  %v2634_v20 = vadd.f32 %v2632_v41, %v2586_v32  ;;  %v2595_v0 = vstv %s7331_s23 }
 0x2b7   : > { %v2545_v29 = vpop.permute.xlu0 %2544 }
 0x2b8   : > { %v2293_v40 = vadd.f32 %v2291_v12, %v2245_v4  ;;  %v2235_v62 = vpop.permute.xlu1 %2234 }
 0x2b9   : > { %v2240_v35 = vsel %vm432_vm0, %v2235_v62, %v2237_v46  ;;  %v2890_v46 = vmul.f32 %v2889_v43, %v6962_v6  ;;  %vm3599_vm0 = vcmask 1042432  }
 0x2ba   : > { %v2244_v11 = vadd.f32 %v2240_v35, %v2034_v34  ;;  %v2341_v47 = vadd.f32 %v2339_v3, %v2293_v40  ;;  %v2597_v34 = vmul.f32 %v2595_v0, %v6925_v45  ;;  %v2643_v35 = vstv %s7341_s8 }
 0x2bb   : > { %v7325_v61 = vpop.permute.xlu0 %2813 }
 0x2bc   : > { %v7311_v22 = vadd.f32 %v2290_v30, %v2244_v11  ;;  %v2746_v38 = vpop.permute.xlu1 %2745 }
 0x2bd   : > { %v2748_v59 = vsel %vm870_vm5, %v7227_v10, %v2746_v38  ;;  %v2332_v10 = vmul.f32 %v2331_v23, %v6856_v19 }
 0x2be   : > { %v2752_v9 = vadd.f32 %v2748_v59, %v7235_v50  ;;  %v2589_v50 = vstv %s7309_s16 }
 0x2bf   : > { %v2334_v42 = vadd.f32 %v2332_v10, %v2286_v58  ;;  %v2591_v51 = vmul.f32 %v2589_v50, %v6925_v45  ;;  %v2812_v58 = vpop.permute.xlu0 %2811  ;;  %v2645_v45 = vmul.f32 %v2643_v35, %v6929_v18 }
 0x2c0   : > { %v2779_v56 = vpop.permute.xlu1 %2778  ;;  %v2887_v28 = vadd.f32 %v2885_v26, %v2752_v9  ;;  %v2817_v41 = vsel %vm870_vm5, %v2812_v58, %v7325_v61  ;;  %v2644_v26 = vmul.f32 %v2643_v35, %v6935_v39 }
 0x2c1   : > { %v2783_v14 = vsel %vm870_vm5, %v2779_v56, %v2781_v44 }
 0x2c2   : > { %v2787_v2 = vadd.f32 %v2783_v14, %v2635_v55  ;;  %3129 = vmatprep.subr.mxu0 %v2887_v28  ;;  %v2901_v28 = vstv %s7363_s6 }
 0x2c3   : > { %3130 = vmatpush1.msra.mxu0 %v7274_v7  ;;  %v2590_v7 = vmul.f32 %v2589_v50, %v6917_v21  ;;  %v2851_v14 = vpop.permute.xlu0 %2850  ;;  %v2903_v50 = vmul.f32 %v2901_v28, %v6969_v8 }
 0x2c4   : > { %v2508_v57 = vpop.permute.xlu1 %2507  ;;  %4059 = vmatmul.mubr.msk.f32.vlgmr.msra.gmra.mrb[0].mxu0 %vm2942_vm7, %v7020_v27  ;;  %v2893_v44 = vadd.f32 %v2891_v15, %v2787_v2 }
 0x2c5   : > { %v2511_v36 = vsel %vm651_vm3, %v2506_v33, %v2508_v57  ;;  %v2512_v55 = vsel %vm651_vm3, %v2508_v57, %v2510_v53  ;;  %3199 = vmatprep.mubr.f32.mxu0 %v7885_v1  ;;  %v2639_v53 = vmul.f32 %v2637_v16, %v6929_v18 }
 0x2c6   : > { %v2515_v23 = vadd.f32 %v2511_v36, %v2334_v42  ;;  %v2516_v48 = vadd.f32 %v2512_v55, %v2335_v63  ;;  %3219 = vmatprep.subr.mxu1 %v2893_v44  ;;  %v2895_v63 = vstv %s7323_s9  ;;  %v2902_v44 = vmul.f32 %v2901_v28, %v6962_v6  ;;  %v7893_v36 = vld [vmem:[#allocation29_spill] sm:$0xff] }
 0x2c7   : > { %v2896_v49 = vmul.f32 %v2895_v63, %v6962_v6  ;;  %v2897_v18 = vmul.f32 %v2895_v63, %v6969_v8 }
 0x2c8   : > { %v2592_v54 = vadd.f32 %v2590_v7, %v2515_v23  ;;  %v2593_v60 = vadd.f32 %v2591_v51, %v2516_v48  ;;  %v2777_v24 = vpop.permute.xlu1 %2776  ;;  %4060 = vmatmul.mubr.msk.f32.gmra.mrb[2].mxu0 %vm2942_vm7, %v7066_v25 }
 0x2c9   : > { %v2782_v17 = vsel %vm870_vm5, %v2777_v24, %v2779_v56  ;;  %3373 = vmatprep.mubr.f32.mxu0 %v7885_v1 }
 0x2ca   : > { %v2640_v31 = vadd.f32 %v2638_v13, %v2592_v54  ;;  %v2786_v32 = vadd.f32 %v2782_v17, %v2634_v20  ;;  %v2641_v37 = vadd.f32 %v2639_v53, %v2593_v60  ;;  %v2338_v20 = vmul.f32 %v2337_v52, %v6856_v19 }
 0x2cb   : > { %v2596_v19 = vmul.f32 %v2595_v0, %v6917_v21 }
 0x2cc   : > { %v2821_v33 = vadd.f32 %v2817_v41, %v2640_v31  ;;  %v2892_v4 = vadd.f32 %v2890_v46, %v2786_v32  ;;  %v2543_v12 = vpop.permute.xlu1 %2542  ;;  %v2340_v38 = vadd.f32 %v2338_v20, %v7311_v22 }
 0x2cd   : > { %v2547_v40 = vsel %vm651_vm3, %v2543_v12, %v2545_v29 }
 0x2ce   : > { %v2551_v62 = vadd.f32 %v2547_v40, %v2341_v47  ;;  %3220 = vmatpush1.msra.mxu1 %v2892_v4  ;;  %v2898_v3 = vadd.f32 %v2896_v49, %v2821_v33 }
 0x2cf   : > { %4061 = vmatmul.mubr.msk.f32.vlgmr.msra.gmra.mrb[8].mxu1 %vm2942_vm7, %v7020_v27 }
 0x2d0   : > { %v2599_v11 = vadd.f32 %v2597_v34, %v2551_v62  ;;  %v2541_v30 = vpop.permute.xlu1 %2540  ;;  %3289 = vmatprep.mubr.f32.mxu1 %v7885_v1 }
 0x2d1   : > { %v2546_v47 = vsel %vm651_vm3, %v2541_v30, %v2543_v12  ;;  %vm3216_vm3 = vcmp.eq.s32.totalorder %v7883_v5, 2 }
 0x2d2   : > { %v2550_v29 = vadd.f32 %v2546_v47, %v2340_v38  ;;  %v2647_v52 = vadd.f32 %v2645_v45, %v2599_v11 }
 0x2d3   : > { %4062 = vmatmul.mubr.msk.f32.gmra.mrb[10].mxu1 %vm2942_vm7, %v7066_v25  ;;  %v2926_v8 = vpop.permute.xlu0 %2925 }
 0x2d4   : > { %v2598_v59 = vadd.f32 %v2596_v19, %v2550_v29  ;;  %v2816_v9 = vpop.permute.xlu1 %2815  ;;  %3463 = vmatprep.mubr.f32.mxu1 %v7885_v1  ;;  %vm2930_vm10 = vcmp.eq.s32.totalorder %v7883_v5, %v2926_v8  ;;  %vm2931_vm11 = vcmp.eq.s32.totalorder %v7893_v36, %v2926_v8 }
 0x2d5   : > { %v2818_v22 = vsel %vm870_vm5, %v7325_v61, %v2816_v9  ;;  %v7395_v6 = vsel %vm2930_vm10, 1.0, %v7885_v1  ;;  %v7398_v55 = vsel %vm2931_vm11, 1.0, %v7885_v1  ;;  %vm3592_vm10 = vcmask 23552  }
 0x2d6   : > { %v2822_v43 = vadd.f32 %v2818_v22, %v2641_v37  ;;  %v2646_v56 = vadd.f32 %v2644_v26, %v2598_v59  ;;  %vm3765_vm11 = vcmask 121856  }
 0x2d8   : > { %v2849_v21 = vpop.permute.xlu1 %2848  ;;  %v2899_v2 = vadd.f32 %v2897_v18, %v2822_v43 }
 0x2d9   : > { %v2853_v10 = vsel %vm870_vm5, %v2849_v21, %v2851_v14 }
 0x2da   : > { %v2857_v15 = vadd.f32 %v2853_v10, %v2647_v52  ;;  %3309 = vmatprep.subr.mxu0 %v2899_v2 }
 0x2db   : > { %3310 = vmatpush1.msra.mxu0 %v2898_v3 }
 0x2dc   : > { %v2847_v39 = vpop.permute.xlu1 %2846  ;;  %4063 = vmatmul.mubr.msk.f32.vlgmr.msra.gmra.mrb[4].mxu0 %vm2942_vm7, %v7020_v27  ;;  %v2905_v61 = vadd.f32 %v2903_v50, %v2857_v15 }
 0x2dd   : > { %v2852_v57 = vsel %vm870_vm5, %v2847_v39, %v2849_v21  ;;  %3379 = vmatprep.mubr.f32.mxu0 %v7885_v1  ;;  %vm3396_vm5 = vcmp.eq.s32.totalorder %v7883_v5, 4 }
 0x2de   : > { %v2856_v42 = vadd.f32 %v2852_v57, %v2646_v56  ;;  %3399 = vmatprep.subr.mxu1 %v2905_v61 }
 0x2e0   : > { %v2904_v16 = vadd.f32 %v2902_v44, %v2856_v42  ;;  %4064 = vmatmul.mubr.msk.f32.gmra.mrb[6].mxu0 %vm2942_vm7, %v7066_v25 }
 0x2e2   : > { %3400 = vmatpush1.msra.mxu1 %v2904_v16  ;;  %v2929_v48 = vpop.permute.xlu1 %2928 }
 0x2e3   : > { %4065 = vmatmul.mubr.msk.f32.vlgmr.msra.gmra.mrb[12].mxu1 %vm2942_vm7, %v7020_v27  ;;  %vm2932_vm12 = vcmp.eq.s32.totalorder %v7883_v5, %v2929_v48  ;;  %vm2933_vm13 = vcmp.eq.s32.totalorder %v7893_v36, %v2929_v48 }
 0x2e4   : > { %3469 = vmatprep.mubr.f32.mxu1 %v7885_v1  ;;  %v4053_v58 = vsel %vm2932_vm12, 1.0, %v7885_v1  ;;  %v4054_v60 = vsel %vm2933_vm13, 1.0, %v7885_v1 }
 0x2e7   : > { %4066 = vmatmul.mubr.msk.f32.gmra.mrb[14].mxu1 %vm2942_vm7, %v7066_v25  ;;  %vm3489_vm7 = vcmask 48128  }
 0x351   : > { %v3015_v23 = vpop.f32.mrb[0].mxu1 }
 0x352   : > { %v3026_v27 = vmul.f32 %v7395_v6, %v3015_v23  ;;  %v3017_v7 = vpop.f32.mrb[1].mxu1 }
 0x353   : > { %v3027_v51 = vmul.f32 %v7398_v55, %v3017_v7  ;;  %v7894_v7 = vlaneseq }
 0x355   : > { %v3030_v25 = vadd.f32 %v3027_v51, %v3026_v27  ;;  %v3500_v51 = vshrl.u32 %v7894_v7, 7 }
 0x357   : > { %3031 = vadd.xlane.f32.xlu1 %v3030_v25  ;;  %v3021_v54 = vpop.f32.mrb[2].mxu1  ;;  %v3504_v25 = vadd.s32 3, %v3500_v51  ;;  %vm3501_vm15 = vcmp.eq.s32.totalorder %v7883_v5, %v3500_v51 }
 0x358   : > { %v3028_v13 = vmul.f32 %v4053_v58, %v3021_v54  ;;  %v3023_v24 = vpop.f32.mrb[3].mxu1 }
 0x359   : > { %v3029_v53 = vmul.f32 %v4054_v60, %v3023_v24  ;;  %vm3505_vm14 = vcmp.eq.s32.totalorder %v7883_v5, %v3504_v25 }
 0x35b   : > { %v3033_v17 = vadd.f32 %v3029_v53, %v3028_v13 }
 0x37e   : > { %v3105_v63 = vpop.f32.mrb[4].mxu1 }
 0x37f   : > { %v3116_v31 = vmul.f32 %v7395_v6, %v3105_v63  ;;  %v3107_v32 = vpop.f32.mrb[5].mxu1 }
 0x380   : > { %v3117_v46 = vmul.f32 %v7398_v55, %v3107_v32 }
 0x382   : > { %v3120_v37 = vadd.f32 %v3117_v46, %v3116_v31  ;;  %v3111_v41 = vpop.f32.mrb[6].mxu1 }
 0x383   : > { %v3118_v0 = vmul.f32 %v4053_v58, %v3111_v41  ;;  %v3113_v33 = vpop.f32.mrb[7].mxu1 }
 0x384   : > { %v3119_v4 = vmul.f32 %v4054_v60, %v3113_v33 }
 0x386   : > { %v3123_v12 = vadd.f32 %v3119_v4, %v3118_v0  ;;  %v3678_v4 = vadd.s32 9, %v3500_v51 }
 0x388   : > { %vm3679_vm9 = vcmp.eq.s32.totalorder %v7883_v5, %v3678_v4 }
 0x397   : > { %v3195_v49 = vpop.f32.mrb[0].mxu0 }
 0x398   : > { %v3206_v40 = vmul.f32 %v7395_v6, %v3195_v49  ;;  %v3197_v62 = vpop.f32.mrb[1].mxu0 }
 0x399   : > { %v3207_v34 = vmul.f32 %v7398_v55, %v3197_v62 }
 0x39b   : > { %v3210_v20 = vadd.f32 %v3207_v34, %v3206_v40  ;;  %v3201_v3 = vpop.f32.mrb[2].mxu0 }
 0x39c   : > { %v3208_v35 = vmul.f32 %v4053_v58, %v3201_v3  ;;  %v3203_v11 = vpop.f32.mrb[3].mxu0 }
 0x39d   : > { %v3209_v30 = vmul.f32 %v4054_v60, %v3203_v11  ;;  %3211 = vadd.xlane.f32.xlu0 %v3210_v20  ;;  %v2910_v11 = vld [vmem:[%s293_s21] sm:$0xff] }
 0x39f   : > { %v3213_v38 = vadd.f32 %v3209_v30, %v3208_v35 }
 0x3a1   : > { %3034 = vadd.xlane.f32.xlu0 %v3033_v17  ;;  %3214 = vadd.xlane.f32.xlu1 %v3213_v38  ;;  %v4075_v38 = vsel %vm3679_vm9, 1.0, %v7885_v1 }
 0x3a2   : > { %v3285_v45 = vpop.f32.mrb[8].mxu1 }
 0x3a3   : > { %v3296_v47 = vmul.f32 %v7395_v6, %v3285_v45  ;;  %v3287_v29 = vpop.f32.mrb[9].mxu1 }
 0x3a4   : > { %v3297_v19 = vmul.f32 %v7398_v55, %v3287_v29 }
 0x3a5   : > { %3121 = vadd.xlane.f32.xlu0 %v3120_v37  ;;  %3124 = vadd.xlane.f32.xlu1 %v3123_v12 }
 0x3a6   : > { %v3300_v52 = vadd.f32 %v3297_v19, %v3296_v47  ;;  %v3291_v59 = vpop.f32.mrb[10].mxu1 }
 0x3a7   : > { %v3298_v9 = vmul.f32 %v4053_v58, %v3291_v59  ;;  %v3293_v26 = vpop.f32.mrb[11].mxu1  ;;  %v2911_v59 = vld [vmem:[%s293_s21 + $0x8] sm:$0xff] }
 0x3a8   : > { %v3299_v22 = vmul.f32 %v4054_v60, %v3293_v26 }
 0x3aa   : > { %v3303_v43 = vadd.f32 %v3299_v22, %v3298_v9 }
 0x3af   : > { %v3375_v18 = vpop.f32.mrb[4].mxu0 }
 0x3b0   : > { %v3386_v56 = vmul.f32 %v7395_v6, %v3375_v18  ;;  %v3377_v28 = vpop.f32.mrb[5].mxu0 }
 0x3b1   : > { %v3387_v14 = vmul.f32 %v7398_v55, %v3377_v28 }
 0x3b3   : > { %v3390_v21 = vadd.f32 %v3387_v14, %v3386_v56  ;;  %v3381_v2 = vpop.f32.mrb[6].mxu0 }
 0x3b4   : > { %v3388_v10 = vmul.f32 %v4053_v58, %v3381_v2  ;;  %v3383_v15 = vpop.f32.mrb[7].mxu0 }
 0x3b5   : > { %v3389_v50 = vmul.f32 %v4054_v60, %v3383_v15  ;;  %3391 = vadd.xlane.f32.xlu0 %v3390_v21 }
 0x3b6   : > { %v3465_v39 = vpop.f32.mrb[12].mxu1 }
 0x3b7   : > { %v3393_v61 = vadd.f32 %v3389_v50, %v3388_v10  ;;  %v3476_v57 = vmul.f32 %v7395_v6, %v3465_v39  ;;  %v3467_v42 = vpop.f32.mrb[13].mxu1  ;;  %v4068_v6 = vsel %vm3505_vm14, 1.0, %v7885_v1 }
 0x3b8   : > { %v3477_v44 = vmul.f32 %v7398_v55, %v3467_v42  ;;  %4095 = vmatprep.subr.msk.mxu0 %vm1978_vm8, %v4068_v6  ;;  %v4067_v55 = vsel %vm3501_vm15, 1.0, %v7885_v1 }
 0x3b9   : > { %3301 = vadd.xlane.f32.xlu0 %v3300_v52  ;;  %3394 = vadd.xlane.f32.xlu1 %v3393_v61 }
 0x3ba   : > { %v3480_v16 = vadd.f32 %v3477_v44, %v3476_v57  ;;  %v3471_v8 = vpop.f32.mrb[14].mxu1  ;;  %4096 = vmatpush3.msk.msra.mxu0 %vm1978_vm8, %v4068_v6 }
 0x3bb   : > { %v3478_v36 = vmul.f32 %v4053_v58, %v3471_v8  ;;  %v3473_v23 = vpop.f32.mrb[15].mxu1  ;;  %4100 = vmatprep.subr.msk.mxu0 %vm3599_vm0, %v4067_v55 }
 0x3bc   : > { %v3479_v48 = vmul.f32 %v4054_v60, %v3473_v23 }
 0x3bd   : > { %3481 = vadd.xlane.f32.xlu0 %v3480_v16  ;;  %3304 = vadd.xlane.f32.xlu1 %v3303_v43 }
 0x3be   : > { %v3483_v27 = vadd.f32 %v3479_v48, %v3478_v36 }
 0x3c1   : > { %3484 = vadd.xlane.f32.xlu1 %v3483_v27 }
 0x3e4   : > { %v3032_v54 = vpop.xlane.xlu1 %3031 }
 0x3e5   : > { %v3037_v53 = vsel %vm3036_vm1, %v3032_v54, 0.0 }
 0x42a   : > { %v3212_v58 = vpop.xlane.xlu0 %3211 }
 0x42e   : > { %v3035_v60 = vpop.xlane.xlu0 %3034  ;;  %v3215_v13 = vpop.xlane.xlu1 %3214 }
 0x42f   : > { %v3038_v32 = vsel %vm3036_vm1, %v3035_v60, 0.0 }
 0x432   : > { %v3122_v24 = vpop.xlane.xlu0 %3121  ;;  %v3125_v17 = vpop.xlane.xlu1 %3124 }
 0x433   : > { %v3127_v31 = vsel %vm3126_vm2, %v3122_v24, %v3037_v53  ;;  %v3128_v0 = vsel %vm3126_vm2, %v3125_v17, %v3038_v32 }
 0x434   : > { %v3217_v37 = vsel %vm3216_vm3, %v3212_v58, %v3127_v31  ;;  %v3218_v40 = vsel %vm3216_vm3, %v3215_v13, %v3128_v0 }
 0x442   : > { %v3392_v63 = vpop.xlane.xlu0 %3391 }
 0x446   : > { %v3302_v46 = vpop.xlane.xlu0 %3301  ;;  %v3395_v41 = vpop.xlane.xlu1 %3394 }
 0x447   : > { %v3307_v33 = vsel %vm3306_vm4, %v3302_v46, %v3217_v37 }
 0x448   : > { %v3397_v49 = vsel %vm3396_vm5, %v3392_v63, %v3307_v33 }
 0x44a   : > { %v3482_v12 = vpop.xlane.xlu0 %3481  ;;  %v3305_v62 = vpop.xlane.xlu1 %3304 }
 0x44b   : > { %v3487_v34 = vsel %vm3486_vm6, %v3482_v12, %v3397_v49  ;;  %v3308_v20 = vsel %vm3306_vm4, %v3305_v62, %v3218_v40 }
 0x44c   : > { %4097 = vmatprep.mubr.msk.f32.mxu0 %vm3489_vm7, %v3487_v34  ;;  %v3398_v3 = vsel %vm3396_vm5, %v3395_v41, %v3308_v20  ;;  %v3490_v45 = vsel %vm3489_vm7, %v3487_v34, -inf }
 0x44e   : > { %v3485_v35 = vpop.xlane.xlu1 %3484 }
 0x44f   : > { %v3488_v30 = vsel %vm3486_vm6, %v3485_v35, %v3398_v3 }
 0x450   : > { %v3491_v47 = vsel %vm3489_vm7, %v3488_v30, -inf  ;;  %4098 = vmatmul.mubr.msk.f32.vlgmr.msra.gmra.mrb[8].mxu0 %vm3489_vm7, %v3488_v30 }
 0x451   : > { %v3492_v29 = vmax.f32 %v3490_v45, %v3491_v47  ;;  %4101 = vmatpush3.msk.msra.mxu0 %vm3599_vm0, %v4067_v55  ;;  %4102 = vmatprep.mubr.msk.f32.mxu0 %vm3592_vm10, %v2910_v11 }
 0x452   : > { %4105 = vmatprep.subr.msk.mxu0 %vm1978_vm8, %v4075_v38 }
 0x453   : > { %v3493_v19 = vrot.slane %v3492_v29, 4 }
 0x455   : > { %v3494_v52 = vmax.f32 %v3492_v29, %v3493_v19 }
 0x457   : > { %v3495_v5 = vrot.slane %v3494_v52, 2 }
 0x458   : > { %4103 = vmatmul.mubr.msk.f32.vlgmr.msra.gmra.mrb[8].mxu0 %vm3592_vm10, %v2911_v59 }
 0x459   : > { %v3496_v9 = vmax.f32 %v3494_v52, %v3495_v5  ;;  %4106 = vmatpush3.msk.msra.mxu0 %vm1978_vm8, %v4075_v38 }
 0x45b   : > { %v3497_v1 = vrot.slane %v3496_v9, 1 }
 0x45d   : > { %v3498_v26 = vmax.f32 %v3496_v9, %v3497_v1 }
 0x45f   : > { %4107 = vmatprep.mubr.msk.f32.mxu0 %vm3489_vm7, %v3498_v26 }
 0x460   : > { %4108 = vmatmul.mubr.msk.f32.vlgmr.msra.gmra.mrb[8].mxu0 %vm3489_vm7, %v3498_v26 }
 0x533   : > { %v4109_v22 = vpop.f32.mrb[8].mxu0 }
 0x534   : > { %3767 = vst.msk [vmem:[%s298_s27 + $0x8] sm:$0xff] %vm3765_vm11, %v4109_v22  ;;  %v3754_v43 = vpop.f32.mrb[9].mxu0 }
 0x535   : > { %3766 = vst.msk [vmem:[%s298_s27] sm:$0xff] %vm3765_vm11, %v3754_v43 }
 0x536 PF: > { %s16_s18 = sadd.s32 1, %s4186_s18  }
 0x537   : > { %p13_p1 = scmp.ge.s32.totalorder %s16_s18, 4  }
 0x539   :  { %15 = sbr.rel (!%p13_p1) target bundleno = 1 (0x1), region = 84 }
 0x540   :  { %3789 = vsyncpa [#allocation4], 1 }
 0x541   :  { %3791 = vsyncpa [#allocation4 + $0x1], 1 }

</bundles_post_ra>
